<compile_context>
chip_gen: v7x
topology: tpu7x:2x2x1
jax: 0.10.0
libtpu: 0.0.40
codegen_flags: <defaults>
</compile_context>

<pallas_src>
import math
import jax
import jax.numpy as jnp
from jax.experimental import pallas as pl
from jax.experimental.pallas import tpu as pltpu


# ---------------------------------------------------------------------------
# Fused Pallas kernel
# ---------------------------------------------------------------------------
def _lstm_cell(pre, c_prev):
    """pre = [i, f, g, o] pre-activations, each (B, H)."""
    i_g = jax.nn.sigmoid(pre[0])
    f_g = jax.nn.sigmoid(pre[1])
    g_g = jnp.tanh(pre[2])
    o_g = jax.nn.sigmoid(pre[3])
    c_new = f_g * c_prev + i_g * g_g
    h_new = o_g * jnp.tanh(c_new)
    return h_new, c_new


def make_sentiment_kernel(no_layers, T, Bp):
    """Build the fused kernel for a fixed (static) layer count / seq len / padded batch."""
    n_w = 3 * no_layers

    def kernel(*args):
        emb_ref = args[0]                # (T*Bp, E)   time-major flattened embeddings
        h0_ref = args[1]                 # (L, Bp, H)
        c0_ref = args[2]                 # (L, Bp, H)
        w_refs = args[3:3 + n_w]         # per layer: wih (4,in,H), whh (4,H,H), b (4,1,H)
        fcw_ref = args[3 + n_w]          # (H, O)
        fcb_ref = args[4 + n_w]          # (1, O)
        out_ref = args[5 + n_w]          # (Bp, O)
        hN_ref = args[6 + n_w]           # (L, Bp, H)
        cN_ref = args[7 + n_w]           # (L, Bp, H)
        xp_refs = args[8 + n_w:]         # 4 x (T*Bp, H) scratch: hoisted per-gate projection

        wih0, b0 = w_refs[0], w_refs[2]

        # --- Hoisted layer-0 input projection: one (T*Bp, E) x (E, H) matmul per gate. ---
        x_flat = emb_ref[...]
        for g in range(4):
            xp_refs[g][...] = (
                jnp.dot(x_flat, wih0[g], preferred_element_type=jnp.float32) + b0[g])

        h_init = tuple(h0_ref[l] for l in range(no_layers))
        c_init = tuple(c0_ref[l] for l in range(no_layers))

        def step(t, carry):
            hs, cs = carry
            row = t * Bp
            if not isinstance(row, int):          # alignment hint when t is traced
                row = pl.multiple_of(row, Bp)
            new_hs, new_cs = [], []

            # Layer 0: input projection precomputed -> only h_prev @ W_hh on critical path.
            whh0 = w_refs[1]
            pre = [xp_refs[g][pl.ds(row, Bp), :]
                   + jnp.dot(hs[0], whh0[g], preferred_element_type=jnp.float32)
                   for g in range(4)]
            h_new, c_new = _lstm_cell(pre, cs[0])
            new_hs.append(h_new)
            new_cs.append(c_new)

            # Layers 1..L-1 consume the layer below's h_t from this same timestep.
            # TODO(synk): nn.LSTM inter-layer dropout is train-mode only; eval => identity.
            for l in range(1, no_layers):
                wih, whh, b = w_refs[3 * l], w_refs[3 * l + 1], w_refs[3 * l + 2]
                x_l = new_hs[l - 1]
                pre = [jnp.dot(x_l, wih[g], preferred_element_type=jnp.float32)
                       + jnp.dot(hs[l], whh[g], preferred_element_type=jnp.float32)
                       + b[g]
                       for g in range(4)]
                h_new, c_new = _lstm_cell(pre, cs[l])
                new_hs.append(h_new)
                new_cs.append(c_new)
            return tuple(new_hs), tuple(new_cs)

        hs_fin, cs_fin = jax.lax.fori_loop(0, T, step, (h_init, c_init), unroll=True)

        # Final states written exactly once (not every timestep).
        for l in range(no_layers):
            hN_ref[l] = hs_fin[l]
            cN_ref[l] = cs_fin[l]

        # TODO(synk): nn.Dropout before fc is identity in eval mode.
        out_ref[...] = jax.nn.sigmoid(
            jnp.dot(hs_fin[-1], fcw_ref[...], preferred_element_type=jnp.float32)
            + fcb_ref[...])

    return kernel


# ---------------------------------------------------------------------------
# Wrapper (matches SentimentRNN.forward(x, hidden) -> (sig_out, (h_n, c_n)))
# ---------------------------------------------------------------------------
def sentiment_rnn_forward(params, x_ids, hidden):
    h0, c0 = hidden                                 # (L, B, H) each
    B, T = x_ids.shape
    L, _, H = h0.shape
    E = params["emb"].shape[1]
    O = params["fc_w"].shape[1]

    # Pad batch to the f32 sublane height so per-timestep blocks are aligned 8-row tiles.
    Bp = max(8, -(-B // 8) * 8)
    pad_b = Bp - B

    ids_p = jnp.pad(x_ids, ((0, pad_b), (0, 0)))    # padded rows use token 0
    emb = params["emb"][ids_p.T]                    # (T, Bp, E): gather directly time-major
    emb_flat = emb.reshape(T * Bp, E)

    h0p = jnp.pad(h0, ((0, 0), (0, pad_b), (0, 0)))
    c0p = jnp.pad(c0, ((0, 0), (0, pad_b), (0, 0)))

    flat_w = []
    for (wih, whh, b) in params["lstm"]:
        flat_w += [wih, whh, b]

    kernel = make_sentiment_kernel(L, T, Bp)
    sig_p, hN_p, cN_p = pl.pallas_call(
        kernel,
        out_shape=(jax.ShapeDtypeStruct((Bp, O), jnp.float32),
                   jax.ShapeDtypeStruct((L, Bp, H), jnp.float32),
                   jax.ShapeDtypeStruct((L, Bp, H), jnp.float32)),
        scratch_shapes=[pltpu.VMEM((T * Bp, H), jnp.float32) for _ in range(4)],
    )(emb_flat, h0p, c0p, *flat_w, params["fc_w"], params["fc_b"])

    return sig_p[:B], (hN_p[:, :B], cN_p[:, :B])


# ---------------------------------------------------------------------------
# Parameter init (PyTorch-style uniform(-1/sqrt(H), 1/sqrt(H))), kernel layout
# ---------------------------------------------------------------------------
def init_params(key, vocab_size, embedding_dim, hidden_dim, no_layers, output_dim):
    keys = iter(jax.random.split(key, 3 + 4 * no_layers))
    bound = 1.0 / math.sqrt(hidden_dim)
    H = hidden_dim

    params = {}
    params["emb"] = (jax.random.normal(next(keys), (vocab_size, embedding_dim),
                                       dtype=jnp.float32) * 0.1)

    lstm, raw_lstm = [], []
    for l in range(no_layers):
        in_dim = embedding_dim if l == 0 else hidden_dim
        w_ih = jax.random.uniform(next(keys), (4 * H, in_dim),
                                  minval=-bound, maxval=bound, dtype=jnp.float32)
        w_hh = jax.random.uniform(next(keys), (4 * H, H),
                                  minval=-bound, maxval=bound, dtype=jnp.float32)
        b_ih = jax.random.uniform(next(keys), (4 * H,),
                                  minval=-bound, maxval=bound, dtype=jnp.float32)
        b_hh = jax.random.uniform(next(keys), (4 * H,),
                                  minval=-bound, maxval=bound, dtype=jnp.float32)
        raw_lstm.append((w_ih, w_hh, b_ih, b_hh))
        # Kernel layout: per-gate (i, f, g, o) blocks on a leading axis — no 64-lane slicing.
        wih_g = w_ih.reshape(4, H, in_dim).transpose(0, 2, 1)     # (4, in_dim, H)
        whh_g = w_hh.reshape(4, H, H).transpose(0, 2, 1)          # (4, H, H)
        b_g = (b_ih + b_hh).reshape(4, 1, H)                      # (4, 1, H)
        lstm.append((wih_g, whh_g, b_g))
    params["lstm"] = lstm
    params["raw_lstm"] = raw_lstm

    fc_w = jax.random.uniform(next(keys), (output_dim, hidden_dim),
                              minval=-bound, maxval=bound, dtype=jnp.float32)
    fc_b = jax.random.uniform(next(keys), (output_dim,),
                              minval=-bound, maxval=bound, dtype=jnp.float32)
    params["raw_fc"] = (fc_w, fc_b)
    params["fc_w"] = fc_w.T                        # (H, O)
    params["fc_b"] = fc_b[None, :]                 # (1, O)
    return params


# ---------------------------------------------------------------------------
# Pure-JAX reference (PyTorch layout) for correctness checking
# ---------------------------------------------------------------------------
def reference_forward(params, x_ids, hidden):
    h, c = hidden
    B, T = x_ids.shape
    L = h.shape[0]
    x_seq = params["emb"][x_ids]                   # (B, T, E)
    hs = [h[l] for l in range(L)]
    cs = [c[l] for l in range(L)]
    for l, (w_ih, w_hh, b_ih, b_hh) in enumerate(params["raw_lstm"]):
        outs = []
        h_l, c_l = hs[l], cs[l]
        for t in range(T):
            g = x_seq[:, t] @ w_ih.T + b_ih + h_l @ w_hh.T + b_hh
            i_g, f_g, g_g, o_g = jnp.split(g, 4, axis=-1)
            i_g = jax.nn.sigmoid(i_g)
            f_g = jax.nn.sigmoid(f_g)
            g_g = jnp.tanh(g_g)
            o_g = jax.nn.sigmoid(o_g)
            c_l = f_g * c_l + i_g * g_g
            h_l = o_g * jnp.tanh(c_l)
            outs.append(h_l)
        x_seq = jnp.stack(outs, axis=1)
        hs[l], cs[l] = h_l, c_l
    fc_w, fc_b = params["raw_fc"]
    sig = jax.nn.sigmoid(x_seq[:, -1] @ fc_w.T + fc_b)
    return sig, (jnp.stack(hs), jnp.stack(cs))


# ---------------------------------------------------------------------------
if __name__ == "__main__":
    # Shapes consistent with the module: embedding_dim=32, hidden_dim=64,
    # no_layers=2, output_dim=1 (reduced vocab for synthetic weights).
    B, T = 2, 8
    VOCAB, E, H, L, OUT = 1000, 32, 64, 2, 1

    key = jax.random.PRNGKey(0)
    k_params, k_ids = jax.random.split(key)
    params = init_params(k_params, VOCAB, E, H, L, OUT)

    x_ids = jax.random.randint(k_ids, (B, T), 0, VOCAB, dtype=jnp.int32)
    # init_hidden(batch_size)
    h0 = jnp.zeros((L, B, H), jnp.float32)
    c0 = jnp.zeros((L, B, H), jnp.float32)

    sig_out, (h_n, c_n) = sentiment_rnn_forward(params, x_ids, (h0, c0))
    jax.block_until_ready((sig_out, h_n, c_n))

    assert sig_out.shape == (B, OUT)
    assert h_n.shape == (L, B, H) and c_n.shape == (L, B, H)

    # Correctness vs. pure-JAX reference.
    ref_sig, (ref_h, ref_c) = reference_forward(params, x_ids, (h0, c0))
    assert jnp.allclose(sig_out, ref_sig, atol=1e-4, rtol=1e-4)
    assert jnp.allclose(h_n, ref_h, atol=1e-4, rtol=1e-4)
    assert jnp.allclose(c_n, ref_c, atol=1e-4, rtol=1e-4)

    print("KERNEL_OK")
</pallas_src>

<mosaic_0001>
module attributes {stable_mosaic.version = 11 : i64} {
  func.func @kernel(%arg0: memref<64x32xf32, #tpu.memory_space<vmem>>, %arg1: memref<2x8x64xf32, #tpu.memory_space<vmem>>, %arg2: memref<2x8x64xf32, #tpu.memory_space<vmem>>, %arg3: memref<4x32x64xf32, #tpu.memory_space<vmem>>, %arg4: memref<4x64x64xf32, #tpu.memory_space<vmem>>, %arg5: memref<4x1x64xf32, #tpu.memory_space<vmem>>, %arg6: memref<4x64x64xf32, #tpu.memory_space<vmem>>, %arg7: memref<4x64x64xf32, #tpu.memory_space<vmem>>, %arg8: memref<4x1x64xf32, #tpu.memory_space<vmem>>, %arg9: memref<64x1xf32, #tpu.memory_space<vmem>>, %arg10: memref<1x1xf32, #tpu.memory_space<vmem>>, %arg11: memref<8x1xf32, #tpu.memory_space<vmem>>, %arg12: memref<2x8x64xf32, #tpu.memory_space<vmem>>, %arg13: memref<2x8x64xf32, #tpu.memory_space<vmem>>, %arg14: memref<64x64xf32, #tpu.memory_space<vmem>>, %arg15: memref<64x64xf32, #tpu.memory_space<vmem>>, %arg16: memref<64x64xf32, #tpu.memory_space<vmem>>, %arg17: memref<64x64xf32, #tpu.memory_space<vmem>>) attributes {dimension_semantics = [], scalar_prefetch = 0 : i64, scratch_operands = 4 : i64, tpu.core_type = #tpu.core_type<tc>} {
    %c0 = arith.constant 0 : index
    %c0_0 = arith.constant 0 : index
    %0 = vector.load %arg0[%c0, %c0_0] : memref<64x32xf32, #tpu.memory_space<vmem>>, vector<64x32xf32>
    %c0_1 = arith.constant 0 : index
    %c0_2 = arith.constant 0 : index
    %c0_3 = arith.constant 0 : index
    %1 = vector.load %arg3[%c0_1, %c0_2, %c0_3] : memref<4x32x64xf32, #tpu.memory_space<vmem>>, vector<1x32x64xf32>
    %2 = vector.shape_cast %1 : vector<1x32x64xf32> to vector<32x64xf32>
    %cst = arith.constant dense<0.000000e+00> : vector<64x64xf32>
    %3 = tpu.matmul %0, %2, %cst {dimension_numbers = #tpu.dot_dimension_numbers<[1], [0], [0], [1], [0, 0, 1, 1], [], []>} : vector<64x32xf32>, vector<32x64xf32>, vector<64x64xf32> -> vector<64x64xf32>
    %c0_4 = arith.constant 0 : index
    %c0_5 = arith.constant 0 : index
    %c0_6 = arith.constant 0 : index
    %4 = vector.load %arg5[%c0_4, %c0_5, %c0_6] : memref<4x1x64xf32, #tpu.memory_space<vmem>>, vector<1x1x64xf32>
    %5 = vector.shape_cast %4 : vector<1x1x64xf32> to vector<1x64xf32>
    %6 = vector.broadcast %5 : vector<1x64xf32> to vector<64x64xf32>
    %7 = arith.addf %3, %6 : vector<64x64xf32>
    %c0_7 = arith.constant 0 : index
    %c0_8 = arith.constant 0 : index
    %8 = vector.load %arg14[%c0_7, %c0_8] : memref<64x64xf32, #tpu.memory_space<vmem>>, vector<64x64xf32>
    tpu.vector_store %arg14[%c0_7, %c0_8], %7 {strides = array<i32>} : memref<64x64xf32, #tpu.memory_space<vmem>>, vector<64x64xf32>,
    %c1 = arith.constant 1 : index
    %c0_9 = arith.constant 0 : index
    %c0_10 = arith.constant 0 : index
    %9 = vector.load %arg3[%c1, %c0_9, %c0_10] : memref<4x32x64xf32, #tpu.memory_space<vmem>>, vector<1x32x64xf32>
    %10 = vector.shape_cast %9 : vector<1x32x64xf32> to vector<32x64xf32>
    %cst_11 = arith.constant dense<0.000000e+00> : vector<64x64xf32>
    %11 = tpu.matmul %0, %10, %cst_11 {dimension_numbers = #tpu.dot_dimension_numbers<[1], [0], [0], [1], [0, 0, 1, 1], [], []>} : vector<64x32xf32>, vector<32x64xf32>, vector<64x64xf32> -> vector<64x64xf32>
    %c1_12 = arith.constant 1 : index
    %c0_13 = arith.constant 0 : index
    %c0_14 = arith.constant 0 : index
    %12 = vector.load %arg5[%c1_12, %c0_13, %c0_14] : memref<4x1x64xf32, #tpu.memory_space<vmem>>, vector<1x1x64xf32>
    %13 = vector.shape_cast %12 : vector<1x1x64xf32> to vector<1x64xf32>
    %14 = vector.broadcast %13 : vector<1x64xf32> to vector<64x64xf32>
    %15 = arith.addf %11, %14 : vector<64x64xf32>
    %c0_15 = arith.constant 0 : index
    %c0_16 = arith.constant 0 : index
    %16 = vector.load %arg15[%c0_15, %c0_16] : memref<64x64xf32, #tpu.memory_space<vmem>>, vector<64x64xf32>
    tpu.vector_store %arg15[%c0_15, %c0_16], %15 {strides = array<i32>} : memref<64x64xf32, #tpu.memory_space<vmem>>, vector<64x64xf32>,
    %c2 = arith.constant 2 : index
    %c0_17 = arith.constant 0 : index
    %c0_18 = arith.constant 0 : index
    %17 = vector.load %arg3[%c2, %c0_17, %c0_18] : memref<4x32x64xf32, #tpu.memory_space<vmem>>, vector<1x32x64xf32>
    %18 = vector.shape_cast %17 : vector<1x32x64xf32> to vector<32x64xf32>
    %cst_19 = arith.constant dense<0.000000e+00> : vector<64x64xf32>
    %19 = tpu.matmul %0, %18, %cst_19 {dimension_numbers = #tpu.dot_dimension_numbers<[1], [0], [0], [1], [0, 0, 1, 1], [], []>} : vector<64x32xf32>, vector<32x64xf32>, vector<64x64xf32> -> vector<64x64xf32>
    %c2_20 = arith.constant 2 : index
    %c0_21 = arith.constant 0 : index
    %c0_22 = arith.constant 0 : index
    %20 = vector.load %arg5[%c2_20, %c0_21, %c0_22] : memref<4x1x64xf32, #tpu.memory_space<vmem>>, vector<1x1x64xf32>
    %21 = vector.shape_cast %20 : vector<1x1x64xf32> to vector<1x64xf32>
    %22 = vector.broadcast %21 : vector<1x64xf32> to vector<64x64xf32>
    %23 = arith.addf %19, %22 : vector<64x64xf32>
    %c0_23 = arith.constant 0 : index
    %c0_24 = arith.constant 0 : index
    %24 = vector.load %arg16[%c0_23, %c0_24] : memref<64x64xf32, #tpu.memory_space<vmem>>, vector<64x64xf32>
    tpu.vector_store %arg16[%c0_23, %c0_24], %23 {strides = array<i32>} : memref<64x64xf32, #tpu.memory_space<vmem>>, vector<64x64xf32>,
    %c3 = arith.constant 3 : index
    %c0_25 = arith.constant 0 : index
    %c0_26 = arith.constant 0 : index
    %25 = vector.load %arg3[%c3, %c0_25, %c0_26] : memref<4x32x64xf32, #tpu.memory_space<vmem>>, vector<1x32x64xf32>
    %26 = vector.shape_cast %25 : vector<1x32x64xf32> to vector<32x64xf32>
    %cst_27 = arith.constant dense<0.000000e+00> : vector<64x64xf32>
    %27 = tpu.matmul %0, %26, %cst_27 {dimension_numbers = #tpu.dot_dimension_numbers<[1], [0], [0], [1], [0, 0, 1, 1], [], []>} : vector<64x32xf32>, vector<32x64xf32>, vector<64x64xf32> -> vector<64x64xf32>
    %c3_28 = arith.constant 3 : index
    %c0_29 = arith.constant 0 : index
    %c0_30 = arith.constant 0 : index
    %28 = vector.load %arg5[%c3_28, %c0_29, %c0_30] : memref<4x1x64xf32, #tpu.memory_space<vmem>>, vector<1x1x64xf32>
    %29 = vector.shape_cast %28 : vector<1x1x64xf32> to vector<1x64xf32>
    %30 = vector.broadcast %29 : vector<1x64xf32> to vector<64x64xf32>
    %31 = arith.addf %27, %30 : vector<64x64xf32>
    %c0_31 = arith.constant 0 : index
    %c0_32 = arith.constant 0 : index
    %32 = vector.load %arg17[%c0_31, %c0_32] : memref<64x64xf32, #tpu.memory_space<vmem>>, vector<64x64xf32>
    tpu.vector_store %arg17[%c0_31, %c0_32], %31 {strides = array<i32>} : memref<64x64xf32, #tpu.memory_space<vmem>>, vector<64x64xf32>,
    %c0_33 = arith.constant 0 : index
    %c0_34 = arith.constant 0 : index
    %c0_35 = arith.constant 0 : index
    %33 = vector.load %arg1[%c0_33, %c0_34, %c0_35] : memref<2x8x64xf32, #tpu.memory_space<vmem>>, vector<1x8x64xf32>
    %34 = vector.shape_cast %33 : vector<1x8x64xf32> to vector<8x64xf32>
    %c1_36 = arith.constant 1 : index
    %c0_37 = arith.constant 0 : index
    %c0_38 = arith.constant 0 : index
    %35 = vector.load %arg1[%c1_36, %c0_37, %c0_38] : memref<2x8x64xf32, #tpu.memory_space<vmem>>, vector<1x8x64xf32>
    %36 = vector.shape_cast %35 : vector<1x8x64xf32> to vector<8x64xf32>
    %c0_39 = arith.constant 0 : index
    %c0_40 = arith.constant 0 : index
    %c0_41 = arith.constant 0 : index
    %37 = vector.load %arg2[%c0_39, %c0_40, %c0_41] : memref<2x8x64xf32, #tpu.memory_space<vmem>>, vector<1x8x64xf32>
    %38 = vector.shape_cast %37 : vector<1x8x64xf32> to vector<8x64xf32>
    %c1_42 = arith.constant 1 : index
    %c0_43 = arith.constant 0 : index
    %c0_44 = arith.constant 0 : index
    %39 = vector.load %arg2[%c1_42, %c0_43, %c0_44] : memref<2x8x64xf32, #tpu.memory_space<vmem>>, vector<1x8x64xf32>
    %40 = vector.shape_cast %39 : vector<1x8x64xf32> to vector<8x64xf32>
    %c0_i32 = arith.constant 0 : i32
    %c8_i32 = arith.constant 8 : i32
    %41 = arith.muli %c0_i32, %c8_i32 : i32
    %42 = tpu.assume_multiple %41, 8 : i32
    %43 = arith.index_cast %42 : i32 to index
    %c0_45 = arith.constant 0 : index
    %44 = vector.load %arg14[%43, %c0_45] : memref<64x64xf32, #tpu.memory_space<vmem>>, vector<8x64xf32>
    %c0_46 = arith.constant 0 : index
    %c0_47 = arith.constant 0 : index
    %c0_48 = arith.constant 0 : index
    %45 = vector.load %arg4[%c0_46, %c0_47, %c0_48] : memref<4x64x64xf32, #tpu.memory_space<vmem>>, vector<1x64x64xf32>
    %46 = vector.shape_cast %45 : vector<1x64x64xf32> to vector<64x64xf32>
    %cst_49 = arith.constant dense<0.000000e+00> : vector<8x64xf32>
    %47 = tpu.matmul %34, %46, %cst_49 {dimension_numbers = #tpu.dot_dimension_numbers<[1], [0], [0], [1], [0, 0, 1, 1], [], []>} : vector<8x64xf32>, vector<64x64xf32>, vector<8x64xf32> -> vector<8x64xf32>
    %48 = arith.addf %44, %47 : vector<8x64xf32>
    %49 = arith.index_cast %42 : i32 to index
    %c0_50 = arith.constant 0 : index
    %50 = vector.load %arg15[%49, %c0_50] : memref<64x64xf32, #tpu.memory_space<vmem>>, vector<8x64xf32>
    %c1_51 = arith.constant 1 : index
    %c0_52 = arith.constant 0 : index
    %c0_53 = arith.constant 0 : index
    %51 = vector.load %arg4[%c1_51, %c0_52, %c0_53] : memref<4x64x64xf32, #tpu.memory_space<vmem>>, vector<1x64x64xf32>
    %52 = vector.shape_cast %51 : vector<1x64x64xf32> to vector<64x64xf32>
    %cst_54 = arith.constant dense<0.000000e+00> : vector<8x64xf32>
    %53 = tpu.matmul %34, %52, %cst_54 {dimension_numbers = #tpu.dot_dimension_numbers<[1], [0], [0], [1], [0, 0, 1, 1], [], []>} : vector<8x64xf32>, vector<64x64xf32>, vector<8x64xf32> -> vector<8x64xf32>
    %54 = arith.addf %50, %53 : vector<8x64xf32>
    %55 = arith.index_cast %42 : i32 to index
    %c0_55 = arith.constant 0 : index
    %56 = vector.load %arg16[%55, %c0_55] : memref<64x64xf32, #tpu.memory_space<vmem>>, vector<8x64xf32>
    %c2_56 = arith.constant 2 : index
    %c0_57 = arith.constant 0 : index
    %c0_58 = arith.constant 0 : index
    %57 = vector.load %arg4[%c2_56, %c0_57, %c0_58] : memref<4x64x64xf32, #tpu.memory_space<vmem>>, vector<1x64x64xf32>
    %58 = vector.shape_cast %57 : vector<1x64x64xf32> to vector<64x64xf32>
    %cst_59 = arith.constant dense<0.000000e+00> : vector<8x64xf32>
    %59 = tpu.matmul %34, %58, %cst_59 {dimension_numbers = #tpu.dot_dimension_numbers<[1], [0], [0], [1], [0, 0, 1, 1], [], []>} : vector<8x64xf32>, vector<64x64xf32>, vector<8x64xf32> -> vector<8x64xf32>
    %60 = arith.addf %56, %59 : vector<8x64xf32>
    %61 = arith.index_cast %42 : i32 to index
    %c0_60 = arith.constant 0 : index
    %62 = vector.load %arg17[%61, %c0_60] : memref<64x64xf32, #tpu.memory_space<vmem>>, vector<8x64xf32>
    %c3_61 = arith.constant 3 : index
    %c0_62 = arith.constant 0 : index
    %c0_63 = arith.constant 0 : index
    %63 = vector.load %arg4[%c3_61, %c0_62, %c0_63] : memref<4x64x64xf32, #tpu.memory_space<vmem>>, vector<1x64x64xf32>
    %64 = vector.shape_cast %63 : vector<1x64x64xf32> to vector<64x64xf32>
    %cst_64 = arith.constant dense<0.000000e+00> : vector<8x64xf32>
    %65 = tpu.matmul %34, %64, %cst_64 {dimension_numbers = #tpu.dot_dimension_numbers<[1], [0], [0], [1], [0, 0, 1, 1], [], []>} : vector<8x64xf32>, vector<64x64xf32>, vector<8x64xf32> -> vector<8x64xf32>
    %66 = arith.addf %62, %65 : vector<8x64xf32>
    %67 = arith.negf %48 : vector<8x64xf32>
    %68 = math.exp %67 : vector<8x64xf32>
    %cst_65 = arith.constant 1.000000e+00 : f32
    %69 = vector.broadcast %cst_65 : f32 to vector<8x64xf32>
    %70 = arith.addf %69, %68 : vector<8x64xf32>
    %71 = arith.divf %69, %70 : vector<8x64xf32>
    %72 = arith.negf %54 : vector<8x64xf32>
    %73 = math.exp %72 : vector<8x64xf32>
    %cst_66 = arith.constant 1.000000e+00 : f32
    %74 = vector.broadcast %cst_66 : f32 to vector<8x64xf32>
    %75 = arith.addf %74, %73 : vector<8x64xf32>
    %76 = arith.divf %74, %75 : vector<8x64xf32>
    %77 = math.tanh %60 : vector<8x64xf32>
    %78 = arith.negf %66 : vector<8x64xf32>
    %79 = math.exp %78 : vector<8x64xf32>
    %cst_67 = arith.constant 1.000000e+00 : f32
    %80 = vector.broadcast %cst_67 : f32 to vector<8x64xf32>
    %81 = arith.addf %80, %79 : vector<8x64xf32>
    %82 = arith.divf %80, %81 : vector<8x64xf32>
    %83 = arith.mulf %76, %38 : vector<8x64xf32>
    %84 = arith.mulf %71, %77 : vector<8x64xf32>
    %85 = arith.addf %83, %84 : vector<8x64xf32>
    %86 = math.tanh %85 : vector<8x64xf32>
    %87 = arith.mulf %82, %86 : vector<8x64xf32>
    %c0_68 = arith.constant 0 : index
    %c0_69 = arith.constant 0 : index
    %c0_70 = arith.constant 0 : index
    %88 = vector.load %arg6[%c0_68, %c0_69, %c0_70] : memref<4x64x64xf32, #tpu.memory_space<vmem>>, vector<1x64x64xf32>
    %89 = vector.shape_cast %88 : vector<1x64x64xf32> to vector<64x64xf32>
    %cst_71 = arith.constant dense<0.000000e+00> : vector<8x64xf32>
    %90 = tpu.matmul %87, %89, %cst_71 {dimension_numbers = #tpu.dot_dimension_numbers<[1], [0], [0], [1], [0, 0, 1, 1], [], []>} : vector<8x64xf32>, vector<64x64xf32>, vector<8x64xf32> -> vector<8x64xf32>
    %c0_72 = arith.constant 0 : index
    %c0_73 = arith.constant 0 : index
    %c0_74 = arith.constant 0 : index
    %91 = vector.load %arg7[%c0_72, %c0_73, %c0_74] : memref<4x64x64xf32, #tpu.memory_space<vmem>>, vector<1x64x64xf32>
    %92 = vector.shape_cast %91 : vector<1x64x64xf32> to vector<64x64xf32>
    %cst_75 = arith.constant dense<0.000000e+00> : vector<8x64xf32>
    %93 = tpu.matmul %36, %92, %cst_75 {dimension_numbers = #tpu.dot_dimension_numbers<[1], [0], [0], [1], [0, 0, 1, 1], [], []>} : vector<8x64xf32>, vector<64x64xf32>, vector<8x64xf32> -> vector<8x64xf32>
    %94 = arith.addf %90, %93 : vector<8x64xf32>
    %c0_76 = arith.constant 0 : index
    %c0_77 = arith.constant 0 : index
    %c0_78 = arith.constant 0 : index
    %95 = vector.load %arg8[%c0_76, %c0_77, %c0_78] : memref<4x1x64xf32, #tpu.memory_space<vmem>>, vector<1x1x64xf32>
    %96 = vector.shape_cast %95 : vector<1x1x64xf32> to vector<1x64xf32>
    %97 = vector.broadcast %96 : vector<1x64xf32> to vector<8x64xf32>
    %98 = arith.addf %94, %97 : vector<8x64xf32>
    %c1_79 = arith.constant 1 : index
    %c0_80 = arith.constant 0 : index
    %c0_81 = arith.constant 0 : index
    %99 = vector.load %arg6[%c1_79, %c0_80, %c0_81] : memref<4x64x64xf32, #tpu.memory_space<vmem>>, vector<1x64x64xf32>
    %100 = vector.shape_cast %99 : vector<1x64x64xf32> to vector<64x64xf32>
    %cst_82 = arith.constant dense<0.000000e+00> : vector<8x64xf32>
    %101 = tpu.matmul %87, %100, %cst_82 {dimension_numbers = #tpu.dot_dimension_numbers<[1], [0], [0], [1], [0, 0, 1, 1], [], []>} : vector<8x64xf32>, vector<64x64xf32>, vector<8x64xf32> -> vector<8x64xf32>
    %c1_83 = arith.constant 1 : index
    %c0_84 = arith.constant 0 : index
    %c0_85 = arith.constant 0 : index
    %102 = vector.load %arg7[%c1_83, %c0_84, %c0_85] : memref<4x64x64xf32, #tpu.memory_space<vmem>>, vector<1x64x64xf32>
    %103 = vector.shape_cast %102 : vector<1x64x64xf32> to vector<64x64xf32>
    %cst_86 = arith.constant dense<0.000000e+00> : vector<8x64xf32>
    %104 = tpu.matmul %36, %103, %cst_86 {dimension_numbers = #tpu.dot_dimension_numbers<[1], [0], [0], [1], [0, 0, 1, 1], [], []>} : vector<8x64xf32>, vector<64x64xf32>, vector<8x64xf32> -> vector<8x64xf32>
    %105 = arith.addf %101, %104 : vector<8x64xf32>
    %c1_87 = arith.constant 1 : index
    %c0_88 = arith.constant 0 : index
    %c0_89 = arith.constant 0 : index
    %106 = vector.load %arg8[%c1_87, %c0_88, %c0_89] : memref<4x1x64xf32, #tpu.memory_space<vmem>>, vector<1x1x64xf32>
    %107 = vector.shape_cast %106 : vector<1x1x64xf32> to vector<1x64xf32>
    %108 = vector.broadcast %107 : vector<1x64xf32> to vector<8x64xf32>
    %109 = arith.addf %105, %108 : vector<8x64xf32>
    %c2_90 = arith.constant 2 : index
    %c0_91 = arith.constant 0 : index
    %c0_92 = arith.constant 0 : index
    %110 = vector.load %arg6[%c2_90, %c0_91, %c0_92] : memref<4x64x64xf32, #tpu.memory_space<vmem>>, vector<1x64x64xf32>
    %111 = vector.shape_cast %110 : vector<1x64x64xf32> to vector<64x64xf32>
    %cst_93 = arith.constant dense<0.000000e+00> : vector<8x64xf32>
    %112 = tpu.matmul %87, %111, %cst_93 {dimension_numbers = #tpu.dot_dimension_numbers<[1], [0], [0], [1], [0, 0, 1, 1], [], []>} : vector<8x64xf32>, vector<64x64xf32>, vector<8x64xf32> -> vector<8x64xf32>
    %c2_94 = arith.constant 2 : index
    %c0_95 = arith.constant 0 : index
    %c0_96 = arith.constant 0 : index
    %113 = vector.load %arg7[%c2_94, %c0_95, %c0_96] : memref<4x64x64xf32, #tpu.memory_space<vmem>>, vector<1x64x64xf32>
    %114 = vector.shape_cast %113 : vector<1x64x64xf32> to vector<64x64xf32>
    %cst_97 = arith.constant dense<0.000000e+00> : vector<8x64xf32>
    %115 = tpu.matmul %36, %114, %cst_97 {dimension_numbers = #tpu.dot_dimension_numbers<[1], [0], [0], [1], [0, 0, 1, 1], [], []>} : vector<8x64xf32>, vector<64x64xf32>, vector<8x64xf32> -> vector<8x64xf32>
    %116 = arith.addf %112, %115 : vector<8x64xf32>
    %c2_98 = arith.constant 2 : index
    %c0_99 = arith.constant 0 : index
    %c0_100 = arith.constant 0 : index
    %117 = vector.load %arg8[%c2_98, %c0_99, %c0_100] : memref<4x1x64xf32, #tpu.memory_space<vmem>>, vector<1x1x64xf32>
    %118 = vector.shape_cast %117 : vector<1x1x64xf32> to vector<1x64xf32>
    %119 = vector.broadcast %118 : vector<1x64xf32> to vector<8x64xf32>
    %120 = arith.addf %116, %119 : vector<8x64xf32>
    %c3_101 = arith.constant 3 : index
    %c0_102 = arith.constant 0 : index
    %c0_103 = arith.constant 0 : index
    %121 = vector.load %arg6[%c3_101, %c0_102, %c0_103] : memref<4x64x64xf32, #tpu.memory_space<vmem>>, vector<1x64x64xf32>
    %122 = vector.shape_cast %121 : vector<1x64x64xf32> to vector<64x64xf32>
    %cst_104 = arith.constant dense<0.000000e+00> : vector<8x64xf32>
    %123 = tpu.matmul %87, %122, %cst_104 {dimension_numbers = #tpu.dot_dimension_numbers<[1], [0], [0], [1], [0, 0, 1, 1], [], []>} : vector<8x64xf32>, vector<64x64xf32>, vector<8x64xf32> -> vector<8x64xf32>
    %c3_105 = arith.constant 3 : index
    %c0_106 = arith.constant 0 : index
    %c0_107 = arith.constant 0 : index
    %124 = vector.load %arg7[%c3_105, %c0_106, %c0_107] : memref<4x64x64xf32, #tpu.memory_space<vmem>>, vector<1x64x64xf32>
    %125 = vector.shape_cast %124 : vector<1x64x64xf32> to vector<64x64xf32>
    %cst_108 = arith.constant dense<0.000000e+00> : vector<8x64xf32>
    %126 = tpu.matmul %36, %125, %cst_108 {dimension_numbers = #tpu.dot_dimension_numbers<[1], [0], [0], [1], [0, 0, 1, 1], [], []>} : vector<8x64xf32>, vector<64x64xf32>, vector<8x64xf32> -> vector<8x64xf32>
    %127 = arith.addf %123, %126 : vector<8x64xf32>
    %c3_109 = arith.constant 3 : index
    %c0_110 = arith.constant 0 : index
    %c0_111 = arith.constant 0 : index
    %128 = vector.load %arg8[%c3_109, %c0_110, %c0_111] : memref<4x1x64xf32, #tpu.memory_space<vmem>>, vector<1x1x64xf32>
    %129 = vector.shape_cast %128 : vector<1x1x64xf32> to vector<1x64xf32>
    %130 = vector.broadcast %129 : vector<1x64xf32> to vector<8x64xf32>
    %131 = arith.addf %127, %130 : vector<8x64xf32>
    %132 = arith.negf %98 : vector<8x64xf32>
    %133 = math.exp %132 : vector<8x64xf32>
    %cst_112 = arith.constant 1.000000e+00 : f32
    %134 = vector.broadcast %cst_112 : f32 to vector<8x64xf32>
    %135 = arith.addf %134, %133 : vector<8x64xf32>
    %136 = arith.divf %134, %135 : vector<8x64xf32>
    %137 = arith.negf %109 : vector<8x64xf32>
    %138 = math.exp %137 : vector<8x64xf32>
    %cst_113 = arith.constant 1.000000e+00 : f32
    %139 = vector.broadcast %cst_113 : f32 to vector<8x64xf32>
    %140 = arith.addf %139, %138 : vector<8x64xf32>
    %141 = arith.divf %139, %140 : vector<8x64xf32>
    %142 = math.tanh %120 : vector<8x64xf32>
    %143 = arith.negf %131 : vector<8x64xf32>
    %144 = math.exp %143 : vector<8x64xf32>
    %cst_114 = arith.constant 1.000000e+00 : f32
    %145 = vector.broadcast %cst_114 : f32 to vector<8x64xf32>
    %146 = arith.addf %145, %144 : vector<8x64xf32>
    %147 = arith.divf %145, %146 : vector<8x64xf32>
    %148 = arith.mulf %141, %40 : vector<8x64xf32>
    %149 = arith.mulf %136, %142 : vector<8x64xf32>
    %150 = arith.addf %148, %149 : vector<8x64xf32>
    %151 = math.tanh %150 : vector<8x64xf32>
    %152 = arith.mulf %147, %151 : vector<8x64xf32>
    %c1_i32 = arith.constant 1 : i32
    %c8_i32_115 = arith.constant 8 : i32
    %153 = arith.muli %c1_i32, %c8_i32_115 : i32
    %154 = tpu.assume_multiple %153, 8 : i32
    %155 = arith.index_cast %154 : i32 to index
    %c0_116 = arith.constant 0 : index
    %156 = vector.load %arg14[%155, %c0_116] : memref<64x64xf32, #tpu.memory_space<vmem>>, vector<8x64xf32>
    %c0_117 = arith.constant 0 : index
    %c0_118 = arith.constant 0 : index
    %c0_119 = arith.constant 0 : index
    %157 = vector.load %arg4[%c0_117, %c0_118, %c0_119] : memref<4x64x64xf32, #tpu.memory_space<vmem>>, vector<1x64x64xf32>
    %158 = vector.shape_cast %157 : vector<1x64x64xf32> to vector<64x64xf32>
    %cst_120 = arith.constant dense<0.000000e+00> : vector<8x64xf32>
    %159 = tpu.matmul %87, %158, %cst_120 {dimension_numbers = #tpu.dot_dimension_numbers<[1], [0], [0], [1], [0, 0, 1, 1], [], []>} : vector<8x64xf32>, vector<64x64xf32>, vector<8x64xf32> -> vector<8x64xf32>
    %160 = arith.addf %156, %159 : vector<8x64xf32>
    %161 = arith.index_cast %154 : i32 to index
    %c0_121 = arith.constant 0 : index
    %162 = vector.load %arg15[%161, %c0_121] : memref<64x64xf32, #tpu.memory_space<vmem>>, vector<8x64xf32>
    %c1_122 = arith.constant 1 : index
    %c0_123 = arith.constant 0 : index
    %c0_124 = arith.constant 0 : index
    %163 = vector.load %arg4[%c1_122, %c0_123, %c0_124] : memref<4x64x64xf32, #tpu.memory_space<vmem>>, vector<1x64x64xf32>
    %164 = vector.shape_cast %163 : vector<1x64x64xf32> to vector<64x64xf32>
    %cst_125 = arith.constant dense<0.000000e+00> : vector<8x64xf32>
    %165 = tpu.matmul %87, %164, %cst_125 {dimension_numbers = #tpu.dot_dimension_numbers<[1], [0], [0], [1], [0, 0, 1, 1], [], []>} : vector<8x64xf32>, vector<64x64xf32>, vector<8x64xf32> -> vector<8x64xf32>
    %166 = arith.addf %162, %165 : vector<8x64xf32>
    %167 = arith.index_cast %154 : i32 to index
    %c0_126 = arith.constant 0 : index
    %168 = vector.load %arg16[%167, %c0_126] : memref<64x64xf32, #tpu.memory_space<vmem>>, vector<8x64xf32>
    %c2_127 = arith.constant 2 : index
    %c0_128 = arith.constant 0 : index
    %c0_129 = arith.constant 0 : index
    %169 = vector.load %arg4[%c2_127, %c0_128, %c0_129] : memref<4x64x64xf32, #tpu.memory_space<vmem>>, vector<1x64x64xf32>
    %170 = vector.shape_cast %169 : vector<1x64x64xf32> to vector<64x64xf32>
    %cst_130 = arith.constant dense<0.000000e+00> : vector<8x64xf32>
    %171 = tpu.matmul %87, %170, %cst_130 {dimension_numbers = #tpu.dot_dimension_numbers<[1], [0], [0], [1], [0, 0, 1, 1], [], []>} : vector<8x64xf32>, vector<64x64xf32>, vector<8x64xf32> -> vector<8x64xf32>
    %172 = arith.addf %168, %171 : vector<8x64xf32>
    %173 = arith.index_cast %154 : i32 to index
    %c0_131 = arith.constant 0 : index
    %174 = vector.load %arg17[%173, %c0_131] : memref<64x64xf32, #tpu.memory_space<vmem>>, vector<8x64xf32>
    %c3_132 = arith.constant 3 : index
    %c0_133 = arith.constant 0 : index
    %c0_134 = arith.constant 0 : index
    %175 = vector.load %arg4[%c3_132, %c0_133, %c0_134] : memref<4x64x64xf32, #tpu.memory_space<vmem>>, vector<1x64x64xf32>
    %176 = vector.shape_cast %175 : vector<1x64x64xf32> to vector<64x64xf32>
    %cst_135 = arith.constant dense<0.000000e+00> : vector<8x64xf32>
    %177 = tpu.matmul %87, %176, %cst_135 {dimension_numbers = #tpu.dot_dimension_numbers<[1], [0], [0], [1], [0, 0, 1, 1], [], []>} : vector<8x64xf32>, vector<64x64xf32>, vector<8x64xf32> -> vector<8x64xf32>
    %178 = arith.addf %174, %177 : vector<8x64xf32>
    %179 = arith.negf %160 : vector<8x64xf32>
    %180 = math.exp %179 : vector<8x64xf32>
    %cst_136 = arith.constant 1.000000e+00 : f32
    %181 = vector.broadcast %cst_136 : f32 to vector<8x64xf32>
    %182 = arith.addf %181, %180 : vector<8x64xf32>
    %183 = arith.divf %181, %182 : vector<8x64xf32>
    %184 = arith.negf %166 : vector<8x64xf32>
    %185 = math.exp %184 : vector<8x64xf32>
    %cst_137 = arith.constant 1.000000e+00 : f32
    %186 = vector.broadcast %cst_137 : f32 to vector<8x64xf32>
    %187 = arith.addf %186, %185 : vector<8x64xf32>
    %188 = arith.divf %186, %187 : vector<8x64xf32>
    %189 = math.tanh %172 : vector<8x64xf32>
    %190 = arith.negf %178 : vector<8x64xf32>
    %191 = math.exp %190 : vector<8x64xf32>
    %cst_138 = arith.constant 1.000000e+00 : f32
    %192 = vector.broadcast %cst_138 : f32 to vector<8x64xf32>
    %193 = arith.addf %192, %191 : vector<8x64xf32>
    %194 = arith.divf %192, %193 : vector<8x64xf32>
    %195 = arith.mulf %188, %85 : vector<8x64xf32>
    %196 = arith.mulf %183, %189 : vector<8x64xf32>
    %197 = arith.addf %195, %196 : vector<8x64xf32>
    %198 = math.tanh %197 : vector<8x64xf32>
    %199 = arith.mulf %194, %198 : vector<8x64xf32>
    %c0_139 = arith.constant 0 : index
    %c0_140 = arith.constant 0 : index
    %c0_141 = arith.constant 0 : index
    %200 = vector.load %arg6[%c0_139, %c0_140, %c0_141] : memref<4x64x64xf32, #tpu.memory_space<vmem>>, vector<1x64x64xf32>
    %201 = vector.shape_cast %200 : vector<1x64x64xf32> to vector<64x64xf32>
    %cst_142 = arith.constant dense<0.000000e+00> : vector<8x64xf32>
    %202 = tpu.matmul %199, %201, %cst_142 {dimension_numbers = #tpu.dot_dimension_numbers<[1], [0], [0], [1], [0, 0, 1, 1], [], []>} : vector<8x64xf32>, vector<64x64xf32>, vector<8x64xf32> -> vector<8x64xf32>
    %c0_143 = arith.constant 0 : index
    %c0_144 = arith.constant 0 : index
    %c0_145 = arith.constant 0 : index
    %203 = vector.load %arg7[%c0_143, %c0_144, %c0_145] : memref<4x64x64xf32, #tpu.memory_space<vmem>>, vector<1x64x64xf32>
    %204 = vector.shape_cast %203 : vector<1x64x64xf32> to vector<64x64xf32>
    %cst_146 = arith.constant dense<0.000000e+00> : vector<8x64xf32>
    %205 = tpu.matmul %152, %204, %cst_146 {dimension_numbers = #tpu.dot_dimension_numbers<[1], [0], [0], [1], [0, 0, 1, 1], [], []>} : vector<8x64xf32>, vector<64x64xf32>, vector<8x64xf32> -> vector<8x64xf32>
    %206 = arith.addf %202, %205 : vector<8x64xf32>
    %c0_147 = arith.constant 0 : index
    %c0_148 = arith.constant 0 : index
    %c0_149 = arith.constant 0 : index
    %207 = vector.load %arg8[%c0_147, %c0_148, %c0_149] : memref<4x1x64xf32, #tpu.memory_space<vmem>>, vector<1x1x64xf32>
    %208 = vector.shape_cast %207 : vector<1x1x64xf32> to vector<1x64xf32>
    %209 = vector.broadcast %208 : vector<1x64xf32> to vector<8x64xf32>
    %210 = arith.addf %206, %209 : vector<8x64xf32>
    %c1_150 = arith.constant 1 : index
    %c0_151 = arith.constant 0 : index
    %c0_152 = arith.constant 0 : index
    %211 = vector.load %arg6[%c1_150, %c0_151, %c0_152] : memref<4x64x64xf32, #tpu.memory_space<vmem>>, vector<1x64x64xf32>
    %212 = vector.shape_cast %211 : vector<1x64x64xf32> to vector<64x64xf32>
    %cst_153 = arith.constant dense<0.000000e+00> : vector<8x64xf32>
    %213 = tpu.matmul %199, %212, %cst_153 {dimension_numbers = #tpu.dot_dimension_numbers<[1], [0], [0], [1], [0, 0, 1, 1], [], []>} : vector<8x64xf32>, vector<64x64xf32>, vector<8x64xf32> -> vector<8x64xf32>
    %c1_154 = arith.constant 1 : index
    %c0_155 = arith.constant 0 : index
    %c0_156 = arith.constant 0 : index
    %214 = vector.load %arg7[%c1_154, %c0_155, %c0_156] : memref<4x64x64xf32, #tpu.memory_space<vmem>>, vector<1x64x64xf32>
    %215 = vector.shape_cast %214 : vector<1x64x64xf32> to vector<64x64xf32>
    %cst_157 = arith.constant dense<0.000000e+00> : vector<8x64xf32>
    %216 = tpu.matmul %152, %215, %cst_157 {dimension_numbers = #tpu.dot_dimension_numbers<[1], [0], [0], [1], [0, 0, 1, 1], [], []>} : vector<8x64xf32>, vector<64x64xf32>, vector<8x64xf32> -> vector<8x64xf32>
    %217 = arith.addf %213, %216 : vector<8x64xf32>
    %c1_158 = arith.constant 1 : index
    %c0_159 = arith.constant 0 : index
    %c0_160 = arith.constant 0 : index
    %218 = vector.load %arg8[%c1_158, %c0_159, %c0_160] : memref<4x1x64xf32, #tpu.memory_space<vmem>>, vector<1x1x64xf32>
    %219 = vector.shape_cast %218 : vector<1x1x64xf32> to vector<1x64xf32>
    %220 = vector.broadcast %219 : vector<1x64xf32> to vector<8x64xf32>
    %221 = arith.addf %217, %220 : vector<8x64xf32>
    %c2_161 = arith.constant 2 : index
    %c0_162 = arith.constant 0 : index
    %c0_163 = arith.constant 0 : index
    %222 = vector.load %arg6[%c2_161, %c0_162, %c0_163] : memref<4x64x64xf32, #tpu.memory_space<vmem>>, vector<1x64x64xf32>
    %223 = vector.shape_cast %222 : vector<1x64x64xf32> to vector<64x64xf32>
    %cst_164 = arith.constant dense<0.000000e+00> : vector<8x64xf32>
    %224 = tpu.matmul %199, %223, %cst_164 {dimension_numbers = #tpu.dot_dimension_numbers<[1], [0], [0], [1], [0, 0, 1, 1], [], []>} : vector<8x64xf32>, vector<64x64xf32>, vector<8x64xf32> -> vector<8x64xf32>
    %c2_165 = arith.constant 2 : index
    %c0_166 = arith.constant 0 : index
    %c0_167 = arith.constant 0 : index
    %225 = vector.load %arg7[%c2_165, %c0_166, %c0_167] : memref<4x64x64xf32, #tpu.memory_space<vmem>>, vector<1x64x64xf32>
    %226 = vector.shape_cast %225 : vector<1x64x64xf32> to vector<64x64xf32>
    %cst_168 = arith.constant dense<0.000000e+00> : vector<8x64xf32>
    %227 = tpu.matmul %152, %226, %cst_168 {dimension_numbers = #tpu.dot_dimension_numbers<[1], [0], [0], [1], [0, 0, 1, 1], [], []>} : vector<8x64xf32>, vector<64x64xf32>, vector<8x64xf32> -> vector<8x64xf32>
    %228 = arith.addf %224, %227 : vector<8x64xf32>
    %c2_169 = arith.constant 2 : index
    %c0_170 = arith.constant 0 : index
    %c0_171 = arith.constant 0 : index
    %229 = vector.load %arg8[%c2_169, %c0_170, %c0_171] : memref<4x1x64xf32, #tpu.memory_space<vmem>>, vector<1x1x64xf32>
    %230 = vector.shape_cast %229 : vector<1x1x64xf32> to vector<1x64xf32>
    %231 = vector.broadcast %230 : vector<1x64xf32> to vector<8x64xf32>
    %232 = arith.addf %228, %231 : vector<8x64xf32>
    %c3_172 = arith.constant 3 : index
    %c0_173 = arith.constant 0 : index
    %c0_174 = arith.constant 0 : index
    %233 = vector.load %arg6[%c3_172, %c0_173, %c0_174] : memref<4x64x64xf32, #tpu.memory_space<vmem>>, vector<1x64x64xf32>
    %234 = vector.shape_cast %233 : vector<1x64x64xf32> to vector<64x64xf32>
    %cst_175 = arith.constant dense<0.000000e+00> : vector<8x64xf32>
    %235 = tpu.matmul %199, %234, %cst_175 {dimension_numbers = #tpu.dot_dimension_numbers<[1], [0], [0], [1], [0, 0, 1, 1], [], []>} : vector<8x64xf32>, vector<64x64xf32>, vector<8x64xf32> -> vector<8x64xf32>
    %c3_176 = arith.constant 3 : index
    %c0_177 = arith.constant 0 : index
    %c0_178 = arith.constant 0 : index
    %236 = vector.load %arg7[%c3_176, %c0_177, %c0_178] : memref<4x64x64xf32, #tpu.memory_space<vmem>>, vector<1x64x64xf32>
    %237 = vector.shape_cast %236 : vector<1x64x64xf32> to vector<64x64xf32>
    %cst_179 = arith.constant dense<0.000000e+00> : vector<8x64xf32>
    %238 = tpu.matmul %152, %237, %cst_179 {dimension_numbers = #tpu.dot_dimension_numbers<[1], [0], [0], [1], [0, 0, 1, 1], [], []>} : vector<8x64xf32>, vector<64x64xf32>, vector<8x64xf32> -> vector<8x64xf32>
    %239 = arith.addf %235, %238 : vector<8x64xf32>
    %c3_180 = arith.constant 3 : index
    %c0_181 = arith.constant 0 : index
    %c0_182 = arith.constant 0 : index
    %240 = vector.load %arg8[%c3_180, %c0_181, %c0_182] : memref<4x1x64xf32, #tpu.memory_space<vmem>>, vector<1x1x64xf32>
    %241 = vector.shape_cast %240 : vector<1x1x64xf32> to vector<1x64xf32>
    %242 = vector.broadcast %241 : vector<1x64xf32> to vector<8x64xf32>
    %243 = arith.addf %239, %242 : vector<8x64xf32>
    %244 = arith.negf %210 : vector<8x64xf32>
    %245 = math.exp %244 : vector<8x64xf32>
    %cst_183 = arith.constant 1.000000e+00 : f32
    %246 = vector.broadcast %cst_183 : f32 to vector<8x64xf32>
    %247 = arith.addf %246, %245 : vector<8x64xf32>
    %248 = arith.divf %246, %247 : vector<8x64xf32>
    %249 = arith.negf %221 : vector<8x64xf32>
    %250 = math.exp %249 : vector<8x64xf32>
    %cst_184 = arith.constant 1.000000e+00 : f32
    %251 = vector.broadcast %cst_184 : f32 to vector<8x64xf32>
    %252 = arith.addf %251, %250 : vector<8x64xf32>
    %253 = arith.divf %251, %252 : vector<8x64xf32>
    %254 = math.tanh %232 : vector<8x64xf32>
    %255 = arith.negf %243 : vector<8x64xf32>
    %256 = math.exp %255 : vector<8x64xf32>
    %cst_185 = arith.constant 1.000000e+00 : f32
    %257 = vector.broadcast %cst_185 : f32 to vector<8x64xf32>
    %258 = arith.addf %257, %256 : vector<8x64xf32>
    %259 = arith.divf %257, %258 : vector<8x64xf32>
    %260 = arith.mulf %253, %150 : vector<8x64xf32>
    %261 = arith.mulf %248, %254 : vector<8x64xf32>
    %262 = arith.addf %260, %261 : vector<8x64xf32>
    %263 = math.tanh %262 : vector<8x64xf32>
    %264 = arith.mulf %259, %263 : vector<8x64xf32>
    %c2_i32 = arith.constant 2 : i32
    %c8_i32_186 = arith.constant 8 : i32
    %265 = arith.muli %c2_i32, %c8_i32_186 : i32
    %266 = tpu.assume_multiple %265, 8 : i32
    %267 = arith.index_cast %266 : i32 to index
    %c0_187 = arith.constant 0 : index
    %268 = vector.load %arg14[%267, %c0_187] : memref<64x64xf32, #tpu.memory_space<vmem>>, vector<8x64xf32>
    %c0_188 = arith.constant 0 : index
    %c0_189 = arith.constant 0 : index
    %c0_190 = arith.constant 0 : index
    %269 = vector.load %arg4[%c0_188, %c0_189, %c0_190] : memref<4x64x64xf32, #tpu.memory_space<vmem>>, vector<1x64x64xf32>
    %270 = vector.shape_cast %269 : vector<1x64x64xf32> to vector<64x64xf32>
    %cst_191 = arith.constant dense<0.000000e+00> : vector<8x64xf32>
    %271 = tpu.matmul %199, %270, %cst_191 {dimension_numbers = #tpu.dot_dimension_numbers<[1], [0], [0], [1], [0, 0, 1, 1], [], []>} : vector<8x64xf32>, vector<64x64xf32>, vector<8x64xf32> -> vector<8x64xf32>
    %272 = arith.addf %268, %271 : vector<8x64xf32>
    %273 = arith.index_cast %266 : i32 to index
    %c0_192 = arith.constant 0 : index
    %274 = vector.load %arg15[%273, %c0_192] : memref<64x64xf32, #tpu.memory_space<vmem>>, vector<8x64xf32>
    %c1_193 = arith.constant 1 : index
    %c0_194 = arith.constant 0 : index
    %c0_195 = arith.constant 0 : index
    %275 = vector.load %arg4[%c1_193, %c0_194, %c0_195] : memref<4x64x64xf32, #tpu.memory_space<vmem>>, vector<1x64x64xf32>
    %276 = vector.shape_cast %275 : vector<1x64x64xf32> to vector<64x64xf32>
    %cst_196 = arith.constant dense<0.000000e+00> : vector<8x64xf32>
    %277 = tpu.matmul %199, %276, %cst_196 {dimension_numbers = #tpu.dot_dimension_numbers<[1], [0], [0], [1], [0, 0, 1, 1], [], []>} : vector<8x64xf32>, vector<64x64xf32>, vector<8x64xf32> -> vector<8x64xf32>
    %278 = arith.addf %274, %277 : vector<8x64xf32>
    %279 = arith.index_cast %266 : i32 to index
    %c0_197 = arith.constant 0 : index
    %280 = vector.load %arg16[%279, %c0_197] : memref<64x64xf32, #tpu.memory_space<vmem>>, vector<8x64xf32>
    %c2_198 = arith.constant 2 : index
    %c0_199 = arith.constant 0 : index
    %c0_200 = arith.constant 0 : index
    %281 = vector.load %arg4[%c2_198, %c0_199, %c0_200] : memref<4x64x64xf32, #tpu.memory_space<vmem>>, vector<1x64x64xf32>
    %282 = vector.shape_cast %281 : vector<1x64x64xf32> to vector<64x64xf32>
    %cst_201 = arith.constant dense<0.000000e+00> : vector<8x64xf32>
    %283 = tpu.matmul %199, %282, %cst_201 {dimension_numbers = #tpu.dot_dimension_numbers<[1], [0], [0], [1], [0, 0, 1, 1], [], []>} : vector<8x64xf32>, vector<64x64xf32>, vector<8x64xf32> -> vector<8x64xf32>
    %284 = arith.addf %280, %283 : vector<8x64xf32>
    %285 = arith.index_cast %266 : i32 to index
    %c0_202 = arith.constant 0 : index
    %286 = vector.load %arg17[%285, %c0_202] : memref<64x64xf32, #tpu.memory_space<vmem>>, vector<8x64xf32>
    %c3_203 = arith.constant 3 : index
    %c0_204 = arith.constant 0 : index
    %c0_205 = arith.constant 0 : index
    %287 = vector.load %arg4[%c3_203, %c0_204, %c0_205] : memref<4x64x64xf32, #tpu.memory_space<vmem>>, vector<1x64x64xf32>
    %288 = vector.shape_cast %287 : vector<1x64x64xf32> to vector<64x64xf32>
    %cst_206 = arith.constant dense<0.000000e+00> : vector<8x64xf32>
    %289 = tpu.matmul %199, %288, %cst_206 {dimension_numbers = #tpu.dot_dimension_numbers<[1], [0], [0], [1], [0, 0, 1, 1], [], []>} : vector<8x64xf32>, vector<64x64xf32>, vector<8x64xf32> -> vector<8x64xf32>
    %290 = arith.addf %286, %289 : vector<8x64xf32>
    %291 = arith.negf %272 : vector<8x64xf32>
    %292 = math.exp %291 : vector<8x64xf32>
    %cst_207 = arith.constant 1.000000e+00 : f32
    %293 = vector.broadcast %cst_207 : f32 to vector<8x64xf32>
    %294 = arith.addf %293, %292 : vector<8x64xf32>
    %295 = arith.divf %293, %294 : vector<8x64xf32>
    %296 = arith.negf %278 : vector<8x64xf32>
    %297 = math.exp %296 : vector<8x64xf32>
    %cst_208 = arith.constant 1.000000e+00 : f32
    %298 = vector.broadcast %cst_208 : f32 to vector<8x64xf32>
    %299 = arith.addf %298, %297 : vector<8x64xf32>
    %300 = arith.divf %298, %299 : vector<8x64xf32>
    %301 = math.tanh %284 : vector<8x64xf32>
    %302 = arith.negf %290 : vector<8x64xf32>
    %303 = math.exp %302 : vector<8x64xf32>
    %cst_209 = arith.constant 1.000000e+00 : f32
    %304 = vector.broadcast %cst_209 : f32 to vector<8x64xf32>
    %305 = arith.addf %304, %303 : vector<8x64xf32>
    %306 = arith.divf %304, %305 : vector<8x64xf32>
    %307 = arith.mulf %300, %197 : vector<8x64xf32>
    %308 = arith.mulf %295, %301 : vector<8x64xf32>
    %309 = arith.addf %307, %308 : vector<8x64xf32>
    %310 = math.tanh %309 : vector<8x64xf32>
    %311 = arith.mulf %306, %310 : vector<8x64xf32>
    %c0_210 = arith.constant 0 : index
    %c0_211 = arith.constant 0 : index
    %c0_212 = arith.constant 0 : index
    %312 = vector.load %arg6[%c0_210, %c0_211, %c0_212] : memref<4x64x64xf32, #tpu.memory_space<vmem>>, vector<1x64x64xf32>
    %313 = vector.shape_cast %312 : vector<1x64x64xf32> to vector<64x64xf32>
    %cst_213 = arith.constant dense<0.000000e+00> : vector<8x64xf32>
    %314 = tpu.matmul %311, %313, %cst_213 {dimension_numbers = #tpu.dot_dimension_numbers<[1], [0], [0], [1], [0, 0, 1, 1], [], []>} : vector<8x64xf32>, vector<64x64xf32>, vector<8x64xf32> -> vector<8x64xf32>
    %c0_214 = arith.constant 0 : index
    %c0_215 = arith.constant 0 : index
    %c0_216 = arith.constant 0 : index
    %315 = vector.load %arg7[%c0_214, %c0_215, %c0_216] : memref<4x64x64xf32, #tpu.memory_space<vmem>>, vector<1x64x64xf32>
    %316 = vector.shape_cast %315 : vector<1x64x64xf32> to vector<64x64xf32>
    %cst_217 = arith.constant dense<0.000000e+00> : vector<8x64xf32>
    %317 = tpu.matmul %264, %316, %cst_217 {dimension_numbers = #tpu.dot_dimension_numbers<[1], [0], [0], [1], [0, 0, 1, 1], [], []>} : vector<8x64xf32>, vector<64x64xf32>, vector<8x64xf32> -> vector<8x64xf32>
    %318 = arith.addf %314, %317 : vector<8x64xf32>
    %c0_218 = arith.constant 0 : index
    %c0_219 = arith.constant 0 : index
    %c0_220 = arith.constant 0 : index
    %319 = vector.load %arg8[%c0_218, %c0_219, %c0_220] : memref<4x1x64xf32, #tpu.memory_space<vmem>>, vector<1x1x64xf32>
    %320 = vector.shape_cast %319 : vector<1x1x64xf32> to vector<1x64xf32>
    %321 = vector.broadcast %320 : vector<1x64xf32> to vector<8x64xf32>
    %322 = arith.addf %318, %321 : vector<8x64xf32>
    %c1_221 = arith.constant 1 : index
    %c0_222 = arith.constant 0 : index
    %c0_223 = arith.constant 0 : index
    %323 = vector.load %arg6[%c1_221, %c0_222, %c0_223] : memref<4x64x64xf32, #tpu.memory_space<vmem>>, vector<1x64x64xf32>
    %324 = vector.shape_cast %323 : vector<1x64x64xf32> to vector<64x64xf32>
    %cst_224 = arith.constant dense<0.000000e+00> : vector<8x64xf32>
    %325 = tpu.matmul %311, %324, %cst_224 {dimension_numbers = #tpu.dot_dimension_numbers<[1], [0], [0], [1], [0, 0, 1, 1], [], []>} : vector<8x64xf32>, vector<64x64xf32>, vector<8x64xf32> -> vector<8x64xf32>
    %c1_225 = arith.constant 1 : index
    %c0_226 = arith.constant 0 : index
    %c0_227 = arith.constant 0 : index
    %326 = vector.load %arg7[%c1_225, %c0_226, %c0_227] : memref<4x64x64xf32, #tpu.memory_space<vmem>>, vector<1x64x64xf32>
    %327 = vector.shape_cast %326 : vector<1x64x64xf32> to vector<64x64xf32>
    %cst_228 = arith.constant dense<0.000000e+00> : vector<8x64xf32>
    %328 = tpu.matmul %264, %327, %cst_228 {dimension_numbers = #tpu.dot_dimension_numbers<[1], [0], [0], [1], [0, 0, 1, 1], [], []>} : vector<8x64xf32>, vector<64x64xf32>, vector<8x64xf32> -> vector<8x64xf32>
    %329 = arith.addf %325, %328 : vector<8x64xf32>
    %c1_229 = arith.constant 1 : index
    %c0_230 = arith.constant 0 : index
    %c0_231 = arith.constant 0 : index
    %330 = vector.load %arg8[%c1_229, %c0_230, %c0_231] : memref<4x1x64xf32, #tpu.memory_space<vmem>>, vector<1x1x64xf32>
    %331 = vector.shape_cast %330 : vector<1x1x64xf32> to vector<1x64xf32>
    %332 = vector.broadcast %331 : vector<1x64xf32> to vector<8x64xf32>
    %333 = arith.addf %329, %332 : vector<8x64xf32>
    %c2_232 = arith.constant 2 : index
    %c0_233 = arith.constant 0 : index
    %c0_234 = arith.constant 0 : index
    %334 = vector.load %arg6[%c2_232, %c0_233, %c0_234] : memref<4x64x64xf32, #tpu.memory_space<vmem>>, vector<1x64x64xf32>
    %335 = vector.shape_cast %334 : vector<1x64x64xf32> to vector<64x64xf32>
    %cst_235 = arith.constant dense<0.000000e+00> : vector<8x64xf32>
    %336 = tpu.matmul %311, %335, %cst_235 {dimension_numbers = #tpu.dot_dimension_numbers<[1], [0], [0], [1], [0, 0, 1, 1], [], []>} : vector<8x64xf32>, vector<64x64xf32>, vector<8x64xf32> -> vector<8x64xf32>
    %c2_236 = arith.constant 2 : index
    %c0_237 = arith.constant 0 : index
    %c0_238 = arith.constant 0 : index
    %337 = vector.load %arg7[%c2_236, %c0_237, %c0_238] : memref<4x64x64xf32, #tpu.memory_space<vmem>>, vector<1x64x64xf32>
    %338 = vector.shape_cast %337 : vector<1x64x64xf32> to vector<64x64xf32>
    %cst_239 = arith.constant dense<0.000000e+00> : vector<8x64xf32>
    %339 = tpu.matmul %264, %338, %cst_239 {dimension_numbers = #tpu.dot_dimension_numbers<[1], [0], [0], [1], [0, 0, 1, 1], [], []>} : vector<8x64xf32>, vector<64x64xf32>, vector<8x64xf32> -> vector<8x64xf32>
    %340 = arith.addf %336, %339 : vector<8x64xf32>
    %c2_240 = arith.constant 2 : index
    %c0_241 = arith.constant 0 : index
    %c0_242 = arith.constant 0 : index
    %341 = vector.load %arg8[%c2_240, %c0_241, %c0_242] : memref<4x1x64xf32, #tpu.memory_space<vmem>>, vector<1x1x64xf32>
    %342 = vector.shape_cast %341 : vector<1x1x64xf32> to vector<1x64xf32>
    %343 = vector.broadcast %342 : vector<1x64xf32> to vector<8x64xf32>
    %344 = arith.addf %340, %343 : vector<8x64xf32>
    %c3_243 = arith.constant 3 : index
    %c0_244 = arith.constant 0 : index
    %c0_245 = arith.constant 0 : index
    %345 = vector.load %arg6[%c3_243, %c0_244, %c0_245] : memref<4x64x64xf32, #tpu.memory_space<vmem>>, vector<1x64x64xf32>
    %346 = vector.shape_cast %345 : vector<1x64x64xf32> to vector<64x64xf32>
    %cst_246 = arith.constant dense<0.000000e+00> : vector<8x64xf32>
    %347 = tpu.matmul %311, %346, %cst_246 {dimension_numbers = #tpu.dot_dimension_numbers<[1], [0], [0], [1], [0, 0, 1, 1], [], []>} : vector<8x64xf32>, vector<64x64xf32>, vector<8x64xf32> -> vector<8x64xf32>
    %c3_247 = arith.constant 3 : index
    %c0_248 = arith.constant 0 : index
    %c0_249 = arith.constant 0 : index
    %348 = vector.load %arg7[%c3_247, %c0_248, %c0_249] : memref<4x64x64xf32, #tpu.memory_space<vmem>>, vector<1x64x64xf32>
    %349 = vector.shape_cast %348 : vector<1x64x64xf32> to vector<64x64xf32>
    %cst_250 = arith.constant dense<0.000000e+00> : vector<8x64xf32>
    %350 = tpu.matmul %264, %349, %cst_250 {dimension_numbers = #tpu.dot_dimension_numbers<[1], [0], [0], [1], [0, 0, 1, 1], [], []>} : vector<8x64xf32>, vector<64x64xf32>, vector<8x64xf32> -> vector<8x64xf32>
    %351 = arith.addf %347, %350 : vector<8x64xf32>
    %c3_251 = arith.constant 3 : index
    %c0_252 = arith.constant 0 : index
    %c0_253 = arith.constant 0 : index
    %352 = vector.load %arg8[%c3_251, %c0_252, %c0_253] : memref<4x1x64xf32, #tpu.memory_space<vmem>>, vector<1x1x64xf32>
    %353 = vector.shape_cast %352 : vector<1x1x64xf32> to vector<1x64xf32>
    %354 = vector.broadcast %353 : vector<1x64xf32> to vector<8x64xf32>
    %355 = arith.addf %351, %354 : vector<8x64xf32>
    %356 = arith.negf %322 : vector<8x64xf32>
    %357 = math.exp %356 : vector<8x64xf32>
    %cst_254 = arith.constant 1.000000e+00 : f32
    %358 = vector.broadcast %cst_254 : f32 to vector<8x64xf32>
    %359 = arith.addf %358, %357 : vector<8x64xf32>
    %360 = arith.divf %358, %359 : vector<8x64xf32>
    %361 = arith.negf %333 : vector<8x64xf32>
    %362 = math.exp %361 : vector<8x64xf32>
    %cst_255 = arith.constant 1.000000e+00 : f32
    %363 = vector.broadcast %cst_255 : f32 to vector<8x64xf32>
    %364 = arith.addf %363, %362 : vector<8x64xf32>
    %365 = arith.divf %363, %364 : vector<8x64xf32>
    %366 = math.tanh %344 : vector<8x64xf32>
    %367 = arith.negf %355 : vector<8x64xf32>
    %368 = math.exp %367 : vector<8x64xf32>
    %cst_256 = arith.constant 1.000000e+00 : f32
    %369 = vector.broadcast %cst_256 : f32 to vector<8x64xf32>
    %370 = arith.addf %369, %368 : vector<8x64xf32>
    %371 = arith.divf %369, %370 : vector<8x64xf32>
    %372 = arith.mulf %365, %262 : vector<8x64xf32>
    %373 = arith.mulf %360, %366 : vector<8x64xf32>
    %374 = arith.addf %372, %373 : vector<8x64xf32>
    %375 = math.tanh %374 : vector<8x64xf32>
    %376 = arith.mulf %371, %375 : vector<8x64xf32>
    %c3_i32 = arith.constant 3 : i32
    %c8_i32_257 = arith.constant 8 : i32
    %377 = arith.muli %c3_i32, %c8_i32_257 : i32
    %378 = tpu.assume_multiple %377, 8 : i32
    %379 = arith.index_cast %378 : i32 to index
    %c0_258 = arith.constant 0 : index
    %380 = vector.load %arg14[%379, %c0_258] : memref<64x64xf32, #tpu.memory_space<vmem>>, vector<8x64xf32>
    %c0_259 = arith.constant 0 : index
    %c0_260 = arith.constant 0 : index
    %c0_261 = arith.constant 0 : index
    %381 = vector.load %arg4[%c0_259, %c0_260, %c0_261] : memref<4x64x64xf32, #tpu.memory_space<vmem>>, vector<1x64x64xf32>
    %382 = vector.shape_cast %381 : vector<1x64x64xf32> to vector<64x64xf32>
    %cst_262 = arith.constant dense<0.000000e+00> : vector<8x64xf32>
    %383 = tpu.matmul %311, %382, %cst_262 {dimension_numbers = #tpu.dot_dimension_numbers<[1], [0], [0], [1], [0, 0, 1, 1], [], []>} : vector<8x64xf32>, vector<64x64xf32>, vector<8x64xf32> -> vector<8x64xf32>
    %384 = arith.addf %380, %383 : vector<8x64xf32>
    %385 = arith.index_cast %378 : i32 to index
    %c0_263 = arith.constant 0 : index
    %386 = vector.load %arg15[%385, %c0_263] : memref<64x64xf32, #tpu.memory_space<vmem>>, vector<8x64xf32>
    %c1_264 = arith.constant 1 : index
    %c0_265 = arith.constant 0 : index
    %c0_266 = arith.constant 0 : index
    %387 = vector.load %arg4[%c1_264, %c0_265, %c0_266] : memref<4x64x64xf32, #tpu.memory_space<vmem>>, vector<1x64x64xf32>
    %388 = vector.shape_cast %387 : vector<1x64x64xf32> to vector<64x64xf32>
    %cst_267 = arith.constant dense<0.000000e+00> : vector<8x64xf32>
    %389 = tpu.matmul %311, %388, %cst_267 {dimension_numbers = #tpu.dot_dimension_numbers<[1], [0], [0], [1], [0, 0, 1, 1], [], []>} : vector<8x64xf32>, vector<64x64xf32>, vector<8x64xf32> -> vector<8x64xf32>
    %390 = arith.addf %386, %389 : vector<8x64xf32>
    %391 = arith.index_cast %378 : i32 to index
    %c0_268 = arith.constant 0 : index
    %392 = vector.load %arg16[%391, %c0_268] : memref<64x64xf32, #tpu.memory_space<vmem>>, vector<8x64xf32>
    %c2_269 = arith.constant 2 : index
    %c0_270 = arith.constant 0 : index
    %c0_271 = arith.constant 0 : index
    %393 = vector.load %arg4[%c2_269, %c0_270, %c0_271] : memref<4x64x64xf32, #tpu.memory_space<vmem>>, vector<1x64x64xf32>
    %394 = vector.shape_cast %393 : vector<1x64x64xf32> to vector<64x64xf32>
    %cst_272 = arith.constant dense<0.000000e+00> : vector<8x64xf32>
    %395 = tpu.matmul %311, %394, %cst_272 {dimension_numbers = #tpu.dot_dimension_numbers<[1], [0], [0], [1], [0, 0, 1, 1], [], []>} : vector<8x64xf32>, vector<64x64xf32>, vector<8x64xf32> -> vector<8x64xf32>
    %396 = arith.addf %392, %395 : vector<8x64xf32>
    %397 = arith.index_cast %378 : i32 to index
    %c0_273 = arith.constant 0 : index
    %398 = vector.load %arg17[%397, %c0_273] : memref<64x64xf32, #tpu.memory_space<vmem>>, vector<8x64xf32>
    %c3_274 = arith.constant 3 : index
    %c0_275 = arith.constant 0 : index
    %c0_276 = arith.constant 0 : index
    %399 = vector.load %arg4[%c3_274, %c0_275, %c0_276] : memref<4x64x64xf32, #tpu.memory_space<vmem>>, vector<1x64x64xf32>
    %400 = vector.shape_cast %399 : vector<1x64x64xf32> to vector<64x64xf32>
    %cst_277 = arith.constant dense<0.000000e+00> : vector<8x64xf32>
    %401 = tpu.matmul %311, %400, %cst_277 {dimension_numbers = #tpu.dot_dimension_numbers<[1], [0], [0], [1], [0, 0, 1, 1], [], []>} : vector<8x64xf32>, vector<64x64xf32>, vector<8x64xf32> -> vector<8x64xf32>
    %402 = arith.addf %398, %401 : vector<8x64xf32>
    %403 = arith.negf %384 : vector<8x64xf32>
    %404 = math.exp %403 : vector<8x64xf32>
    %cst_278 = arith.constant 1.000000e+00 : f32
    %405 = vector.broadcast %cst_278 : f32 to vector<8x64xf32>
    %406 = arith.addf %405, %404 : vector<8x64xf32>
    %407 = arith.divf %405, %406 : vector<8x64xf32>
    %408 = arith.negf %390 : vector<8x64xf32>
    %409 = math.exp %408 : vector<8x64xf32>
    %cst_279 = arith.constant 1.000000e+00 : f32
    %410 = vector.broadcast %cst_279 : f32 to vector<8x64xf32>
    %411 = arith.addf %410, %409 : vector<8x64xf32>
    %412 = arith.divf %410, %411 : vector<8x64xf32>
    %413 = math.tanh %396 : vector<8x64xf32>
    %414 = arith.negf %402 : vector<8x64xf32>
    %415 = math.exp %414 : vector<8x64xf32>
    %cst_280 = arith.constant 1.000000e+00 : f32
    %416 = vector.broadcast %cst_280 : f32 to vector<8x64xf32>
    %417 = arith.addf %416, %415 : vector<8x64xf32>
    %418 = arith.divf %416, %417 : vector<8x64xf32>
    %419 = arith.mulf %412, %309 : vector<8x64xf32>
    %420 = arith.mulf %407, %413 : vector<8x64xf32>
    %421 = arith.addf %419, %420 : vector<8x64xf32>
    %422 = math.tanh %421 : vector<8x64xf32>
    %423 = arith.mulf %418, %422 : vector<8x64xf32>
    %c0_281 = arith.constant 0 : index
    %c0_282 = arith.constant 0 : index
    %c0_283 = arith.constant 0 : index
    %424 = vector.load %arg6[%c0_281, %c0_282, %c0_283] : memref<4x64x64xf32, #tpu.memory_space<vmem>>, vector<1x64x64xf32>
    %425 = vector.shape_cast %424 : vector<1x64x64xf32> to vector<64x64xf32>
    %cst_284 = arith.constant dense<0.000000e+00> : vector<8x64xf32>
    %426 = tpu.matmul %423, %425, %cst_284 {dimension_numbers = #tpu.dot_dimension_numbers<[1], [0], [0], [1], [0, 0, 1, 1], [], []>} : vector<8x64xf32>, vector<64x64xf32>, vector<8x64xf32> -> vector<8x64xf32>
    %c0_285 = arith.constant 0 : index
    %c0_286 = arith.constant 0 : index
    %c0_287 = arith.constant 0 : index
    %427 = vector.load %arg7[%c0_285, %c0_286, %c0_287] : memref<4x64x64xf32, #tpu.memory_space<vmem>>, vector<1x64x64xf32>
    %428 = vector.shape_cast %427 : vector<1x64x64xf32> to vector<64x64xf32>
    %cst_288 = arith.constant dense<0.000000e+00> : vector<8x64xf32>
    %429 = tpu.matmul %376, %428, %cst_288 {dimension_numbers = #tpu.dot_dimension_numbers<[1], [0], [0], [1], [0, 0, 1, 1], [], []>} : vector<8x64xf32>, vector<64x64xf32>, vector<8x64xf32> -> vector<8x64xf32>
    %430 = arith.addf %426, %429 : vector<8x64xf32>
    %c0_289 = arith.constant 0 : index
    %c0_290 = arith.constant 0 : index
    %c0_291 = arith.constant 0 : index
    %431 = vector.load %arg8[%c0_289, %c0_290, %c0_291] : memref<4x1x64xf32, #tpu.memory_space<vmem>>, vector<1x1x64xf32>
    %432 = vector.shape_cast %431 : vector<1x1x64xf32> to vector<1x64xf32>
    %433 = vector.broadcast %432 : vector<1x64xf32> to vector<8x64xf32>
    %434 = arith.addf %430, %433 : vector<8x64xf32>
    %c1_292 = arith.constant 1 : index
    %c0_293 = arith.constant 0 : index
    %c0_294 = arith.constant 0 : index
    %435 = vector.load %arg6[%c1_292, %c0_293, %c0_294] : memref<4x64x64xf32, #tpu.memory_space<vmem>>, vector<1x64x64xf32>
    %436 = vector.shape_cast %435 : vector<1x64x64xf32> to vector<64x64xf32>
    %cst_295 = arith.constant dense<0.000000e+00> : vector<8x64xf32>
    %437 = tpu.matmul %423, %436, %cst_295 {dimension_numbers = #tpu.dot_dimension_numbers<[1], [0], [0], [1], [0, 0, 1, 1], [], []>} : vector<8x64xf32>, vector<64x64xf32>, vector<8x64xf32> -> vector<8x64xf32>
    %c1_296 = arith.constant 1 : index
    %c0_297 = arith.constant 0 : index
    %c0_298 = arith.constant 0 : index
    %438 = vector.load %arg7[%c1_296, %c0_297, %c0_298] : memref<4x64x64xf32, #tpu.memory_space<vmem>>, vector<1x64x64xf32>
    %439 = vector.shape_cast %438 : vector<1x64x64xf32> to vector<64x64xf32>
    %cst_299 = arith.constant dense<0.000000e+00> : vector<8x64xf32>
    %440 = tpu.matmul %376, %439, %cst_299 {dimension_numbers = #tpu.dot_dimension_numbers<[1], [0], [0], [1], [0, 0, 1, 1], [], []>} : vector<8x64xf32>, vector<64x64xf32>, vector<8x64xf32> -> vector<8x64xf32>
    %441 = arith.addf %437, %440 : vector<8x64xf32>
    %c1_300 = arith.constant 1 : index
    %c0_301 = arith.constant 0 : index
    %c0_302 = arith.constant 0 : index
    %442 = vector.load %arg8[%c1_300, %c0_301, %c0_302] : memref<4x1x64xf32, #tpu.memory_space<vmem>>, vector<1x1x64xf32>
    %443 = vector.shape_cast %442 : vector<1x1x64xf32> to vector<1x64xf32>
    %444 = vector.broadcast %443 : vector<1x64xf32> to vector<8x64xf32>
    %445 = arith.addf %441, %444 : vector<8x64xf32>
    %c2_303 = arith.constant 2 : index
    %c0_304 = arith.constant 0 : index
    %c0_305 = arith.constant 0 : index
    %446 = vector.load %arg6[%c2_303, %c0_304, %c0_305] : memref<4x64x64xf32, #tpu.memory_space<vmem>>, vector<1x64x64xf32>
    %447 = vector.shape_cast %446 : vector<1x64x64xf32> to vector<64x64xf32>
    %cst_306 = arith.constant dense<0.000000e+00> : vector<8x64xf32>
    %448 = tpu.matmul %423, %447, %cst_306 {dimension_numbers = #tpu.dot_dimension_numbers<[1], [0], [0], [1], [0, 0, 1, 1], [], []>} : vector<8x64xf32>, vector<64x64xf32>, vector<8x64xf32> -> vector<8x64xf32>
    %c2_307 = arith.constant 2 : index
    %c0_308 = arith.constant 0 : index
    %c0_309 = arith.constant 0 : index
    %449 = vector.load %arg7[%c2_307, %c0_308, %c0_309] : memref<4x64x64xf32, #tpu.memory_space<vmem>>, vector<1x64x64xf32>
    %450 = vector.shape_cast %449 : vector<1x64x64xf32> to vector<64x64xf32>
    %cst_310 = arith.constant dense<0.000000e+00> : vector<8x64xf32>
    %451 = tpu.matmul %376, %450, %cst_310 {dimension_numbers = #tpu.dot_dimension_numbers<[1], [0], [0], [1], [0, 0, 1, 1], [], []>} : vector<8x64xf32>, vector<64x64xf32>, vector<8x64xf32> -> vector<8x64xf32>
    %452 = arith.addf %448, %451 : vector<8x64xf32>
    %c2_311 = arith.constant 2 : index
    %c0_312 = arith.constant 0 : index
    %c0_313 = arith.constant 0 : index
    %453 = vector.load %arg8[%c2_311, %c0_312, %c0_313] : memref<4x1x64xf32, #tpu.memory_space<vmem>>, vector<1x1x64xf32>
    %454 = vector.shape_cast %453 : vector<1x1x64xf32> to vector<1x64xf32>
    %455 = vector.broadcast %454 : vector<1x64xf32> to vector<8x64xf32>
    %456 = arith.addf %452, %455 : vector<8x64xf32>
    %c3_314 = arith.constant 3 : index
    %c0_315 = arith.constant 0 : index
    %c0_316 = arith.constant 0 : index
    %457 = vector.load %arg6[%c3_314, %c0_315, %c0_316] : memref<4x64x64xf32, #tpu.memory_space<vmem>>, vector<1x64x64xf32>
    %458 = vector.shape_cast %457 : vector<1x64x64xf32> to vector<64x64xf32>
    %cst_317 = arith.constant dense<0.000000e+00> : vector<8x64xf32>
    %459 = tpu.matmul %423, %458, %cst_317 {dimension_numbers = #tpu.dot_dimension_numbers<[1], [0], [0], [1], [0, 0, 1, 1], [], []>} : vector<8x64xf32>, vector<64x64xf32>, vector<8x64xf32> -> vector<8x64xf32>
    %c3_318 = arith.constant 3 : index
    %c0_319 = arith.constant 0 : index
    %c0_320 = arith.constant 0 : index
    %460 = vector.load %arg7[%c3_318, %c0_319, %c0_320] : memref<4x64x64xf32, #tpu.memory_space<vmem>>, vector<1x64x64xf32>
    %461 = vector.shape_cast %460 : vector<1x64x64xf32> to vector<64x64xf32>
    %cst_321 = arith.constant dense<0.000000e+00> : vector<8x64xf32>
    %462 = tpu.matmul %376, %461, %cst_321 {dimension_numbers = #tpu.dot_dimension_numbers<[1], [0], [0], [1], [0, 0, 1, 1], [], []>} : vector<8x64xf32>, vector<64x64xf32>, vector<8x64xf32> -> vector<8x64xf32>
    %463 = arith.addf %459, %462 : vector<8x64xf32>
    %c3_322 = arith.constant 3 : index
    %c0_323 = arith.constant 0 : index
    %c0_324 = arith.constant 0 : index
    %464 = vector.load %arg8[%c3_322, %c0_323, %c0_324] : memref<4x1x64xf32, #tpu.memory_space<vmem>>, vector<1x1x64xf32>
    %465 = vector.shape_cast %464 : vector<1x1x64xf32> to vector<1x64xf32>
    %466 = vector.broadcast %465 : vector<1x64xf32> to vector<8x64xf32>
    %467 = arith.addf %463, %466 : vector<8x64xf32>
    %468 = arith.negf %434 : vector<8x64xf32>
    %469 = math.exp %468 : vector<8x64xf32>
    %cst_325 = arith.constant 1.000000e+00 : f32
    %470 = vector.broadcast %cst_325 : f32 to vector<8x64xf32>
    %471 = arith.addf %470, %469 : vector<8x64xf32>
    %472 = arith.divf %470, %471 : vector<8x64xf32>
    %473 = arith.negf %445 : vector<8x64xf32>
    %474 = math.exp %473 : vector<8x64xf32>
    %cst_326 = arith.constant 1.000000e+00 : f32
    %475 = vector.broadcast %cst_326 : f32 to vector<8x64xf32>
    %476 = arith.addf %475, %474 : vector<8x64xf32>
    %477 = arith.divf %475, %476 : vector<8x64xf32>
    %478 = math.tanh %456 : vector<8x64xf32>
    %479 = arith.negf %467 : vector<8x64xf32>
    %480 = math.exp %479 : vector<8x64xf32>
    %cst_327 = arith.constant 1.000000e+00 : f32
    %481 = vector.broadcast %cst_327 : f32 to vector<8x64xf32>
    %482 = arith.addf %481, %480 : vector<8x64xf32>
    %483 = arith.divf %481, %482 : vector<8x64xf32>
    %484 = arith.mulf %477, %374 : vector<8x64xf32>
    %485 = arith.mulf %472, %478 : vector<8x64xf32>
    %486 = arith.addf %484, %485 : vector<8x64xf32>
    %487 = math.tanh %486 : vector<8x64xf32>
    %488 = arith.mulf %483, %487 : vector<8x64xf32>
    %c4_i32 = arith.constant 4 : i32
    %c8_i32_328 = arith.constant 8 : i32
    %489 = arith.muli %c4_i32, %c8_i32_328 : i32
    %490 = tpu.assume_multiple %489, 8 : i32
    %491 = arith.index_cast %490 : i32 to index
    %c0_329 = arith.constant 0 : index
    %492 = vector.load %arg14[%491, %c0_329] : memref<64x64xf32, #tpu.memory_space<vmem>>, vector<8x64xf32>
    %c0_330 = arith.constant 0 : index
    %c0_331 = arith.constant 0 : index
    %c0_332 = arith.constant 0 : index
    %493 = vector.load %arg4[%c0_330, %c0_331, %c0_332] : memref<4x64x64xf32, #tpu.memory_space<vmem>>, vector<1x64x64xf32>
    %494 = vector.shape_cast %493 : vector<1x64x64xf32> to vector<64x64xf32>
    %cst_333 = arith.constant dense<0.000000e+00> : vector<8x64xf32>
    %495 = tpu.matmul %423, %494, %cst_333 {dimension_numbers = #tpu.dot_dimension_numbers<[1], [0], [0], [1], [0, 0, 1, 1], [], []>} : vector<8x64xf32>, vector<64x64xf32>, vector<8x64xf32> -> vector<8x64xf32>
    %496 = arith.addf %492, %495 : vector<8x64xf32>
    %497 = arith.index_cast %490 : i32 to index
    %c0_334 = arith.constant 0 : index
    %498 = vector.load %arg15[%497, %c0_334] : memref<64x64xf32, #tpu.memory_space<vmem>>, vector<8x64xf32>
    %c1_335 = arith.constant 1 : index
    %c0_336 = arith.constant 0 : index
    %c0_337 = arith.constant 0 : index
    %499 = vector.load %arg4[%c1_335, %c0_336, %c0_337] : memref<4x64x64xf32, #tpu.memory_space<vmem>>, vector<1x64x64xf32>
    %500 = vector.shape_cast %499 : vector<1x64x64xf32> to vector<64x64xf32>
    %cst_338 = arith.constant dense<0.000000e+00> : vector<8x64xf32>
    %501 = tpu.matmul %423, %500, %cst_338 {dimension_numbers = #tpu.dot_dimension_numbers<[1], [0], [0], [1], [0, 0, 1, 1], [], []>} : vector<8x64xf32>, vector<64x64xf32>, vector<8x64xf32> -> vector<8x64xf32>
    %502 = arith.addf %498, %501 : vector<8x64xf32>
    %503 = arith.index_cast %490 : i32 to index
    %c0_339 = arith.constant 0 : index
    %504 = vector.load %arg16[%503, %c0_339] : memref<64x64xf32, #tpu.memory_space<vmem>>, vector<8x64xf32>
    %c2_340 = arith.constant 2 : index
    %c0_341 = arith.constant 0 : index
    %c0_342 = arith.constant 0 : index
    %505 = vector.load %arg4[%c2_340, %c0_341, %c0_342] : memref<4x64x64xf32, #tpu.memory_space<vmem>>, vector<1x64x64xf32>
    %506 = vector.shape_cast %505 : vector<1x64x64xf32> to vector<64x64xf32>
    %cst_343 = arith.constant dense<0.000000e+00> : vector<8x64xf32>
    %507 = tpu.matmul %423, %506, %cst_343 {dimension_numbers = #tpu.dot_dimension_numbers<[1], [0], [0], [1], [0, 0, 1, 1], [], []>} : vector<8x64xf32>, vector<64x64xf32>, vector<8x64xf32> -> vector<8x64xf32>
    %508 = arith.addf %504, %507 : vector<8x64xf32>
    %509 = arith.index_cast %490 : i32 to index
    %c0_344 = arith.constant 0 : index
    %510 = vector.load %arg17[%509, %c0_344] : memref<64x64xf32, #tpu.memory_space<vmem>>, vector<8x64xf32>
    %c3_345 = arith.constant 3 : index
    %c0_346 = arith.constant 0 : index
    %c0_347 = arith.constant 0 : index
    %511 = vector.load %arg4[%c3_345, %c0_346, %c0_347] : memref<4x64x64xf32, #tpu.memory_space<vmem>>, vector<1x64x64xf32>
    %512 = vector.shape_cast %511 : vector<1x64x64xf32> to vector<64x64xf32>
    %cst_348 = arith.constant dense<0.000000e+00> : vector<8x64xf32>
    %513 = tpu.matmul %423, %512, %cst_348 {dimension_numbers = #tpu.dot_dimension_numbers<[1], [0], [0], [1], [0, 0, 1, 1], [], []>} : vector<8x64xf32>, vector<64x64xf32>, vector<8x64xf32> -> vector<8x64xf32>
    %514 = arith.addf %510, %513 : vector<8x64xf32>
    %515 = arith.negf %496 : vector<8x64xf32>
    %516 = math.exp %515 : vector<8x64xf32>
    %cst_349 = arith.constant 1.000000e+00 : f32
    %517 = vector.broadcast %cst_349 : f32 to vector<8x64xf32>
    %518 = arith.addf %517, %516 : vector<8x64xf32>
    %519 = arith.divf %517, %518 : vector<8x64xf32>
    %520 = arith.negf %502 : vector<8x64xf32>
    %521 = math.exp %520 : vector<8x64xf32>
    %cst_350 = arith.constant 1.000000e+00 : f32
    %522 = vector.broadcast %cst_350 : f32 to vector<8x64xf32>
    %523 = arith.addf %522, %521 : vector<8x64xf32>
    %524 = arith.divf %522, %523 : vector<8x64xf32>
    %525 = math.tanh %508 : vector<8x64xf32>
    %526 = arith.negf %514 : vector<8x64xf32>
    %527 = math.exp %526 : vector<8x64xf32>
    %cst_351 = arith.constant 1.000000e+00 : f32
    %528 = vector.broadcast %cst_351 : f32 to vector<8x64xf32>
    %529 = arith.addf %528, %527 : vector<8x64xf32>
    %530 = arith.divf %528, %529 : vector<8x64xf32>
    %531 = arith.mulf %524, %421 : vector<8x64xf32>
    %532 = arith.mulf %519, %525 : vector<8x64xf32>
    %533 = arith.addf %531, %532 : vector<8x64xf32>
    %534 = math.tanh %533 : vector<8x64xf32>
    %535 = arith.mulf %530, %534 : vector<8x64xf32>
    %c0_352 = arith.constant 0 : index
    %c0_353 = arith.constant 0 : index
    %c0_354 = arith.constant 0 : index
    %536 = vector.load %arg6[%c0_352, %c0_353, %c0_354] : memref<4x64x64xf32, #tpu.memory_space<vmem>>, vector<1x64x64xf32>
    %537 = vector.shape_cast %536 : vector<1x64x64xf32> to vector<64x64xf32>
    %cst_355 = arith.constant dense<0.000000e+00> : vector<8x64xf32>
    %538 = tpu.matmul %535, %537, %cst_355 {dimension_numbers = #tpu.dot_dimension_numbers<[1], [0], [0], [1], [0, 0, 1, 1], [], []>} : vector<8x64xf32>, vector<64x64xf32>, vector<8x64xf32> -> vector<8x64xf32>
    %c0_356 = arith.constant 0 : index
    %c0_357 = arith.constant 0 : index
    %c0_358 = arith.constant 0 : index
    %539 = vector.load %arg7[%c0_356, %c0_357, %c0_358] : memref<4x64x64xf32, #tpu.memory_space<vmem>>, vector<1x64x64xf32>
    %540 = vector.shape_cast %539 : vector<1x64x64xf32> to vector<64x64xf32>
    %cst_359 = arith.constant dense<0.000000e+00> : vector<8x64xf32>
    %541 = tpu.matmul %488, %540, %cst_359 {dimension_numbers = #tpu.dot_dimension_numbers<[1], [0], [0], [1], [0, 0, 1, 1], [], []>} : vector<8x64xf32>, vector<64x64xf32>, vector<8x64xf32> -> vector<8x64xf32>
    %542 = arith.addf %538, %541 : vector<8x64xf32>
    %c0_360 = arith.constant 0 : index
    %c0_361 = arith.constant 0 : index
    %c0_362 = arith.constant 0 : index
    %543 = vector.load %arg8[%c0_360, %c0_361, %c0_362] : memref<4x1x64xf32, #tpu.memory_space<vmem>>, vector<1x1x64xf32>
    %544 = vector.shape_cast %543 : vector<1x1x64xf32> to vector<1x64xf32>
    %545 = vector.broadcast %544 : vector<1x64xf32> to vector<8x64xf32>
    %546 = arith.addf %542, %545 : vector<8x64xf32>
    %c1_363 = arith.constant 1 : index
    %c0_364 = arith.constant 0 : index
    %c0_365 = arith.constant 0 : index
    %547 = vector.load %arg6[%c1_363, %c0_364, %c0_365] : memref<4x64x64xf32, #tpu.memory_space<vmem>>, vector<1x64x64xf32>
    %548 = vector.shape_cast %547 : vector<1x64x64xf32> to vector<64x64xf32>
    %cst_366 = arith.constant dense<0.000000e+00> : vector<8x64xf32>
    %549 = tpu.matmul %535, %548, %cst_366 {dimension_numbers = #tpu.dot_dimension_numbers<[1], [0], [0], [1], [0, 0, 1, 1], [], []>} : vector<8x64xf32>, vector<64x64xf32>, vector<8x64xf32> -> vector<8x64xf32>
    %c1_367 = arith.constant 1 : index
    %c0_368 = arith.constant 0 : index
    %c0_369 = arith.constant 0 : index
    %550 = vector.load %arg7[%c1_367, %c0_368, %c0_369] : memref<4x64x64xf32, #tpu.memory_space<vmem>>, vector<1x64x64xf32>
    %551 = vector.shape_cast %550 : vector<1x64x64xf32> to vector<64x64xf32>
    %cst_370 = arith.constant dense<0.000000e+00> : vector<8x64xf32>
    %552 = tpu.matmul %488, %551, %cst_370 {dimension_numbers = #tpu.dot_dimension_numbers<[1], [0], [0], [1], [0, 0, 1, 1], [], []>} : vector<8x64xf32>, vector<64x64xf32>, vector<8x64xf32> -> vector<8x64xf32>
    %553 = arith.addf %549, %552 : vector<8x64xf32>
    %c1_371 = arith.constant 1 : index
    %c0_372 = arith.constant 0 : index
    %c0_373 = arith.constant 0 : index
    %554 = vector.load %arg8[%c1_371, %c0_372, %c0_373] : memref<4x1x64xf32, #tpu.memory_space<vmem>>, vector<1x1x64xf32>
    %555 = vector.shape_cast %554 : vector<1x1x64xf32> to vector<1x64xf32>
    %556 = vector.broadcast %555 : vector<1x64xf32> to vector<8x64xf32>
    %557 = arith.addf %553, %556 : vector<8x64xf32>
    %c2_374 = arith.constant 2 : index
    %c0_375 = arith.constant 0 : index
    %c0_376 = arith.constant 0 : index
    %558 = vector.load %arg6[%c2_374, %c0_375, %c0_376] : memref<4x64x64xf32, #tpu.memory_space<vmem>>, vector<1x64x64xf32>
    %559 = vector.shape_cast %558 : vector<1x64x64xf32> to vector<64x64xf32>
    %cst_377 = arith.constant dense<0.000000e+00> : vector<8x64xf32>
    %560 = tpu.matmul %535, %559, %cst_377 {dimension_numbers = #tpu.dot_dimension_numbers<[1], [0], [0], [1], [0, 0, 1, 1], [], []>} : vector<8x64xf32>, vector<64x64xf32>, vector<8x64xf32> -> vector<8x64xf32>
    %c2_378 = arith.constant 2 : index
    %c0_379 = arith.constant 0 : index
    %c0_380 = arith.constant 0 : index
    %561 = vector.load %arg7[%c2_378, %c0_379, %c0_380] : memref<4x64x64xf32, #tpu.memory_space<vmem>>, vector<1x64x64xf32>
    %562 = vector.shape_cast %561 : vector<1x64x64xf32> to vector<64x64xf32>
    %cst_381 = arith.constant dense<0.000000e+00> : vector<8x64xf32>
    %563 = tpu.matmul %488, %562, %cst_381 {dimension_numbers = #tpu.dot_dimension_numbers<[1], [0], [0], [1], [0, 0, 1, 1], [], []>} : vector<8x64xf32>, vector<64x64xf32>, vector<8x64xf32> -> vector<8x64xf32>
    %564 = arith.addf %560, %563 : vector<8x64xf32>
    %c2_382 = arith.constant 2 : index
    %c0_383 = arith.constant 0 : index
    %c0_384 = arith.constant 0 : index
    %565 = vector.load %arg8[%c2_382, %c0_383, %c0_384] : memref<4x1x64xf32, #tpu.memory_space<vmem>>, vector<1x1x64xf32>
    %566 = vector.shape_cast %565 : vector<1x1x64xf32> to vector<1x64xf32>
    %567 = vector.broadcast %566 : vector<1x64xf32> to vector<8x64xf32>
    %568 = arith.addf %564, %567 : vector<8x64xf32>
    %c3_385 = arith.constant 3 : index
    %c0_386 = arith.constant 0 : index
    %c0_387 = arith.constant 0 : index
    %569 = vector.load %arg6[%c3_385, %c0_386, %c0_387] : memref<4x64x64xf32, #tpu.memory_space<vmem>>, vector<1x64x64xf32>
    %570 = vector.shape_cast %569 : vector<1x64x64xf32> to vector<64x64xf32>
    %cst_388 = arith.constant dense<0.000000e+00> : vector<8x64xf32>
    %571 = tpu.matmul %535, %570, %cst_388 {dimension_numbers = #tpu.dot_dimension_numbers<[1], [0], [0], [1], [0, 0, 1, 1], [], []>} : vector<8x64xf32>, vector<64x64xf32>, vector<8x64xf32> -> vector<8x64xf32>
    %c3_389 = arith.constant 3 : index
    %c0_390 = arith.constant 0 : index
    %c0_391 = arith.constant 0 : index
    %572 = vector.load %arg7[%c3_389, %c0_390, %c0_391] : memref<4x64x64xf32, #tpu.memory_space<vmem>>, vector<1x64x64xf32>
    %573 = vector.shape_cast %572 : vector<1x64x64xf32> to vector<64x64xf32>
    %cst_392 = arith.constant dense<0.000000e+00> : vector<8x64xf32>
    %574 = tpu.matmul %488, %573, %cst_392 {dimension_numbers = #tpu.dot_dimension_numbers<[1], [0], [0], [1], [0, 0, 1, 1], [], []>} : vector<8x64xf32>, vector<64x64xf32>, vector<8x64xf32> -> vector<8x64xf32>
    %575 = arith.addf %571, %574 : vector<8x64xf32>
    %c3_393 = arith.constant 3 : index
    %c0_394 = arith.constant 0 : index
    %c0_395 = arith.constant 0 : index
    %576 = vector.load %arg8[%c3_393, %c0_394, %c0_395] : memref<4x1x64xf32, #tpu.memory_space<vmem>>, vector<1x1x64xf32>
    %577 = vector.shape_cast %576 : vector<1x1x64xf32> to vector<1x64xf32>
    %578 = vector.broadcast %577 : vector<1x64xf32> to vector<8x64xf32>
    %579 = arith.addf %575, %578 : vector<8x64xf32>
    %580 = arith.negf %546 : vector<8x64xf32>
    %581 = math.exp %580 : vector<8x64xf32>
    %cst_396 = arith.constant 1.000000e+00 : f32
    %582 = vector.broadcast %cst_396 : f32 to vector<8x64xf32>
    %583 = arith.addf %582, %581 : vector<8x64xf32>
    %584 = arith.divf %582, %583 : vector<8x64xf32>
    %585 = arith.negf %557 : vector<8x64xf32>
    %586 = math.exp %585 : vector<8x64xf32>
    %cst_397 = arith.constant 1.000000e+00 : f32
    %587 = vector.broadcast %cst_397 : f32 to vector<8x64xf32>
    %588 = arith.addf %587, %586 : vector<8x64xf32>
    %589 = arith.divf %587, %588 : vector<8x64xf32>
    %590 = math.tanh %568 : vector<8x64xf32>
    %591 = arith.negf %579 : vector<8x64xf32>
    %592 = math.exp %591 : vector<8x64xf32>
    %cst_398 = arith.constant 1.000000e+00 : f32
    %593 = vector.broadcast %cst_398 : f32 to vector<8x64xf32>
    %594 = arith.addf %593, %592 : vector<8x64xf32>
    %595 = arith.divf %593, %594 : vector<8x64xf32>
    %596 = arith.mulf %589, %486 : vector<8x64xf32>
    %597 = arith.mulf %584, %590 : vector<8x64xf32>
    %598 = arith.addf %596, %597 : vector<8x64xf32>
    %599 = math.tanh %598 : vector<8x64xf32>
    %600 = arith.mulf %595, %599 : vector<8x64xf32>
    %c5_i32 = arith.constant 5 : i32
    %c8_i32_399 = arith.constant 8 : i32
    %601 = arith.muli %c5_i32, %c8_i32_399 : i32
    %602 = tpu.assume_multiple %601, 8 : i32
    %603 = arith.index_cast %602 : i32 to index
    %c0_400 = arith.constant 0 : index
    %604 = vector.load %arg14[%603, %c0_400] : memref<64x64xf32, #tpu.memory_space<vmem>>, vector<8x64xf32>
    %c0_401 = arith.constant 0 : index
    %c0_402 = arith.constant 0 : index
    %c0_403 = arith.constant 0 : index
    %605 = vector.load %arg4[%c0_401, %c0_402, %c0_403] : memref<4x64x64xf32, #tpu.memory_space<vmem>>, vector<1x64x64xf32>
    %606 = vector.shape_cast %605 : vector<1x64x64xf32> to vector<64x64xf32>
    %cst_404 = arith.constant dense<0.000000e+00> : vector<8x64xf32>
    %607 = tpu.matmul %535, %606, %cst_404 {dimension_numbers = #tpu.dot_dimension_numbers<[1], [0], [0], [1], [0, 0, 1, 1], [], []>} : vector<8x64xf32>, vector<64x64xf32>, vector<8x64xf32> -> vector<8x64xf32>
    %608 = arith.addf %604, %607 : vector<8x64xf32>
    %609 = arith.index_cast %602 : i32 to index
    %c0_405 = arith.constant 0 : index
    %610 = vector.load %arg15[%609, %c0_405] : memref<64x64xf32, #tpu.memory_space<vmem>>, vector<8x64xf32>
    %c1_406 = arith.constant 1 : index
    %c0_407 = arith.constant 0 : index
    %c0_408 = arith.constant 0 : index
    %611 = vector.load %arg4[%c1_406, %c0_407, %c0_408] : memref<4x64x64xf32, #tpu.memory_space<vmem>>, vector<1x64x64xf32>
    %612 = vector.shape_cast %611 : vector<1x64x64xf32> to vector<64x64xf32>
    %cst_409 = arith.constant dense<0.000000e+00> : vector<8x64xf32>
    %613 = tpu.matmul %535, %612, %cst_409 {dimension_numbers = #tpu.dot_dimension_numbers<[1], [0], [0], [1], [0, 0, 1, 1], [], []>} : vector<8x64xf32>, vector<64x64xf32>, vector<8x64xf32> -> vector<8x64xf32>
    %614 = arith.addf %610, %613 : vector<8x64xf32>
    %615 = arith.index_cast %602 : i32 to index
    %c0_410 = arith.constant 0 : index
    %616 = vector.load %arg16[%615, %c0_410] : memref<64x64xf32, #tpu.memory_space<vmem>>, vector<8x64xf32>
    %c2_411 = arith.constant 2 : index
    %c0_412 = arith.constant 0 : index
    %c0_413 = arith.constant 0 : index
    %617 = vector.load %arg4[%c2_411, %c0_412, %c0_413] : memref<4x64x64xf32, #tpu.memory_space<vmem>>, vector<1x64x64xf32>
    %618 = vector.shape_cast %617 : vector<1x64x64xf32> to vector<64x64xf32>
    %cst_414 = arith.constant dense<0.000000e+00> : vector<8x64xf32>
    %619 = tpu.matmul %535, %618, %cst_414 {dimension_numbers = #tpu.dot_dimension_numbers<[1], [0], [0], [1], [0, 0, 1, 1], [], []>} : vector<8x64xf32>, vector<64x64xf32>, vector<8x64xf32> -> vector<8x64xf32>
    %620 = arith.addf %616, %619 : vector<8x64xf32>
    %621 = arith.index_cast %602 : i32 to index
    %c0_415 = arith.constant 0 : index
    %622 = vector.load %arg17[%621, %c0_415] : memref<64x64xf32, #tpu.memory_space<vmem>>, vector<8x64xf32>
    %c3_416 = arith.constant 3 : index
    %c0_417 = arith.constant 0 : index
    %c0_418 = arith.constant 0 : index
    %623 = vector.load %arg4[%c3_416, %c0_417, %c0_418] : memref<4x64x64xf32, #tpu.memory_space<vmem>>, vector<1x64x64xf32>
    %624 = vector.shape_cast %623 : vector<1x64x64xf32> to vector<64x64xf32>
    %cst_419 = arith.constant dense<0.000000e+00> : vector<8x64xf32>
    %625 = tpu.matmul %535, %624, %cst_419 {dimension_numbers = #tpu.dot_dimension_numbers<[1], [0], [0], [1], [0, 0, 1, 1], [], []>} : vector<8x64xf32>, vector<64x64xf32>, vector<8x64xf32> -> vector<8x64xf32>
    %626 = arith.addf %622, %625 : vector<8x64xf32>
    %627 = arith.negf %608 : vector<8x64xf32>
    %628 = math.exp %627 : vector<8x64xf32>
    %cst_420 = arith.constant 1.000000e+00 : f32
    %629 = vector.broadcast %cst_420 : f32 to vector<8x64xf32>
    %630 = arith.addf %629, %628 : vector<8x64xf32>
    %631 = arith.divf %629, %630 : vector<8x64xf32>
    %632 = arith.negf %614 : vector<8x64xf32>
    %633 = math.exp %632 : vector<8x64xf32>
    %cst_421 = arith.constant 1.000000e+00 : f32
    %634 = vector.broadcast %cst_421 : f32 to vector<8x64xf32>
    %635 = arith.addf %634, %633 : vector<8x64xf32>
    %636 = arith.divf %634, %635 : vector<8x64xf32>
    %637 = math.tanh %620 : vector<8x64xf32>
    %638 = arith.negf %626 : vector<8x64xf32>
    %639 = math.exp %638 : vector<8x64xf32>
    %cst_422 = arith.constant 1.000000e+00 : f32
    %640 = vector.broadcast %cst_422 : f32 to vector<8x64xf32>
    %641 = arith.addf %640, %639 : vector<8x64xf32>
    %642 = arith.divf %640, %641 : vector<8x64xf32>
    %643 = arith.mulf %636, %533 : vector<8x64xf32>
    %644 = arith.mulf %631, %637 : vector<8x64xf32>
    %645 = arith.addf %643, %644 : vector<8x64xf32>
    %646 = math.tanh %645 : vector<8x64xf32>
    %647 = arith.mulf %642, %646 : vector<8x64xf32>
    %c0_423 = arith.constant 0 : index
    %c0_424 = arith.constant 0 : index
    %c0_425 = arith.constant 0 : index
    %648 = vector.load %arg6[%c0_423, %c0_424, %c0_425] : memref<4x64x64xf32, #tpu.memory_space<vmem>>, vector<1x64x64xf32>
    %649 = vector.shape_cast %648 : vector<1x64x64xf32> to vector<64x64xf32>
    %cst_426 = arith.constant dense<0.000000e+00> : vector<8x64xf32>
    %650 = tpu.matmul %647, %649, %cst_426 {dimension_numbers = #tpu.dot_dimension_numbers<[1], [0], [0], [1], [0, 0, 1, 1], [], []>} : vector<8x64xf32>, vector<64x64xf32>, vector<8x64xf32> -> vector<8x64xf32>
    %c0_427 = arith.constant 0 : index
    %c0_428 = arith.constant 0 : index
    %c0_429 = arith.constant 0 : index
    %651 = vector.load %arg7[%c0_427, %c0_428, %c0_429] : memref<4x64x64xf32, #tpu.memory_space<vmem>>, vector<1x64x64xf32>
    %652 = vector.shape_cast %651 : vector<1x64x64xf32> to vector<64x64xf32>
    %cst_430 = arith.constant dense<0.000000e+00> : vector<8x64xf32>
    %653 = tpu.matmul %600, %652, %cst_430 {dimension_numbers = #tpu.dot_dimension_numbers<[1], [0], [0], [1], [0, 0, 1, 1], [], []>} : vector<8x64xf32>, vector<64x64xf32>, vector<8x64xf32> -> vector<8x64xf32>
    %654 = arith.addf %650, %653 : vector<8x64xf32>
    %c0_431 = arith.constant 0 : index
    %c0_432 = arith.constant 0 : index
    %c0_433 = arith.constant 0 : index
    %655 = vector.load %arg8[%c0_431, %c0_432, %c0_433] : memref<4x1x64xf32, #tpu.memory_space<vmem>>, vector<1x1x64xf32>
    %656 = vector.shape_cast %655 : vector<1x1x64xf32> to vector<1x64xf32>
    %657 = vector.broadcast %656 : vector<1x64xf32> to vector<8x64xf32>
    %658 = arith.addf %654, %657 : vector<8x64xf32>
    %c1_434 = arith.constant 1 : index
    %c0_435 = arith.constant 0 : index
    %c0_436 = arith.constant 0 : index
    %659 = vector.load %arg6[%c1_434, %c0_435, %c0_436] : memref<4x64x64xf32, #tpu.memory_space<vmem>>, vector<1x64x64xf32>
    %660 = vector.shape_cast %659 : vector<1x64x64xf32> to vector<64x64xf32>
    %cst_437 = arith.constant dense<0.000000e+00> : vector<8x64xf32>
    %661 = tpu.matmul %647, %660, %cst_437 {dimension_numbers = #tpu.dot_dimension_numbers<[1], [0], [0], [1], [0, 0, 1, 1], [], []>} : vector<8x64xf32>, vector<64x64xf32>, vector<8x64xf32> -> vector<8x64xf32>
    %c1_438 = arith.constant 1 : index
    %c0_439 = arith.constant 0 : index
    %c0_440 = arith.constant 0 : index
    %662 = vector.load %arg7[%c1_438, %c0_439, %c0_440] : memref<4x64x64xf32, #tpu.memory_space<vmem>>, vector<1x64x64xf32>
    %663 = vector.shape_cast %662 : vector<1x64x64xf32> to vector<64x64xf32>
    %cst_441 = arith.constant dense<0.000000e+00> : vector<8x64xf32>
    %664 = tpu.matmul %600, %663, %cst_441 {dimension_numbers = #tpu.dot_dimension_numbers<[1], [0], [0], [1], [0, 0, 1, 1], [], []>} : vector<8x64xf32>, vector<64x64xf32>, vector<8x64xf32> -> vector<8x64xf32>
    %665 = arith.addf %661, %664 : vector<8x64xf32>
    %c1_442 = arith.constant 1 : index
    %c0_443 = arith.constant 0 : index
    %c0_444 = arith.constant 0 : index
    %666 = vector.load %arg8[%c1_442, %c0_443, %c0_444] : memref<4x1x64xf32, #tpu.memory_space<vmem>>, vector<1x1x64xf32>
    %667 = vector.shape_cast %666 : vector<1x1x64xf32> to vector<1x64xf32>
    %668 = vector.broadcast %667 : vector<1x64xf32> to vector<8x64xf32>
    %669 = arith.addf %665, %668 : vector<8x64xf32>
    %c2_445 = arith.constant 2 : index
    %c0_446 = arith.constant 0 : index
    %c0_447 = arith.constant 0 : index
    %670 = vector.load %arg6[%c2_445, %c0_446, %c0_447] : memref<4x64x64xf32, #tpu.memory_space<vmem>>, vector<1x64x64xf32>
    %671 = vector.shape_cast %670 : vector<1x64x64xf32> to vector<64x64xf32>
    %cst_448 = arith.constant dense<0.000000e+00> : vector<8x64xf32>
    %672 = tpu.matmul %647, %671, %cst_448 {dimension_numbers = #tpu.dot_dimension_numbers<[1], [0], [0], [1], [0, 0, 1, 1], [], []>} : vector<8x64xf32>, vector<64x64xf32>, vector<8x64xf32> -> vector<8x64xf32>
    %c2_449 = arith.constant 2 : index
    %c0_450 = arith.constant 0 : index
    %c0_451 = arith.constant 0 : index
    %673 = vector.load %arg7[%c2_449, %c0_450, %c0_451] : memref<4x64x64xf32, #tpu.memory_space<vmem>>, vector<1x64x64xf32>
    %674 = vector.shape_cast %673 : vector<1x64x64xf32> to vector<64x64xf32>
    %cst_452 = arith.constant dense<0.000000e+00> : vector<8x64xf32>
    %675 = tpu.matmul %600, %674, %cst_452 {dimension_numbers = #tpu.dot_dimension_numbers<[1], [0], [0], [1], [0, 0, 1, 1], [], []>} : vector<8x64xf32>, vector<64x64xf32>, vector<8x64xf32> -> vector<8x64xf32>
    %676 = arith.addf %672, %675 : vector<8x64xf32>
    %c2_453 = arith.constant 2 : index
    %c0_454 = arith.constant 0 : index
    %c0_455 = arith.constant 0 : index
    %677 = vector.load %arg8[%c2_453, %c0_454, %c0_455] : memref<4x1x64xf32, #tpu.memory_space<vmem>>, vector<1x1x64xf32>
    %678 = vector.shape_cast %677 : vector<1x1x64xf32> to vector<1x64xf32>
    %679 = vector.broadcast %678 : vector<1x64xf32> to vector<8x64xf32>
    %680 = arith.addf %676, %679 : vector<8x64xf32>
    %c3_456 = arith.constant 3 : index
    %c0_457 = arith.constant 0 : index
    %c0_458 = arith.constant 0 : index
    %681 = vector.load %arg6[%c3_456, %c0_457, %c0_458] : memref<4x64x64xf32, #tpu.memory_space<vmem>>, vector<1x64x64xf32>
    %682 = vector.shape_cast %681 : vector<1x64x64xf32> to vector<64x64xf32>
    %cst_459 = arith.constant dense<0.000000e+00> : vector<8x64xf32>
    %683 = tpu.matmul %647, %682, %cst_459 {dimension_numbers = #tpu.dot_dimension_numbers<[1], [0], [0], [1], [0, 0, 1, 1], [], []>} : vector<8x64xf32>, vector<64x64xf32>, vector<8x64xf32> -> vector<8x64xf32>
    %c3_460 = arith.constant 3 : index
    %c0_461 = arith.constant 0 : index
    %c0_462 = arith.constant 0 : index
    %684 = vector.load %arg7[%c3_460, %c0_461, %c0_462] : memref<4x64x64xf32, #tpu.memory_space<vmem>>, vector<1x64x64xf32>
    %685 = vector.shape_cast %684 : vector<1x64x64xf32> to vector<64x64xf32>
    %cst_463 = arith.constant dense<0.000000e+00> : vector<8x64xf32>
    %686 = tpu.matmul %600, %685, %cst_463 {dimension_numbers = #tpu.dot_dimension_numbers<[1], [0], [0], [1], [0, 0, 1, 1], [], []>} : vector<8x64xf32>, vector<64x64xf32>, vector<8x64xf32> -> vector<8x64xf32>
    %687 = arith.addf %683, %686 : vector<8x64xf32>
    %c3_464 = arith.constant 3 : index
    %c0_465 = arith.constant 0 : index
    %c0_466 = arith.constant 0 : index
    %688 = vector.load %arg8[%c3_464, %c0_465, %c0_466] : memref<4x1x64xf32, #tpu.memory_space<vmem>>, vector<1x1x64xf32>
    %689 = vector.shape_cast %688 : vector<1x1x64xf32> to vector<1x64xf32>
    %690 = vector.broadcast %689 : vector<1x64xf32> to vector<8x64xf32>
    %691 = arith.addf %687, %690 : vector<8x64xf32>
    %692 = arith.negf %658 : vector<8x64xf32>
    %693 = math.exp %692 : vector<8x64xf32>
    %cst_467 = arith.constant 1.000000e+00 : f32
    %694 = vector.broadcast %cst_467 : f32 to vector<8x64xf32>
    %695 = arith.addf %694, %693 : vector<8x64xf32>
    %696 = arith.divf %694, %695 : vector<8x64xf32>
    %697 = arith.negf %669 : vector<8x64xf32>
    %698 = math.exp %697 : vector<8x64xf32>
    %cst_468 = arith.constant 1.000000e+00 : f32
    %699 = vector.broadcast %cst_468 : f32 to vector<8x64xf32>
    %700 = arith.addf %699, %698 : vector<8x64xf32>
    %701 = arith.divf %699, %700 : vector<8x64xf32>
    %702 = math.tanh %680 : vector<8x64xf32>
    %703 = arith.negf %691 : vector<8x64xf32>
    %704 = math.exp %703 : vector<8x64xf32>
    %cst_469 = arith.constant 1.000000e+00 : f32
    %705 = vector.broadcast %cst_469 : f32 to vector<8x64xf32>
    %706 = arith.addf %705, %704 : vector<8x64xf32>
    %707 = arith.divf %705, %706 : vector<8x64xf32>
    %708 = arith.mulf %701, %598 : vector<8x64xf32>
    %709 = arith.mulf %696, %702 : vector<8x64xf32>
    %710 = arith.addf %708, %709 : vector<8x64xf32>
    %711 = math.tanh %710 : vector<8x64xf32>
    %712 = arith.mulf %707, %711 : vector<8x64xf32>
    %c6_i32 = arith.constant 6 : i32
    %c8_i32_470 = arith.constant 8 : i32
    %713 = arith.muli %c6_i32, %c8_i32_470 : i32
    %714 = tpu.assume_multiple %713, 8 : i32
    %715 = arith.index_cast %714 : i32 to index
    %c0_471 = arith.constant 0 : index
    %716 = vector.load %arg14[%715, %c0_471] : memref<64x64xf32, #tpu.memory_space<vmem>>, vector<8x64xf32>
    %c0_472 = arith.constant 0 : index
    %c0_473 = arith.constant 0 : index
    %c0_474 = arith.constant 0 : index
    %717 = vector.load %arg4[%c0_472, %c0_473, %c0_474] : memref<4x64x64xf32, #tpu.memory_space<vmem>>, vector<1x64x64xf32>
    %718 = vector.shape_cast %717 : vector<1x64x64xf32> to vector<64x64xf32>
    %cst_475 = arith.constant dense<0.000000e+00> : vector<8x64xf32>
    %719 = tpu.matmul %647, %718, %cst_475 {dimension_numbers = #tpu.dot_dimension_numbers<[1], [0], [0], [1], [0, 0, 1, 1], [], []>} : vector<8x64xf32>, vector<64x64xf32>, vector<8x64xf32> -> vector<8x64xf32>
    %720 = arith.addf %716, %719 : vector<8x64xf32>
    %721 = arith.index_cast %714 : i32 to index
    %c0_476 = arith.constant 0 : index
    %722 = vector.load %arg15[%721, %c0_476] : memref<64x64xf32, #tpu.memory_space<vmem>>, vector<8x64xf32>
    %c1_477 = arith.constant 1 : index
    %c0_478 = arith.constant 0 : index
    %c0_479 = arith.constant 0 : index
    %723 = vector.load %arg4[%c1_477, %c0_478, %c0_479] : memref<4x64x64xf32, #tpu.memory_space<vmem>>, vector<1x64x64xf32>
    %724 = vector.shape_cast %723 : vector<1x64x64xf32> to vector<64x64xf32>
    %cst_480 = arith.constant dense<0.000000e+00> : vector<8x64xf32>
    %725 = tpu.matmul %647, %724, %cst_480 {dimension_numbers = #tpu.dot_dimension_numbers<[1], [0], [0], [1], [0, 0, 1, 1], [], []>} : vector<8x64xf32>, vector<64x64xf32>, vector<8x64xf32> -> vector<8x64xf32>
    %726 = arith.addf %722, %725 : vector<8x64xf32>
    %727 = arith.index_cast %714 : i32 to index
    %c0_481 = arith.constant 0 : index
    %728 = vector.load %arg16[%727, %c0_481] : memref<64x64xf32, #tpu.memory_space<vmem>>, vector<8x64xf32>
    %c2_482 = arith.constant 2 : index
    %c0_483 = arith.constant 0 : index
    %c0_484 = arith.constant 0 : index
    %729 = vector.load %arg4[%c2_482, %c0_483, %c0_484] : memref<4x64x64xf32, #tpu.memory_space<vmem>>, vector<1x64x64xf32>
    %730 = vector.shape_cast %729 : vector<1x64x64xf32> to vector<64x64xf32>
    %cst_485 = arith.constant dense<0.000000e+00> : vector<8x64xf32>
    %731 = tpu.matmul %647, %730, %cst_485 {dimension_numbers = #tpu.dot_dimension_numbers<[1], [0], [0], [1], [0, 0, 1, 1], [], []>} : vector<8x64xf32>, vector<64x64xf32>, vector<8x64xf32> -> vector<8x64xf32>
    %732 = arith.addf %728, %731 : vector<8x64xf32>
    %733 = arith.index_cast %714 : i32 to index
    %c0_486 = arith.constant 0 : index
    %734 = vector.load %arg17[%733, %c0_486] : memref<64x64xf32, #tpu.memory_space<vmem>>, vector<8x64xf32>
    %c3_487 = arith.constant 3 : index
    %c0_488 = arith.constant 0 : index
    %c0_489 = arith.constant 0 : index
    %735 = vector.load %arg4[%c3_487, %c0_488, %c0_489] : memref<4x64x64xf32, #tpu.memory_space<vmem>>, vector<1x64x64xf32>
    %736 = vector.shape_cast %735 : vector<1x64x64xf32> to vector<64x64xf32>
    %cst_490 = arith.constant dense<0.000000e+00> : vector<8x64xf32>
    %737 = tpu.matmul %647, %736, %cst_490 {dimension_numbers = #tpu.dot_dimension_numbers<[1], [0], [0], [1], [0, 0, 1, 1], [], []>} : vector<8x64xf32>, vector<64x64xf32>, vector<8x64xf32> -> vector<8x64xf32>
    %738 = arith.addf %734, %737 : vector<8x64xf32>
    %739 = arith.negf %720 : vector<8x64xf32>
    %740 = math.exp %739 : vector<8x64xf32>
    %cst_491 = arith.constant 1.000000e+00 : f32
    %741 = vector.broadcast %cst_491 : f32 to vector<8x64xf32>
    %742 = arith.addf %741, %740 : vector<8x64xf32>
    %743 = arith.divf %741, %742 : vector<8x64xf32>
    %744 = arith.negf %726 : vector<8x64xf32>
    %745 = math.exp %744 : vector<8x64xf32>
    %cst_492 = arith.constant 1.000000e+00 : f32
    %746 = vector.broadcast %cst_492 : f32 to vector<8x64xf32>
    %747 = arith.addf %746, %745 : vector<8x64xf32>
    %748 = arith.divf %746, %747 : vector<8x64xf32>
    %749 = math.tanh %732 : vector<8x64xf32>
    %750 = arith.negf %738 : vector<8x64xf32>
    %751 = math.exp %750 : vector<8x64xf32>
    %cst_493 = arith.constant 1.000000e+00 : f32
    %752 = vector.broadcast %cst_493 : f32 to vector<8x64xf32>
    %753 = arith.addf %752, %751 : vector<8x64xf32>
    %754 = arith.divf %752, %753 : vector<8x64xf32>
    %755 = arith.mulf %748, %645 : vector<8x64xf32>
    %756 = arith.mulf %743, %749 : vector<8x64xf32>
    %757 = arith.addf %755, %756 : vector<8x64xf32>
    %758 = math.tanh %757 : vector<8x64xf32>
    %759 = arith.mulf %754, %758 : vector<8x64xf32>
    %c0_494 = arith.constant 0 : index
    %c0_495 = arith.constant 0 : index
    %c0_496 = arith.constant 0 : index
    %760 = vector.load %arg6[%c0_494, %c0_495, %c0_496] : memref<4x64x64xf32, #tpu.memory_space<vmem>>, vector<1x64x64xf32>
    %761 = vector.shape_cast %760 : vector<1x64x64xf32> to vector<64x64xf32>
    %cst_497 = arith.constant dense<0.000000e+00> : vector<8x64xf32>
    %762 = tpu.matmul %759, %761, %cst_497 {dimension_numbers = #tpu.dot_dimension_numbers<[1], [0], [0], [1], [0, 0, 1, 1], [], []>} : vector<8x64xf32>, vector<64x64xf32>, vector<8x64xf32> -> vector<8x64xf32>
    %c0_498 = arith.constant 0 : index
    %c0_499 = arith.constant 0 : index
    %c0_500 = arith.constant 0 : index
    %763 = vector.load %arg7[%c0_498, %c0_499, %c0_500] : memref<4x64x64xf32, #tpu.memory_space<vmem>>, vector<1x64x64xf32>
    %764 = vector.shape_cast %763 : vector<1x64x64xf32> to vector<64x64xf32>
    %cst_501 = arith.constant dense<0.000000e+00> : vector<8x64xf32>
    %765 = tpu.matmul %712, %764, %cst_501 {dimension_numbers = #tpu.dot_dimension_numbers<[1], [0], [0], [1], [0, 0, 1, 1], [], []>} : vector<8x64xf32>, vector<64x64xf32>, vector<8x64xf32> -> vector<8x64xf32>
    %766 = arith.addf %762, %765 : vector<8x64xf32>
    %c0_502 = arith.constant 0 : index
    %c0_503 = arith.constant 0 : index
    %c0_504 = arith.constant 0 : index
    %767 = vector.load %arg8[%c0_502, %c0_503, %c0_504] : memref<4x1x64xf32, #tpu.memory_space<vmem>>, vector<1x1x64xf32>
    %768 = vector.shape_cast %767 : vector<1x1x64xf32> to vector<1x64xf32>
    %769 = vector.broadcast %768 : vector<1x64xf32> to vector<8x64xf32>
    %770 = arith.addf %766, %769 : vector<8x64xf32>
    %c1_505 = arith.constant 1 : index
    %c0_506 = arith.constant 0 : index
    %c0_507 = arith.constant 0 : index
    %771 = vector.load %arg6[%c1_505, %c0_506, %c0_507] : memref<4x64x64xf32, #tpu.memory_space<vmem>>, vector<1x64x64xf32>
    %772 = vector.shape_cast %771 : vector<1x64x64xf32> to vector<64x64xf32>
    %cst_508 = arith.constant dense<0.000000e+00> : vector<8x64xf32>
    %773 = tpu.matmul %759, %772, %cst_508 {dimension_numbers = #tpu.dot_dimension_numbers<[1], [0], [0], [1], [0, 0, 1, 1], [], []>} : vector<8x64xf32>, vector<64x64xf32>, vector<8x64xf32> -> vector<8x64xf32>
    %c1_509 = arith.constant 1 : index
    %c0_510 = arith.constant 0 : index
    %c0_511 = arith.constant 0 : index
    %774 = vector.load %arg7[%c1_509, %c0_510, %c0_511] : memref<4x64x64xf32, #tpu.memory_space<vmem>>, vector<1x64x64xf32>
    %775 = vector.shape_cast %774 : vector<1x64x64xf32> to vector<64x64xf32>
    %cst_512 = arith.constant dense<0.000000e+00> : vector<8x64xf32>
    %776 = tpu.matmul %712, %775, %cst_512 {dimension_numbers = #tpu.dot_dimension_numbers<[1], [0], [0], [1], [0, 0, 1, 1], [], []>} : vector<8x64xf32>, vector<64x64xf32>, vector<8x64xf32> -> vector<8x64xf32>
    %777 = arith.addf %773, %776 : vector<8x64xf32>
    %c1_513 = arith.constant 1 : index
    %c0_514 = arith.constant 0 : index
    %c0_515 = arith.constant 0 : index
    %778 = vector.load %arg8[%c1_513, %c0_514, %c0_515] : memref<4x1x64xf32, #tpu.memory_space<vmem>>, vector<1x1x64xf32>
    %779 = vector.shape_cast %778 : vector<1x1x64xf32> to vector<1x64xf32>
    %780 = vector.broadcast %779 : vector<1x64xf32> to vector<8x64xf32>
    %781 = arith.addf %777, %780 : vector<8x64xf32>
    %c2_516 = arith.constant 2 : index
    %c0_517 = arith.constant 0 : index
    %c0_518 = arith.constant 0 : index
    %782 = vector.load %arg6[%c2_516, %c0_517, %c0_518] : memref<4x64x64xf32, #tpu.memory_space<vmem>>, vector<1x64x64xf32>
    %783 = vector.shape_cast %782 : vector<1x64x64xf32> to vector<64x64xf32>
    %cst_519 = arith.constant dense<0.000000e+00> : vector<8x64xf32>
    %784 = tpu.matmul %759, %783, %cst_519 {dimension_numbers = #tpu.dot_dimension_numbers<[1], [0], [0], [1], [0, 0, 1, 1], [], []>} : vector<8x64xf32>, vector<64x64xf32>, vector<8x64xf32> -> vector<8x64xf32>
    %c2_520 = arith.constant 2 : index
    %c0_521 = arith.constant 0 : index
    %c0_522 = arith.constant 0 : index
    %785 = vector.load %arg7[%c2_520, %c0_521, %c0_522] : memref<4x64x64xf32, #tpu.memory_space<vmem>>, vector<1x64x64xf32>
    %786 = vector.shape_cast %785 : vector<1x64x64xf32> to vector<64x64xf32>
    %cst_523 = arith.constant dense<0.000000e+00> : vector<8x64xf32>
    %787 = tpu.matmul %712, %786, %cst_523 {dimension_numbers = #tpu.dot_dimension_numbers<[1], [0], [0], [1], [0, 0, 1, 1], [], []>} : vector<8x64xf32>, vector<64x64xf32>, vector<8x64xf32> -> vector<8x64xf32>
    %788 = arith.addf %784, %787 : vector<8x64xf32>
    %c2_524 = arith.constant 2 : index
    %c0_525 = arith.constant 0 : index
    %c0_526 = arith.constant 0 : index
    %789 = vector.load %arg8[%c2_524, %c0_525, %c0_526] : memref<4x1x64xf32, #tpu.memory_space<vmem>>, vector<1x1x64xf32>
    %790 = vector.shape_cast %789 : vector<1x1x64xf32> to vector<1x64xf32>
    %791 = vector.broadcast %790 : vector<1x64xf32> to vector<8x64xf32>
    %792 = arith.addf %788, %791 : vector<8x64xf32>
    %c3_527 = arith.constant 3 : index
    %c0_528 = arith.constant 0 : index
    %c0_529 = arith.constant 0 : index
    %793 = vector.load %arg6[%c3_527, %c0_528, %c0_529] : memref<4x64x64xf32, #tpu.memory_space<vmem>>, vector<1x64x64xf32>
    %794 = vector.shape_cast %793 : vector<1x64x64xf32> to vector<64x64xf32>
    %cst_530 = arith.constant dense<0.000000e+00> : vector<8x64xf32>
    %795 = tpu.matmul %759, %794, %cst_530 {dimension_numbers = #tpu.dot_dimension_numbers<[1], [0], [0], [1], [0, 0, 1, 1], [], []>} : vector<8x64xf32>, vector<64x64xf32>, vector<8x64xf32> -> vector<8x64xf32>
    %c3_531 = arith.constant 3 : index
    %c0_532 = arith.constant 0 : index
    %c0_533 = arith.constant 0 : index
    %796 = vector.load %arg7[%c3_531, %c0_532, %c0_533] : memref<4x64x64xf32, #tpu.memory_space<vmem>>, vector<1x64x64xf32>
    %797 = vector.shape_cast %796 : vector<1x64x64xf32> to vector<64x64xf32>
    %cst_534 = arith.constant dense<0.000000e+00> : vector<8x64xf32>
    %798 = tpu.matmul %712, %797, %cst_534 {dimension_numbers = #tpu.dot_dimension_numbers<[1], [0], [0], [1], [0, 0, 1, 1], [], []>} : vector<8x64xf32>, vector<64x64xf32>, vector<8x64xf32> -> vector<8x64xf32>
    %799 = arith.addf %795, %798 : vector<8x64xf32>
    %c3_535 = arith.constant 3 : index
    %c0_536 = arith.constant 0 : index
    %c0_537 = arith.constant 0 : index
    %800 = vector.load %arg8[%c3_535, %c0_536, %c0_537] : memref<4x1x64xf32, #tpu.memory_space<vmem>>, vector<1x1x64xf32>
    %801 = vector.shape_cast %800 : vector<1x1x64xf32> to vector<1x64xf32>
    %802 = vector.broadcast %801 : vector<1x64xf32> to vector<8x64xf32>
    %803 = arith.addf %799, %802 : vector<8x64xf32>
    %804 = arith.negf %770 : vector<8x64xf32>
    %805 = math.exp %804 : vector<8x64xf32>
    %cst_538 = arith.constant 1.000000e+00 : f32
    %806 = vector.broadcast %cst_538 : f32 to vector<8x64xf32>
    %807 = arith.addf %806, %805 : vector<8x64xf32>
    %808 = arith.divf %806, %807 : vector<8x64xf32>
    %809 = arith.negf %781 : vector<8x64xf32>
    %810 = math.exp %809 : vector<8x64xf32>
    %cst_539 = arith.constant 1.000000e+00 : f32
    %811 = vector.broadcast %cst_539 : f32 to vector<8x64xf32>
    %812 = arith.addf %811, %810 : vector<8x64xf32>
    %813 = arith.divf %811, %812 : vector<8x64xf32>
    %814 = math.tanh %792 : vector<8x64xf32>
    %815 = arith.negf %803 : vector<8x64xf32>
    %816 = math.exp %815 : vector<8x64xf32>
    %cst_540 = arith.constant 1.000000e+00 : f32
    %817 = vector.broadcast %cst_540 : f32 to vector<8x64xf32>
    %818 = arith.addf %817, %816 : vector<8x64xf32>
    %819 = arith.divf %817, %818 : vector<8x64xf32>
    %820 = arith.mulf %813, %710 : vector<8x64xf32>
    %821 = arith.mulf %808, %814 : vector<8x64xf32>
    %822 = arith.addf %820, %821 : vector<8x64xf32>
    %823 = math.tanh %822 : vector<8x64xf32>
    %824 = arith.mulf %819, %823 : vector<8x64xf32>
    %c7_i32 = arith.constant 7 : i32
    %c8_i32_541 = arith.constant 8 : i32
    %825 = arith.muli %c7_i32, %c8_i32_541 : i32
    %826 = tpu.assume_multiple %825, 8 : i32
    %827 = arith.index_cast %826 : i32 to index
    %c0_542 = arith.constant 0 : index
    %828 = vector.load %arg14[%827, %c0_542] : memref<64x64xf32, #tpu.memory_space<vmem>>, vector<8x64xf32>
    %c0_543 = arith.constant 0 : index
    %c0_544 = arith.constant 0 : index
    %c0_545 = arith.constant 0 : index
    %829 = vector.load %arg4[%c0_543, %c0_544, %c0_545] : memref<4x64x64xf32, #tpu.memory_space<vmem>>, vector<1x64x64xf32>
    %830 = vector.shape_cast %829 : vector<1x64x64xf32> to vector<64x64xf32>
    %cst_546 = arith.constant dense<0.000000e+00> : vector<8x64xf32>
    %831 = tpu.matmul %759, %830, %cst_546 {dimension_numbers = #tpu.dot_dimension_numbers<[1], [0], [0], [1], [0, 0, 1, 1], [], []>} : vector<8x64xf32>, vector<64x64xf32>, vector<8x64xf32> -> vector<8x64xf32>
    %832 = arith.addf %828, %831 : vector<8x64xf32>
    %833 = arith.index_cast %826 : i32 to index
    %c0_547 = arith.constant 0 : index
    %834 = vector.load %arg15[%833, %c0_547] : memref<64x64xf32, #tpu.memory_space<vmem>>, vector<8x64xf32>
    %c1_548 = arith.constant 1 : index
    %c0_549 = arith.constant 0 : index
    %c0_550 = arith.constant 0 : index
    %835 = vector.load %arg4[%c1_548, %c0_549, %c0_550] : memref<4x64x64xf32, #tpu.memory_space<vmem>>, vector<1x64x64xf32>
    %836 = vector.shape_cast %835 : vector<1x64x64xf32> to vector<64x64xf32>
    %cst_551 = arith.constant dense<0.000000e+00> : vector<8x64xf32>
    %837 = tpu.matmul %759, %836, %cst_551 {dimension_numbers = #tpu.dot_dimension_numbers<[1], [0], [0], [1], [0, 0, 1, 1], [], []>} : vector<8x64xf32>, vector<64x64xf32>, vector<8x64xf32> -> vector<8x64xf32>
    %838 = arith.addf %834, %837 : vector<8x64xf32>
    %839 = arith.index_cast %826 : i32 to index
    %c0_552 = arith.constant 0 : index
    %840 = vector.load %arg16[%839, %c0_552] : memref<64x64xf32, #tpu.memory_space<vmem>>, vector<8x64xf32>
    %c2_553 = arith.constant 2 : index
    %c0_554 = arith.constant 0 : index
    %c0_555 = arith.constant 0 : index
    %841 = vector.load %arg4[%c2_553, %c0_554, %c0_555] : memref<4x64x64xf32, #tpu.memory_space<vmem>>, vector<1x64x64xf32>
    %842 = vector.shape_cast %841 : vector<1x64x64xf32> to vector<64x64xf32>
    %cst_556 = arith.constant dense<0.000000e+00> : vector<8x64xf32>
    %843 = tpu.matmul %759, %842, %cst_556 {dimension_numbers = #tpu.dot_dimension_numbers<[1], [0], [0], [1], [0, 0, 1, 1], [], []>} : vector<8x64xf32>, vector<64x64xf32>, vector<8x64xf32> -> vector<8x64xf32>
    %844 = arith.addf %840, %843 : vector<8x64xf32>
    %845 = arith.index_cast %826 : i32 to index
    %c0_557 = arith.constant 0 : index
    %846 = vector.load %arg17[%845, %c0_557] : memref<64x64xf32, #tpu.memory_space<vmem>>, vector<8x64xf32>
    %c3_558 = arith.constant 3 : index
    %c0_559 = arith.constant 0 : index
    %c0_560 = arith.constant 0 : index
    %847 = vector.load %arg4[%c3_558, %c0_559, %c0_560] : memref<4x64x64xf32, #tpu.memory_space<vmem>>, vector<1x64x64xf32>
    %848 = vector.shape_cast %847 : vector<1x64x64xf32> to vector<64x64xf32>
    %cst_561 = arith.constant dense<0.000000e+00> : vector<8x64xf32>
    %849 = tpu.matmul %759, %848, %cst_561 {dimension_numbers = #tpu.dot_dimension_numbers<[1], [0], [0], [1], [0, 0, 1, 1], [], []>} : vector<8x64xf32>, vector<64x64xf32>, vector<8x64xf32> -> vector<8x64xf32>
    %850 = arith.addf %846, %849 : vector<8x64xf32>
    %851 = arith.negf %832 : vector<8x64xf32>
    %852 = math.exp %851 : vector<8x64xf32>
    %cst_562 = arith.constant 1.000000e+00 : f32
    %853 = vector.broadcast %cst_562 : f32 to vector<8x64xf32>
    %854 = arith.addf %853, %852 : vector<8x64xf32>
    %855 = arith.divf %853, %854 : vector<8x64xf32>
    %856 = arith.negf %838 : vector<8x64xf32>
    %857 = math.exp %856 : vector<8x64xf32>
    %cst_563 = arith.constant 1.000000e+00 : f32
    %858 = vector.broadcast %cst_563 : f32 to vector<8x64xf32>
    %859 = arith.addf %858, %857 : vector<8x64xf32>
    %860 = arith.divf %858, %859 : vector<8x64xf32>
    %861 = math.tanh %844 : vector<8x64xf32>
    %862 = arith.negf %850 : vector<8x64xf32>
    %863 = math.exp %862 : vector<8x64xf32>
    %cst_564 = arith.constant 1.000000e+00 : f32
    %864 = vector.broadcast %cst_564 : f32 to vector<8x64xf32>
    %865 = arith.addf %864, %863 : vector<8x64xf32>
    %866 = arith.divf %864, %865 : vector<8x64xf32>
    %867 = arith.mulf %860, %757 : vector<8x64xf32>
    %868 = arith.mulf %855, %861 : vector<8x64xf32>
    %869 = arith.addf %867, %868 : vector<8x64xf32>
    %870 = math.tanh %869 : vector<8x64xf32>
    %871 = arith.mulf %866, %870 : vector<8x64xf32>
    %c0_565 = arith.constant 0 : index
    %c0_566 = arith.constant 0 : index
    %c0_567 = arith.constant 0 : index
    %872 = vector.load %arg6[%c0_565, %c0_566, %c0_567] : memref<4x64x64xf32, #tpu.memory_space<vmem>>, vector<1x64x64xf32>
    %873 = vector.shape_cast %872 : vector<1x64x64xf32> to vector<64x64xf32>
    %cst_568 = arith.constant dense<0.000000e+00> : vector<8x64xf32>
    %874 = tpu.matmul %871, %873, %cst_568 {dimension_numbers = #tpu.dot_dimension_numbers<[1], [0], [0], [1], [0, 0, 1, 1], [], []>} : vector<8x64xf32>, vector<64x64xf32>, vector<8x64xf32> -> vector<8x64xf32>
    %c0_569 = arith.constant 0 : index
    %c0_570 = arith.constant 0 : index
    %c0_571 = arith.constant 0 : index
    %875 = vector.load %arg7[%c0_569, %c0_570, %c0_571] : memref<4x64x64xf32, #tpu.memory_space<vmem>>, vector<1x64x64xf32>
    %876 = vector.shape_cast %875 : vector<1x64x64xf32> to vector<64x64xf32>
    %cst_572 = arith.constant dense<0.000000e+00> : vector<8x64xf32>
    %877 = tpu.matmul %824, %876, %cst_572 {dimension_numbers = #tpu.dot_dimension_numbers<[1], [0], [0], [1], [0, 0, 1, 1], [], []>} : vector<8x64xf32>, vector<64x64xf32>, vector<8x64xf32> -> vector<8x64xf32>
    %878 = arith.addf %874, %877 : vector<8x64xf32>
    %c0_573 = arith.constant 0 : index
    %c0_574 = arith.constant 0 : index
    %c0_575 = arith.constant 0 : index
    %879 = vector.load %arg8[%c0_573, %c0_574, %c0_575] : memref<4x1x64xf32, #tpu.memory_space<vmem>>, vector<1x1x64xf32>
    %880 = vector.shape_cast %879 : vector<1x1x64xf32> to vector<1x64xf32>
    %881 = vector.broadcast %880 : vector<1x64xf32> to vector<8x64xf32>
    %882 = arith.addf %878, %881 : vector<8x64xf32>
    %c1_576 = arith.constant 1 : index
    %c0_577 = arith.constant 0 : index
    %c0_578 = arith.constant 0 : index
    %883 = vector.load %arg6[%c1_576, %c0_577, %c0_578] : memref<4x64x64xf32, #tpu.memory_space<vmem>>, vector<1x64x64xf32>
    %884 = vector.shape_cast %883 : vector<1x64x64xf32> to vector<64x64xf32>
    %cst_579 = arith.constant dense<0.000000e+00> : vector<8x64xf32>
    %885 = tpu.matmul %871, %884, %cst_579 {dimension_numbers = #tpu.dot_dimension_numbers<[1], [0], [0], [1], [0, 0, 1, 1], [], []>} : vector<8x64xf32>, vector<64x64xf32>, vector<8x64xf32> -> vector<8x64xf32>
    %c1_580 = arith.constant 1 : index
    %c0_581 = arith.constant 0 : index
    %c0_582 = arith.constant 0 : index
    %886 = vector.load %arg7[%c1_580, %c0_581, %c0_582] : memref<4x64x64xf32, #tpu.memory_space<vmem>>, vector<1x64x64xf32>
    %887 = vector.shape_cast %886 : vector<1x64x64xf32> to vector<64x64xf32>
    %cst_583 = arith.constant dense<0.000000e+00> : vector<8x64xf32>
    %888 = tpu.matmul %824, %887, %cst_583 {dimension_numbers = #tpu.dot_dimension_numbers<[1], [0], [0], [1], [0, 0, 1, 1], [], []>} : vector<8x64xf32>, vector<64x64xf32>, vector<8x64xf32> -> vector<8x64xf32>
    %889 = arith.addf %885, %888 : vector<8x64xf32>
    %c1_584 = arith.constant 1 : index
    %c0_585 = arith.constant 0 : index
    %c0_586 = arith.constant 0 : index
    %890 = vector.load %arg8[%c1_584, %c0_585, %c0_586] : memref<4x1x64xf32, #tpu.memory_space<vmem>>, vector<1x1x64xf32>
    %891 = vector.shape_cast %890 : vector<1x1x64xf32> to vector<1x64xf32>
    %892 = vector.broadcast %891 : vector<1x64xf32> to vector<8x64xf32>
    %893 = arith.addf %889, %892 : vector<8x64xf32>
    %c2_587 = arith.constant 2 : index
    %c0_588 = arith.constant 0 : index
    %c0_589 = arith.constant 0 : index
    %894 = vector.load %arg6[%c2_587, %c0_588, %c0_589] : memref<4x64x64xf32, #tpu.memory_space<vmem>>, vector<1x64x64xf32>
    %895 = vector.shape_cast %894 : vector<1x64x64xf32> to vector<64x64xf32>
    %cst_590 = arith.constant dense<0.000000e+00> : vector<8x64xf32>
    %896 = tpu.matmul %871, %895, %cst_590 {dimension_numbers = #tpu.dot_dimension_numbers<[1], [0], [0], [1], [0, 0, 1, 1], [], []>} : vector<8x64xf32>, vector<64x64xf32>, vector<8x64xf32> -> vector<8x64xf32>
    %c2_591 = arith.constant 2 : index
    %c0_592 = arith.constant 0 : index
    %c0_593 = arith.constant 0 : index
    %897 = vector.load %arg7[%c2_591, %c0_592, %c0_593] : memref<4x64x64xf32, #tpu.memory_space<vmem>>, vector<1x64x64xf32>
    %898 = vector.shape_cast %897 : vector<1x64x64xf32> to vector<64x64xf32>
    %cst_594 = arith.constant dense<0.000000e+00> : vector<8x64xf32>
    %899 = tpu.matmul %824, %898, %cst_594 {dimension_numbers = #tpu.dot_dimension_numbers<[1], [0], [0], [1], [0, 0, 1, 1], [], []>} : vector<8x64xf32>, vector<64x64xf32>, vector<8x64xf32> -> vector<8x64xf32>
    %900 = arith.addf %896, %899 : vector<8x64xf32>
    %c2_595 = arith.constant 2 : index
    %c0_596 = arith.constant 0 : index
    %c0_597 = arith.constant 0 : index
    %901 = vector.load %arg8[%c2_595, %c0_596, %c0_597] : memref<4x1x64xf32, #tpu.memory_space<vmem>>, vector<1x1x64xf32>
    %902 = vector.shape_cast %901 : vector<1x1x64xf32> to vector<1x64xf32>
    %903 = vector.broadcast %902 : vector<1x64xf32> to vector<8x64xf32>
    %904 = arith.addf %900, %903 : vector<8x64xf32>
    %c3_598 = arith.constant 3 : index
    %c0_599 = arith.constant 0 : index
    %c0_600 = arith.constant 0 : index
    %905 = vector.load %arg6[%c3_598, %c0_599, %c0_600] : memref<4x64x64xf32, #tpu.memory_space<vmem>>, vector<1x64x64xf32>
    %906 = vector.shape_cast %905 : vector<1x64x64xf32> to vector<64x64xf32>
    %cst_601 = arith.constant dense<0.000000e+00> : vector<8x64xf32>
    %907 = tpu.matmul %871, %906, %cst_601 {dimension_numbers = #tpu.dot_dimension_numbers<[1], [0], [0], [1], [0, 0, 1, 1], [], []>} : vector<8x64xf32>, vector<64x64xf32>, vector<8x64xf32> -> vector<8x64xf32>
    %c3_602 = arith.constant 3 : index
    %c0_603 = arith.constant 0 : index
    %c0_604 = arith.constant 0 : index
    %908 = vector.load %arg7[%c3_602, %c0_603, %c0_604] : memref<4x64x64xf32, #tpu.memory_space<vmem>>, vector<1x64x64xf32>
    %909 = vector.shape_cast %908 : vector<1x64x64xf32> to vector<64x64xf32>
    %cst_605 = arith.constant dense<0.000000e+00> : vector<8x64xf32>
    %910 = tpu.matmul %824, %909, %cst_605 {dimension_numbers = #tpu.dot_dimension_numbers<[1], [0], [0], [1], [0, 0, 1, 1], [], []>} : vector<8x64xf32>, vector<64x64xf32>, vector<8x64xf32> -> vector<8x64xf32>
    %911 = arith.addf %907, %910 : vector<8x64xf32>
    %c3_606 = arith.constant 3 : index
    %c0_607 = arith.constant 0 : index
    %c0_608 = arith.constant 0 : index
    %912 = vector.load %arg8[%c3_606, %c0_607, %c0_608] : memref<4x1x64xf32, #tpu.memory_space<vmem>>, vector<1x1x64xf32>
    %913 = vector.shape_cast %912 : vector<1x1x64xf32> to vector<1x64xf32>
    %914 = vector.broadcast %913 : vector<1x64xf32> to vector<8x64xf32>
    %915 = arith.addf %911, %914 : vector<8x64xf32>
    %916 = arith.negf %882 : vector<8x64xf32>
    %917 = math.exp %916 : vector<8x64xf32>
    %cst_609 = arith.constant 1.000000e+00 : f32
    %918 = vector.broadcast %cst_609 : f32 to vector<8x64xf32>
    %919 = arith.addf %918, %917 : vector<8x64xf32>
    %920 = arith.divf %918, %919 : vector<8x64xf32>
    %921 = arith.negf %893 : vector<8x64xf32>
    %922 = math.exp %921 : vector<8x64xf32>
    %cst_610 = arith.constant 1.000000e+00 : f32
    %923 = vector.broadcast %cst_610 : f32 to vector<8x64xf32>
    %924 = arith.addf %923, %922 : vector<8x64xf32>
    %925 = arith.divf %923, %924 : vector<8x64xf32>
    %926 = math.tanh %904 : vector<8x64xf32>
    %927 = arith.negf %915 : vector<8x64xf32>
    %928 = math.exp %927 : vector<8x64xf32>
    %cst_611 = arith.constant 1.000000e+00 : f32
    %929 = vector.broadcast %cst_611 : f32 to vector<8x64xf32>
    %930 = arith.addf %929, %928 : vector<8x64xf32>
    %931 = arith.divf %929, %930 : vector<8x64xf32>
    %932 = arith.mulf %925, %822 : vector<8x64xf32>
    %933 = arith.mulf %920, %926 : vector<8x64xf32>
    %934 = arith.addf %932, %933 : vector<8x64xf32>
    %935 = math.tanh %934 : vector<8x64xf32>
    %936 = arith.mulf %931, %935 : vector<8x64xf32>
    %c8_i32_612 = arith.constant 8 : i32
    %c0_613 = arith.constant 0 : index
    %c0_614 = arith.constant 0 : index
    %c0_615 = arith.constant 0 : index
    %937 = vector.load %arg12[%c0_613, %c0_614, %c0_615] : memref<2x8x64xf32, #tpu.memory_space<vmem>>, vector<1x8x64xf32>
    %938 = vector.shape_cast %937 : vector<1x8x64xf32> to vector<8x64xf32>
    %939 = vector.shape_cast %871 : vector<8x64xf32> to vector<1x8x64xf32>
    tpu.vector_store %arg12[%c0_613, %c0_614, %c0_615], %939 {strides = array<i32>} : memref<2x8x64xf32, #tpu.memory_space<vmem>>, vector<1x8x64xf32>,
    %c0_616 = arith.constant 0 : index
    %c0_617 = arith.constant 0 : index
    %c0_618 = arith.constant 0 : index
    %940 = vector.load %arg13[%c0_616, %c0_617, %c0_618] : memref<2x8x64xf32, #tpu.memory_space<vmem>>, vector<1x8x64xf32>
    %941 = vector.shape_cast %940 : vector<1x8x64xf32> to vector<8x64xf32>
    %942 = vector.shape_cast %869 : vector<8x64xf32> to vector<1x8x64xf32>
    tpu.vector_store %arg13[%c0_616, %c0_617, %c0_618], %942 {strides = array<i32>} : memref<2x8x64xf32, #tpu.memory_space<vmem>>, vector<1x8x64xf32>,
    %c1_619 = arith.constant 1 : index
    %c0_620 = arith.constant 0 : index
    %c0_621 = arith.constant 0 : index
    %943 = vector.load %arg12[%c1_619, %c0_620, %c0_621] : memref<2x8x64xf32, #tpu.memory_space<vmem>>, vector<1x8x64xf32>
    %944 = vector.shape_cast %943 : vector<1x8x64xf32> to vector<8x64xf32>
    %945 = vector.shape_cast %936 : vector<8x64xf32> to vector<1x8x64xf32>
    tpu.vector_store %arg12[%c1_619, %c0_620, %c0_621], %945 {strides = array<i32>} : memref<2x8x64xf32, #tpu.memory_space<vmem>>, vector<1x8x64xf32>,
    %c1_622 = arith.constant 1 : index
    %c0_623 = arith.constant 0 : index
    %c0_624 = arith.constant 0 : index
    %946 = vector.load %arg13[%c1_622, %c0_623, %c0_624] : memref<2x8x64xf32, #tpu.memory_space<vmem>>, vector<1x8x64xf32>
    %947 = vector.shape_cast %946 : vector<1x8x64xf32> to vector<8x64xf32>
    %948 = vector.shape_cast %934 : vector<8x64xf32> to vector<1x8x64xf32>
    tpu.vector_store %arg13[%c1_622, %c0_623, %c0_624], %948 {strides = array<i32>} : memref<2x8x64xf32, #tpu.memory_space<vmem>>, vector<1x8x64xf32>,
    %c0_625 = arith.constant 0 : index
    %c0_626 = arith.constant 0 : index
    %949 = vector.load %arg9[%c0_625, %c0_626] : memref<64x1xf32, #tpu.memory_space<vmem>>, vector<64x1xf32>
    %cst_627 = arith.constant dense<0.000000e+00> : vector<8x1xf32>
    %950 = tpu.matmul %936, %949, %cst_627 {dimension_numbers = #tpu.dot_dimension_numbers<[1], [0], [0], [1], [0, 0, 1, 1], [], []>} : vector<8x64xf32>, vector<64x1xf32>, vector<8x1xf32> -> vector<8x1xf32>
    %c0_628 = arith.constant 0 : index
    %c0_629 = arith.constant 0 : index
    %951 = vector.load %arg10[%c0_628, %c0_629] : memref<1x1xf32, #tpu.memory_space<vmem>>, vector<1x1xf32>
    %952 = vector.broadcast %951 : vector<1x1xf32> to vector<8x1xf32>
    %953 = arith.addf %950, %952 : vector<8x1xf32>
    %954 = arith.negf %953 : vector<8x1xf32>
    %955 = math.exp %954 : vector<8x1xf32>
    %cst_630 = arith.constant 1.000000e+00 : f32
    %956 = vector.broadcast %cst_630 : f32 to vector<8x1xf32>
    %957 = arith.addf %956, %955 : vector<8x1xf32>
    %958 = arith.divf %956, %957 : vector<8x1xf32>
    %c0_631 = arith.constant 0 : index
    %c0_632 = arith.constant 0 : index
    %959 = vector.load %arg11[%c0_631, %c0_632] : memref<8x1xf32, #tpu.memory_space<vmem>>, vector<8x1xf32>
    tpu.vector_store %arg11[%c0_631, %c0_632], %958 {strides = array<i32>} : memref<8x1xf32, #tpu.memory_space<vmem>>, vector<8x1xf32>,
    return
  }
}

</mosaic_0001>

<bundles_post_ra>
// kernel: tpu_custom_call.1
= control target key start
LH: loop header
LB: loop body
LE: loop exit
PB: predicated region body
PF: predicated region fallthrough
CT: control target
= control target key end

     0   :  { %s14648_s0 = inlined_call_operand.vmem [shape: f32[64,32], index: 0, kind: input, shape index: {}]   ;;  %s14649_s1 = inlined_call_operand.vmem [shape: f32[2,8,64], index: 1, kind: input, shape index: {}]   ;;  %s14650_s2 = inlined_call_operand.vmem [shape: f32[2,8,64], index: 2, kind: input, shape index: {}]   ;;  %s14651_s3 = inlined_call_operand.vmem [shape: f32[4,32,64], index: 3, kind: input, shape index: {}]   ;;  %s14652_s4 = inlined_call_operand.hbm [shape: f32[4,64,64], index: 4, kind: input, shape index: {}]   ;;  %s14653_s5 = inlined_call_operand.vmem [shape: f32[4,1,64], index: 5, kind: input, shape index: {}]   ;;  %s14654_s6 = inlined_call_operand.hbm [shape: f32[4,64,64], index: 6, kind: input, shape index: {}]   ;;  %s14655_s7 = inlined_call_operand.hbm [shape: f32[4,64,64], index: 7, kind: input, shape index: {}]   ;;  %s14656_s8 = inlined_call_operand.vmem [shape: f32[4,1,64], index: 8, kind: input, shape index: {}]   ;;  %s14657_s9 = inlined_call_operand.vmem [shape: f32[64,1], index: 9, kind: input, shape index: {}]   ;;  %s14658_s10 = inlined_call_operand.<no memory space> [shape: f32[1,1], index: 10, kind: input, shape index: {}]   ;;  %s14659_s11 = inlined_call_operand.vmem [shape: f32[8,1], index: 11, kind: output, shape index: {0}]   ;;  %s14660_s12 = inlined_call_operand.hbm [shape: f32[2,8,64], index: 12, kind: output, shape index: {1}]   ;;  %s14661_s13 = inlined_call_operand.hbm [shape: f32[2,8,64], index: 13, kind: output, shape index: {2}]  }
   0x1   :  { %v19_v0 = vstv %s14658_s10 }
   0x2   :  { %20 = vst [vmem:[#allocation6] sm:$0x1] %v19_v0 }
   0x3   :  { %21 = vsyncpa [#allocation8], 0 }
   0x4   :  { %22 = vsyncpa [#allocation11], 0 }
   0x5   :  { %23 = vsyncpa [#allocation9], 0 }
   0x6   :  { %24 = vsyncpa [#allocation15], 0  ;;  %s12830_s27 = smov [#allocation10]   ;;  %s12831_s29 = smov [#allocation7]  }
   0x7   :  { %s52_s28 = sshll.u32 %s12830_s27, 4  ;;  %s38_s30 = sshll.u32 %s12831_s29, 4  ;;  %s53_s28 = int_to_ptr.vmem [resolvable:$true] %s52_s28  ;;  %s12913_s30 = int_to_ptr.vmem [resolvable:$true] %s38_s30 }
   0x8   :  { %s12712_s16 = scalar_lea.hbm %s14654_s6, 4096 }
   0x9   :  { %p12713_p0 = scmp.ne.s32.totalorder %s14654_s6, %s12712_s16  ;;  %p12716_p1 = scmp.lt.u32.totalorder %s12712_s16, %s14654_s6 }
   0xb   :  { %p12718_p2 = pnand %p12716_p1, %p12713_p0 }
   0xd   :  { %12721 = shalt.err (!%p12718_p2)
}
   0xe   :  { %s12722_s20 = scalar_lea.vmem %s53_s28, 4096  ;;  %p12727_p4 = scmp.lt.s32.totalorder %s53_s28, %s53_s28 }
   0xf   :  { %p12723_p3 = scmp.ne.s32.totalorder %s53_s28, %s12722_s20  ;;  %p12728_p5 = scmp.lt.s32.totalorder %s12722_s20, %s12722_s20 }
  0x11   :  { %p12729_p6 = por %p12728_p5, %p12727_p4 }
  0x13   :  { %p12730_p7 = pnand %p12729_p6, %p12723_p3 }
  0x15   :  { %12733 = shalt.err (!%p12730_p7)
}
  0x16   :  { %s12832_s21 = smov 128   ;;  %s12833_s22 = smov 8  }
  0x17   :  { %58 = dma.hbm_to_vmem [thread:$0]  %s14654_s6, 4096, %s53_s28, [#allocation11], %s12832_s21, %s12832_s21, %s12833_s22  }
  0x18   :  { %s12734_s27 = scalar_lea.hbm %s14652_s4, 4096 }
  0x19   :  { %p12735_p8 = scmp.ne.s32.totalorder %s14652_s4, %s12734_s27  ;;  %p12738_p9 = scmp.lt.u32.totalorder %s12734_s27, %s14652_s4 }
  0x1b   :  { %p12740_p10 = pnand %p12738_p9, %p12735_p8 }
  0x1d   :  { %12743 = shalt.err (!%p12740_p10)
}
  0x1e   :  { %s12744_s17 = scalar_lea.vmem %s12913_s30, 4096  ;;  %p12749_p12 = scmp.lt.s32.totalorder %s12913_s30, %s12913_s30 }
  0x1f   :  { %p12745_p11 = scmp.ne.s32.totalorder %s12913_s30, %s12744_s17  ;;  %p12750_p13 = scmp.lt.s32.totalorder %s12744_s17, %s12744_s17 }
  0x21   :  { %p12751_p0 = por %p12750_p13, %p12749_p12 }
  0x23   :  { %p12752_p1 = pnand %p12751_p0, %p12745_p11 }
  0x25   :  { %12755 = shalt.err (!%p12752_p1)
}
  0x26   :  { %44 = dma.hbm_to_vmem [thread:$0]  %s14652_s4, 4096, %s12913_s30, [#allocation8], %s12832_s21, %s12832_s21, %s12833_s22  }
  0x27   :  { %s12834_s18 = smov [#allocation12]   ;;  %s12756_s23 = scalar_lea.hbm %s14655_s7, 4096 }
  0x28   :  { %s64_s10 = sshll.u32 %s12834_s18, 4  ;;  %p12757_p2 = scmp.ne.s32.totalorder %s14655_s7, %s12756_s23  ;;  %s65_s10 = int_to_ptr.vmem [resolvable:$true] %s64_s10 }
  0x29   :  { %p12760_p3 = scmp.lt.u32.totalorder %s12756_s23, %s14655_s7 }
  0x2b   :  { %p12762_p4 = pnand %p12760_p3, %p12757_p2 }
  0x2d   :  { %12765 = shalt.err (!%p12762_p4)
}
  0x2e   :  { %s12766_s29 = scalar_lea.vmem %s65_s10, 4096  ;;  %p12771_p6 = scmp.lt.s32.totalorder %s65_s10, %s65_s10 }
  0x2f   :  { %p12767_p5 = scmp.ne.s32.totalorder %s65_s10, %s12766_s29  ;;  %p12772_p7 = scmp.lt.s32.totalorder %s12766_s29, %s12766_s29 }
  0x31   :  { %p12773_p8 = por %p12772_p7, %p12771_p6 }
  0x33   :  { %p12774_p9 = pnand %p12773_p8, %p12767_p5 }
  0x35   :  { %12777 = shalt.err (!%p12774_p9)
}
  0x36   :  { %70 = dma.hbm_to_vmem [thread:$0]  %s14655_s7, 4096, %s65_s10, [#allocation11], %s12832_s21, %s12832_s21, %s12833_s22  }
  0x37   :  { %12822 = dma.done.wait [#allocation8], 4096  }
  0x38   :  { %12823 = vsyncadd [#allocation8], 4294963200 }
  0x39   :  { %12824 = dma.done.wait [#allocation11], 8192  }
  0x3a   :  { %12825 = vsyncadd [#allocation11], 4294959104  ;;  %vm105_vm0 = vcmask 261120   ;;  %v94_v1 = vld [vmem:[%s14651_s3] sm:$0xff]  ;;  %v95_v2 = vld [vmem:[%s14651_s3 + $0x8] sm:$0xff]  ;;  %v14668_v37 = vmov 0.0|0.0  }
  0x3b   :  { %v96_v3 = vld [vmem:[%s14651_s3 + $0x10] sm:$0xff]  ;;  %v11234_v4 = vpack.c.bf16 %v95_v2, %v94_v1  ;;  %v97_v5 = vld [vmem:[%s14651_s3 + $0x18] sm:$0xff]  ;;  %v12980_v6 = vld [vmem:[%s14648_s0 + $0x20] sm:$0xff]  ;;  %vm235_vm1 = vcmask 523264   ;;  %vm12836_vm2 = vmmov 0   ;;  %v14662_v54 = vmov 0.0  }
  0x3c   :  { %v12985_v7 = vld [vmem:[%s14648_s0] sm:$0xff]  ;;  %v11238_v8 = vpack.c.bf16 %v97_v5, %v96_v3  ;;  %9325 = vmatprep.mubr.msk.f32.mxu1 %vm105_vm0, %v12980_v6  ;;  %v8193_v10 = vld [vmem:[%s14651_s3 + $0x28] sm:$0xff]  ;;  %v8194_v15 = vld [vmem:[%s14651_s3 + $0x30] sm:$0xff]  ;;  %s12839_s27 = smov [#allocation14]  }
  0x3d   :  { %9319 = vmatprep.mubr.msk.f32.mxu0 %vm105_vm0, %v12985_v7  ;;  %v8192_v9 = vld [vmem:[%s14651_s3 + $0x20] sm:$0xff]  ;;  %11235 = vmatprep.subr.bf16.mxu0 %v11234_v4  ;;  %v8207_v12 = vld [vmem:[%s14651_s3 + $0x48] sm:$0xff]  ;;  %v8195_v16 = vld [vmem:[%s14651_s3 + $0x38] sm:$0xff]  ;;  %s8164_s29 = sshll.u32 %s12839_s27, 4  ;;  %s14608_s29 = int_to_ptr.vmem [resolvable:$true] %s8164_s29 }
  0x3e   :  { %12430 = vmatprep.subr.bf16.mxu1 %v11234_v4  ;;  %v8206_v11 = vld [vmem:[%s14651_s3 + $0x40] sm:$0xff]  ;;  %11237 = vmatpush3.bf16.msra.mxu0 %v11234_v4  ;;  %v11242_v13 = vpack.c.bf16 %v8193_v10, %v8192_v9  ;;  %v8208_v17 = vld [vmem:[%s14651_s3 + $0x50] sm:$0xff]  ;;  %v8209_v18 = vld [vmem:[%s14651_s3 + $0x58] sm:$0xff]  ;;  %v11246_v23 = vpack.c.bf16 %v8195_v16, %v8194_v15 }
  0x3f   :  { %12432 = vmatpush3.bf16.msra.mxu1 %v11234_v4  ;;  %11239 = vmatprep.subr.bf16.mxu0 %v11238_v8  ;;  %v11250_v14 = vpack.c.bf16 %v8207_v12, %v8206_v11  ;;  %v13018_v19 = vld [vmem:[%s14648_s0 + $0x28] sm:$0xff]  ;;  %v13028_v21 = vld [vmem:[%s14648_s0 + $0x30] sm:$0xff]  ;;  %v11254_v24 = vpack.c.bf16 %v8209_v18, %v8208_v17  ;;  %v8220_v25 = vld [vmem:[%s14651_s3 + $0x60] sm:$0xff] }
  0x40   :  { %12431 = vmatprep.subr.bf16.mxu1 %v11238_v8  ;;  %v13023_v20 = vld [vmem:[%s14648_s0 + $0x8] sm:$0xff]  ;;  %v13033_v22 = vld [vmem:[%s14648_s0 + $0x10] sm:$0xff]  ;;  %v13048_v27 = vld [vmem:[%s14648_s0 + $0x38] sm:$0xff] }
  0x41   :  { %v8221_v26 = vld [vmem:[%s14651_s3 + $0x68] sm:$0xff]  ;;  %v13053_v28 = vld [vmem:[%s14648_s0 + $0x18] sm:$0xff]  ;;  %v8222_v32 = vld [vmem:[%s14651_s3 + $0x70] sm:$0xff] }
  0x42   :  { %11241 = vmatpush3.bf16.msra.mxu0 %v11238_v8  ;;  %v629_v29 = vld [vmem:[#allocation7] sm:$0xff]  ;;  %v630_v30 = vld [vmem:[#allocation7 + $0x8] sm:$0xff]  ;;  %v11258_v31 = vpack.c.bf16 %v8221_v26, %v8220_v25  ;;  %v8223_v33 = vld [vmem:[%s14651_s3 + $0x78] sm:$0xff] }
  0x43   :  { %12433 = vmatpush3.bf16.msra.mxu1 %v11238_v8  ;;  %11251 = vmatprep.subr.bf16.mxu0 %v11250_v14  ;;  %v13069_v34 = vpack.c.bf16 %v630_v30, %v629_v29  ;;  %v631_v35 = vld [vmem:[#allocation7 + $0x10] sm:$0xff]  ;;  %v632_v36 = vld [vmem:[#allocation7 + $0x18] sm:$0xff]  ;;  %v11262_v38 = vpack.c.bf16 %v8223_v33, %v8222_v32  ;;  %v633_v40 = vld [vmem:[#allocation7 + $0x20] sm:$0xff] }
  0x44   :  { %11243 = vmatprep.subr.bf16.mxu1 %v11242_v13  ;;  %v13081_v39 = vpack.c.bf16 %v632_v36, %v631_v35  ;;  %v634_v41 = vld [vmem:[#allocation7 + $0x28] sm:$0xff]  ;;  %v635_v43 = vld [vmem:[#allocation7 + $0x30] sm:$0xff]  ;;  %v636_v44 = vld [vmem:[#allocation7 + $0x38] sm:$0xff] }
  0x45   :  { %9320 = vmatmul.mubr.msk.f32.vlgmr.msra.gmra.mrb[0].mxu0 %vm105_vm0, %v13023_v20  ;;  %v13095_v42 = vpack.c.bf16 %v634_v41, %v633_v40  ;;  %v13107_v45 = vpack.c.bf16 %v636_v44, %v635_v43  ;;  %v713_v46 = vld [vmem:[#allocation7 + $0x40] sm:$0xff]  ;;  %v714_v47 = vld [vmem:[#allocation7 + $0x48] sm:$0xff]  ;;  %v715_v53 = vld [vmem:[#allocation7 + $0x50] sm:$0xff] }
  0x46   :  { %9326 = vmatmul.mubr.msk.f32.vlgmr.msra.gmra.mrb[0].mxu1 %vm105_vm0, %v13018_v19  ;;  %11253 = vmatpush3.bf16.msra.mxu0 %v11250_v14  ;;  %v794_v48 = vld [vmem:[#allocation7 + $0x80] sm:$0xff]  ;;  %v795_v49 = vld [vmem:[#allocation7 + $0x88] sm:$0xff]  ;;  %v13120_v50 = vpack.c.bf16 %v714_v47, %v713_v46  ;;  %v716_v55 = vld [vmem:[#allocation7 + $0x58] sm:$0xff] }
  0x47   :  { %11245 = vmatpush3.bf16.msra.mxu1 %v11242_v13  ;;  %9328 = vmatprep.mubr.msk.f32.mxu1 %vm105_vm0, %v13028_v21  ;;  %v13125_v51 = vld [vmem:[%s14649_s1] sm:$0xff]  ;;  %v13127_v52 = vpack.c.bf16 %v795_v49, %v794_v48  ;;  %v796_v56 = vld [vmem:[#allocation7 + $0x90] sm:$0xff]  ;;  %v13138_v58 = vpack.c.bf16 %v716_v55, %v715_v53  ;;  %v718_v61 = vld [vmem:[#allocation7 + $0x68] sm:$0xff] }
  0x48   :  { %9322 = vmatprep.mubr.msk.f32.mxu0 %vm105_vm0, %v13033_v22  ;;  %11247 = vmatprep.subr.bf16.mxu1 %v11246_v23  ;;  %v797_v57 = vld [vmem:[#allocation7 + $0x98] sm:$0xff]  ;;  %v717_v60 = vld [vmem:[#allocation7 + $0x60] sm:$0xff]  ;;  %v799_v63 = vld [vmem:[#allocation7 + $0xa8] sm:$0xff] }
  0x49   :  { %11255 = vmatprep.subr.bf16.mxu0 %v11254_v24  ;;  %9323 = vmatmul.mubr.msk.f32.gmra.mrb[2].mxu0 %vm105_vm0, %v13053_v28  ;;  %v13140_v59 = vpack.c.bf16 %v797_v57, %v796_v56  ;;  %v798_v62 = vld [vmem:[#allocation7 + $0xa0] sm:$0xff]  ;;  %v13152_v0 = vpack.c.bf16 %v718_v61, %v717_v60  ;;  %v719_v2 = vld [vmem:[#allocation7 + $0x70] sm:$0xff]  ;;  %v720_v3 = vld [vmem:[#allocation7 + $0x78] sm:$0xff] }
  0x4a   :  { %9329 = vmatmul.mubr.msk.f32.gmra.mrb[2].mxu1 %vm105_vm0, %v13048_v27  ;;  %11257 = vmatpush3.bf16.msra.mxu0 %v11254_v24  ;;  %v13154_v1 = vpack.c.bf16 %v799_v63, %v798_v62  ;;  %v800_v4 = vld [vmem:[#allocation7 + $0xb0] sm:$0xff]  ;;  %v801_v5 = vld [vmem:[#allocation7 + $0xb8] sm:$0xff]  ;;  %v876_v9 = vld [vmem:[#allocation7 + $0xc8] sm:$0xff] }
  0x4b   :  { %11249 = vmatpush3.bf16.msra.mxu1 %v11246_v23  ;;  %9339 = vmatprep.mubr.msk.f32.mxu1 %vm105_vm0, %v12985_v7  ;;  %14699 = vst [vmem:[#allocation20_spill] sm:$0xff] %v13152_v0  ;;  %v13166_v8 = vpack.c.bf16 %v801_v5, %v800_v4  ;;  %v877_v11 = vld [vmem:[#allocation7 + $0xd0] sm:$0xff]  ;;  %v878_v12 = vld [vmem:[#allocation7 + $0xd8] sm:$0xff]  ;;  %v879_v14 = vld [vmem:[#allocation7 + $0xe0] sm:$0xff] }
  0x4c   :  { %9359 = vmatprep.mubr.msk.f32.mxu0 %vm105_vm0, %v12985_v7  ;;  %11259 = vmatprep.subr.bf16.mxu1 %v11258_v31  ;;  %v13187_v13 = vpack.c.bf16 %v878_v12, %v877_v11  ;;  %v880_v15 = vld [vmem:[#allocation7 + $0xe8] sm:$0xff]  ;;  %v881_v17 = vld [vmem:[#allocation7 + $0xf0] sm:$0xff]  ;;  %v882_v18 = vld [vmem:[#allocation7 + $0xf8] sm:$0xff] }
  0x4d   :  { %11266 = vmatprep.subr.bf16.mxu0 %v14668_v37  ;;  %9360 = vmatmul.mubr.msk.f32.vlgmr.msra.gmra.mrb[4].mxu0 %vm105_vm0, %v13023_v20  ;;  %v13195_v16 = vpack.c.bf16 %v880_v15, %v879_v14  ;;  %v988_v23 = vld [vmem:[#allocation12 + $0x10] sm:$0xff]  ;;  %v989_v24 = vld [vmem:[#allocation12 + $0x18] sm:$0xff]  ;;  %v990_v26 = vld [vmem:[#allocation12 + $0x20] sm:$0xff] }
  0x4e   :  { %9340 = vmatmul.mubr.msk.f32.vlgmr.msra.gmra.mrb[4].mxu1 %vm105_vm0, %v13023_v20  ;;  %11268 = vmatpush3.bf16.msra.mxu0 %v13069_v34  ;;  %14702 = vst [vmem:[#allocation23_spill] sm:$0xff] %v13187_v13  ;;  %v13212_v25 = vpack.c.bf16 %v989_v24, %v988_v23  ;;  %v992_v29 = vld [vmem:[#allocation12 + $0x30] sm:$0xff]  ;;  %v993_v30 = vld [vmem:[#allocation12 + $0x38] sm:$0xff]  ;;  %v1158_v32 = vld [vmem:[#allocation12 + $0x40] sm:$0xff] }
  0x4f   :  { %11261 = vmatpush3.bf16.msra.mxu1 %v11258_v31  ;;  %9342 = vmatprep.mubr.msk.f32.mxu1 %vm105_vm0, %v13033_v22  ;;  %14703 = vst [vmem:[#allocation24_spill] sm:$0xff] %v13195_v16  ;;  %v13220_v31 = vpack.c.bf16 %v993_v30, %v992_v29  ;;  %v1159_v33 = vld [vmem:[#allocation12 + $0x48] sm:$0xff]  ;;  %v1161_v40 = vld [vmem:[#allocation12 + $0x58] sm:$0xff]  ;;  %v1162_v43 = vld [vmem:[#allocation12 + $0x60] sm:$0xff] }
  0x50   :  { %9362 = vmatprep.mubr.msk.f32.mxu0 %vm105_vm0, %v13033_v22  ;;  %11269 = vmatprep.subr.bf16.mxu0 %v14668_v37  ;;  %v13224_v35 = vpack.c.bf16 %v1159_v33, %v1158_v32  ;;  %v13229_v36 = vld [vmem:[%s14649_s1 + $0x8] sm:$0xff]  ;;  %v1164_v47 = vld [vmem:[#allocation12 + $0x70] sm:$0xff]  ;;  %v1165_v48 = vld [vmem:[#allocation12 + $0x78] sm:$0xff] }
  0x51   :  { %11263 = vmatprep.subr.bf16.mxu1 %v11262_v38  ;;  %9363 = vmatmul.mubr.msk.f32.gmra.mrb[6].mxu0 %vm105_vm0, %v13053_v28  ;;  %14706 = vst [vmem:[#allocation27_spill] sm:$0xff] %v13220_v31  ;;  %v1163_v44 = vld [vmem:[#allocation12 + $0x68] sm:$0xff]  ;;  %v13245_v49 = vpack.c.bf16 %v1165_v48, %v1164_v47  ;;  %v1327_v56 = vld [vmem:[#allocation12 + $0x90] sm:$0xff]  ;;  %v1328_v57 = vld [vmem:[#allocation12 + $0x98] sm:$0xff] }
  0x52   :  { %9343 = vmatmul.mubr.msk.f32.gmra.mrb[6].mxu1 %vm105_vm0, %v13053_v28  ;;  %11271 = vmatpush3.bf16.msra.mxu0 %v13081_v39  ;;  %v13241_v46 = vpack.c.bf16 %v1163_v44, %v1162_v43  ;;  %v1326_v53 = vld [vmem:[#allocation12 + $0x88] sm:$0xff]  ;;  %v13257_v60 = vpack.c.bf16 %v1328_v57, %v1327_v56  ;;  %v1329_v61 = vld [vmem:[#allocation12 + $0xa0] sm:$0xff]  ;;  %v1494_v11 = vld [vmem:[#allocation12 + $0xd0] sm:$0xff] }
  0x53   :  { %9345 = vmatprep.mubr.msk.f32.mxu1 %vm105_vm0, %v12980_v6  ;;  %9365 = vmatprep.mubr.msk.f32.mxu0 %vm105_vm0, %v12980_v6  ;;  %v1330_v62 = vld [vmem:[#allocation12 + $0xa8] sm:$0xff]  ;;  %v1492_v5 = vld [vmem:[#allocation12 + $0xc0] sm:$0xff]  ;;  %v1495_v12 = vld [vmem:[#allocation12 + $0xd8] sm:$0xff] }
  0x54   :  { %11272 = vmatprep.subr.bf16.mxu0 %v14668_v37  ;;  %11265 = vmatpush3.bf16.msra.mxu1 %v11262_v38  ;;  %v1160_v38 = vld [vmem:[#allocation12 + $0x50] sm:$0xff]  ;;  %v13261_v63 = vpack.c.bf16 %v1330_v62, %v1329_v61  ;;  %v13277_v14 = vpack.c.bf16 %v1495_v12, %v1494_v11  ;;  %v1496_v15 = vld [vmem:[#allocation12 + $0xe0] sm:$0xff]  ;;  %v981_v30 = vld [vmem:[#allocation10 + $0x18] sm:$0xff] }
  0x55   :  { %9366 = vmatmul.mubr.msk.f32.gmra.mrb[8].mxu0 %vm105_vm0, %v13018_v19  ;;  %11278 = vmatprep.subr.bf16.mxu1 %v14668_v37  ;;  %v13237_v41 = vpack.c.bf16 %v1161_v40, %v1160_v38  ;;  %v978_v24 = vld [vmem:[#allocation10] sm:$0xff]  ;;  %v980_v29 = vld [vmem:[#allocation10 + $0x10] sm:$0xff]  ;;  %v985_v43 = vld [vmem:[#allocation10 + $0x38] sm:$0xff] }
  0x56   :  { %9346 = vmatmul.mubr.msk.f32.gmra.mrb[8].mxu1 %vm105_vm0, %v13018_v19  ;;  %11274 = vmatpush3.bf16.msra.mxu0 %v13095_v42  ;;  %v13297_v32 = vpack.c.bf16 %v981_v30, %v980_v29  ;;  %v982_v33 = vld [vmem:[#allocation10 + $0x20] sm:$0xff]  ;;  %v984_v40 = vld [vmem:[#allocation10 + $0x30] sm:$0xff]  ;;  %v8183_v47 = vld [vmem:[%s14653_s5] ss:$0 sm:$0xff] }
  0x57   :  { %9348 = vmatprep.mubr.msk.f32.mxu1 %vm105_vm0, %v13028_v21  ;;  %9368 = vmatprep.mubr.msk.f32.mxu0 %vm105_vm0, %v13028_v21  ;;  %v13311_v44 = vpack.c.bf16 %v985_v43, %v984_v40 }
  0x58   :  { %11275 = vmatprep.subr.bf16.mxu0 %v14668_v37  ;;  %14708 = vst [vmem:[#allocation29_spill] sm:$0xff] %v13297_v32 }
  0x59   :  { %9369 = vmatmul.mubr.msk.f32.gmra.mrb[10].mxu0 %vm105_vm0, %v13048_v27  ;;  %14710 = vst [vmem:[#allocation31_spill] sm:$0xff] %v13311_v44 }
  0x5a   :  { %9349 = vmatmul.mubr.msk.f32.gmra.mrb[10].mxu1 %vm105_vm0, %v13048_v27  ;;  %11277 = vmatpush3.bf16.msra.mxu0 %v13107_v45 }
  0x5b   :  { %9379 = vmatprep.mubr.msk.f32.mxu1 %vm105_vm0, %v12985_v7  ;;  %9407 = vmatprep.mubr.msk.f32.mxu0 %vm12836_vm2, %v14662_v54  ;;  %v13164_v7 = vpack.c.bf16 %v720_v3, %v719_v2  ;;  %v1331_v2 = vld [vmem:[#allocation12 + $0xb0] sm:$0xff]  ;;  %v1332_v3 = vld [vmem:[#allocation12 + $0xb8] sm:$0xff] }
  0x5c   :  { %11290 = vmatprep.subr.bf16.mxu0 %v14668_v37  ;;  %v13265_v4 = vpack.c.bf16 %v1332_v3, %v1331_v2 }
  0x5d   :  { %9408 = vmatmul.mubr.msk.f32.vlgmr.msra.gmra.mrb[12].mxu0 %vm235_vm1, %v13125_v51  ;;  %14700 = vst [vmem:[#allocation21_spill] sm:$0xff] %v13164_v7 }
  0x5e   :  { %9380 = vmatmul.mubr.msk.f32.vlgmr.msra.gmra.mrb[12].mxu1 %vm105_vm0, %v13023_v20  ;;  %11292 = vmatpush3.bf16.msra.mxu0 %v13127_v52  ;;  %v986_v20 = vld [vmem:[#allocation12] sm:$0xff] }
  0x5f   :  { %11280 = vmatpush3.bf16.msra.mxu1 %v13120_v50  ;;  %9382 = vmatprep.mubr.msk.f32.mxu1 %vm105_vm0, %v13033_v22 }
  0x60   :  { %11281 = vmatprep.subr.bf16.mxu1 %v14668_v37  ;;  %11293 = vmatprep.subr.bf16.mxu0 %v14668_v37 }
  0x61   :  { %9445 = vmatprep.mubr.msk.f32.mxu0 %vm12836_vm2, %v14662_v54 }
  0x62   :  { %9383 = vmatmul.mubr.msk.f32.gmra.mrb[14].mxu1 %vm105_vm0, %v13053_v28  ;;  %11295 = vmatpush3.bf16.msra.mxu0 %v13140_v59 }
  0x63   :  { %11283 = vmatpush3.bf16.msra.mxu1 %v13138_v58  ;;  %9385 = vmatprep.mubr.msk.f32.mxu1 %vm105_vm0, %v12980_v6  ;;  %v875_v6 = vld [vmem:[#allocation7 + $0xc0] sm:$0xff] }
  0x64   :  { %11284 = vmatprep.subr.bf16.mxu1 %v14668_v37  ;;  %11296 = vmatprep.subr.bf16.mxu0 %v14668_v37  ;;  %v13176_v10 = vpack.c.bf16 %v876_v9, %v875_v6  ;;  %v1493_v6 = vld [vmem:[#allocation12 + $0xc8] sm:$0xff] }
  0x65   :  { %v13269_v9 = vpack.c.bf16 %v1493_v6, %v1492_v5 }
  0x66   :  { %9386 = vmatmul.mubr.msk.f32.gmra.mrb[16].mxu1 %vm105_vm0, %v13018_v19  ;;  %11298 = vmatpush3.bf16.msra.mxu0 %v13154_v1  ;;  %14701 = vst [vmem:[#allocation22_spill] sm:$0xff] %v13176_v10  ;;  %v13199_v19 = vpack.c.bf16 %v882_v18, %v881_v17  ;;  %v1497_v17 = vld [vmem:[#allocation12 + $0xe8] sm:$0xff] }
  0x67   :  { %11286 = vmatpush3.bf16.msra.mxu1 %v13152_v0  ;;  %9388 = vmatprep.mubr.msk.f32.mxu1 %vm105_vm0, %v13028_v21  ;;  %v987_v21 = vld [vmem:[#allocation12 + $0x8] sm:$0xff]  ;;  %v13281_v18 = vpack.c.bf16 %v1497_v17, %v1496_v15 }
  0x68   :  { %11287 = vmatprep.subr.bf16.mxu1 %v14668_v37  ;;  %11299 = vmatprep.subr.bf16.mxu0 %v14668_v37  ;;  %14704 = vst [vmem:[#allocation25_spill] sm:$0xff] %v13199_v19  ;;  %v13208_v22 = vpack.c.bf16 %v987_v21, %v986_v20  ;;  %v1498_v20 = vld [vmem:[#allocation12 + $0xf0] sm:$0xff]  ;;  %v1499_v21 = vld [vmem:[#allocation12 + $0xf8] sm:$0xff] }
  0x69   :  { %v13285_v23 = vpack.c.bf16 %v1499_v21, %v1498_v20  ;;  %v8197_v20 = vld [vmem:[%s14653_s5 + $0x1] ss:$0 sm:$0xff] }
  0x6a   :  { %9389 = vmatmul.mubr.msk.f32.gmra.mrb[18].mxu1 %vm105_vm0, %v13048_v27  ;;  %11301 = vmatpush3.bf16.msra.mxu0 %v13166_v8  ;;  %v991_v27 = vld [vmem:[#allocation12 + $0x28] sm:$0xff] }
  0x6b   :  { %11289 = vmatpush3.bf16.msra.mxu1 %v13164_v7  ;;  %9426 = vmatprep.mubr.msk.f32.mxu1 %vm12836_vm2, %v14662_v54  ;;  %v13216_v28 = vpack.c.bf16 %v991_v27, %v990_v26  ;;  %v979_v26 = vld [vmem:[#allocation10 + $0x8] sm:$0xff] }
  0x6c   :  { %11302 = vmatprep.subr.bf16.mxu1 %v14668_v37  ;;  %11314 = vmatprep.subr.bf16.mxu0 %v14668_v37  ;;  %v13289_v27 = vpack.c.bf16 %v979_v26, %v978_v24  ;;  %v8211_v24 = vld [vmem:[%s14653_s5 + $0x2] ss:$0 sm:$0xff] }
  0x6d   :  { %9446 = vmatmul.mubr.msk.f32.vlgmr.msra.gmra.mrb[14].mxu0 %vm235_vm1, %v13125_v51  ;;  %14705 = vst [vmem:[#allocation26_spill] sm:$0xff] %v13216_v28 }
  0x6e   :  { %9427 = vmatmul.mubr.msk.f32.vlgmr.msra.gmra.mrb[20].mxu1 %vm235_vm1, %v13125_v51  ;;  %9483 = vmatprep.mubr.msk.f32.mxu0 %vm12836_vm2, %v14662_v54  ;;  %14707 = vst [vmem:[#allocation28_spill] sm:$0xff] %v13289_v27 }
  0x6f   :  { %11304 = vmatpush3.bf16.msra.mxu1 %v13176_v10  ;;  %9464 = vmatprep.mubr.msk.f32.mxu1 %vm12836_vm2, %v14662_v54 }
  0x70   :  { %11305 = vmatprep.subr.bf16.mxu1 %v14668_v37  ;;  %11316 = vmatpush3.bf16.msra.mxu0 %v13208_v22 }
  0x71   :  { %11317 = vmatprep.subr.bf16.mxu0 %v14668_v37 }
  0x73   :  { %11307 = vmatpush3.bf16.msra.mxu1 %v13187_v13 }
  0x74   :  { %11308 = vmatprep.subr.bf16.mxu1 %v14668_v37  ;;  %11319 = vmatpush3.bf16.msra.mxu0 %v13212_v25 }
  0x75   :  { %11320 = vmatprep.subr.bf16.mxu0 %v14668_v37 }
  0x77   :  { %11310 = vmatpush3.bf16.msra.mxu1 %v13195_v16 }
  0x78   :  { %11311 = vmatprep.subr.bf16.mxu1 %v14668_v37  ;;  %11322 = vmatpush3.bf16.msra.mxu0 %v13216_v28 }
  0x79   :  { %11323 = vmatprep.subr.bf16.mxu0 %v14668_v37 }
  0x7b   :  { %11313 = vmatpush3.bf16.msra.mxu1 %v13199_v19 }
  0x7c   :  { %11326 = vmatprep.subr.bf16.mxu1 %v14668_v37  ;;  %11325 = vmatpush3.bf16.msra.mxu0 %v13220_v31 }
  0x7d   :  { %11338 = vmatprep.subr.bf16.mxu0 %v14668_v37 }
  0x7e   :  { %9465 = vmatmul.mubr.msk.f32.vlgmr.msra.gmra.mrb[22].mxu1 %vm235_vm1, %v13125_v51  ;;  %v1325_v51 = vld [vmem:[#allocation12 + $0x80] sm:$0xff] }
  0x7f   :  { %9502 = vmatprep.mubr.msk.f32.mxu1 %vm12836_vm2, %v14662_v54  ;;  %9484 = vmatmul.mubr.msk.f32.vlgmr.msra.gmra.mrb[16].mxu0 %vm235_vm1, %v13229_v36  ;;  %v13249_v55 = vpack.c.bf16 %v1326_v53, %v1325_v51 }
  0x80   :  { %11340 = vmatpush3.bf16.msra.mxu0 %v13224_v35  ;;  %9521 = vmatprep.mubr.msk.f32.mxu0 %vm12836_vm2, %v14662_v54 }
  0x81   :  { %11341 = vmatprep.subr.bf16.mxu0 %v14668_v37  ;;  %11328 = vmatpush3.bf16.msra.mxu1 %v13289_v27 }
  0x82   :  { %11329 = vmatprep.subr.bf16.mxu1 %v14668_v37 }
  0x84   :  { %11343 = vmatpush3.bf16.msra.mxu0 %v13237_v41 }
  0x85   :  { %11344 = vmatprep.subr.bf16.mxu0 %v14668_v37  ;;  %11331 = vmatpush3.bf16.msra.mxu1 %v13297_v32 }
  0x86   :  { %11332 = vmatprep.subr.bf16.mxu1 %v14668_v37 }
  0x88   :  { %11346 = vmatpush3.bf16.msra.mxu0 %v13241_v46 }
  0x89   :  { %11347 = vmatprep.subr.bf16.mxu0 %v14668_v37 }
  0x8c   :  { %11349 = vmatpush3.bf16.msra.mxu0 %v13245_v49 }
  0x8d   :  { %11362 = vmatprep.subr.bf16.mxu0 %v14668_v37 }
  0x8f   :  { %9522 = vmatmul.mubr.msk.f32.vlgmr.msra.gmra.mrb[18].mxu0 %vm235_vm1, %v13229_v36 }
  0x90   :  { %11364 = vmatpush3.bf16.msra.mxu0 %v13249_v55  ;;  %9559 = vmatprep.mubr.msk.f32.mxu0 %vm12836_vm2, %v14662_v54 }
  0x91   :  { %11365 = vmatprep.subr.bf16.mxu0 %v14668_v37 }
  0x94   :  { %11367 = vmatpush3.bf16.msra.mxu0 %v13257_v60 }
  0x95   :  { %11368 = vmatprep.subr.bf16.mxu0 %v14668_v37 }
  0x98   :  { %11370 = vmatpush3.bf16.msra.mxu0 %v13261_v63 }
  0x99   :  { %11371 = vmatprep.subr.bf16.mxu0 %v14668_v37 }
  0x9c   :  { %11373 = vmatpush3.bf16.msra.mxu0 %v13265_v4 }
  0x9d   :  { %11386 = vmatprep.subr.bf16.mxu0 %v14668_v37 }
  0x9f   :  { %9560 = vmatmul.mubr.msk.f32.vlgmr.msra.gmra.mrb[20].mxu0 %vm235_vm1, %v13229_v36 }
  0xa0   :  { %11388 = vmatpush3.bf16.msra.mxu0 %v13269_v9  ;;  %9597 = vmatprep.mubr.msk.f32.mxu0 %vm12836_vm2, %v14662_v54 }
  0xa1   :  { %11389 = vmatprep.subr.bf16.mxu0 %v14668_v37 }
  0xa4   :  { %11391 = vmatpush3.bf16.msra.mxu0 %v13277_v14 }
  0xa5   :  { %11392 = vmatprep.subr.bf16.mxu0 %v14668_v37 }
  0xa8   :  { %11394 = vmatpush3.bf16.msra.mxu0 %v13281_v18 }
  0xa9   :  { %11395 = vmatprep.subr.bf16.mxu0 %v14668_v37 }
  0xac   :  { %11397 = vmatpush3.bf16.msra.mxu0 %v13285_v23 }
  0xad   :  { %11410 = vmatprep.subr.bf16.mxu0 %v14668_v37 }
  0xaf   :  { %9598 = vmatmul.mubr.msk.f32.vlgmr.msra.gmra.mrb[22].mxu0 %vm235_vm1, %v13229_v36  ;;  %v983_v36 = vld [vmem:[#allocation10 + $0x28] sm:$0xff] }
  0xb0   :  { %11412 = vmatpush3.bf16.msra.mxu0 %v13069_v34  ;;  %9635 = vmatprep.mubr.msk.f32.mxu0 %vm12836_vm2, %v14662_v54  ;;  %v13305_v38 = vpack.c.bf16 %v983_v36, %v982_v33 }
  0xb1   :  { %11413 = vmatprep.subr.bf16.mxu0 %v14668_v37 }
  0xb2   :  { %14709 = vst [vmem:[#allocation30_spill] sm:$0xff] %v13305_v38  ;;  %11334 = vmatpush3.bf16.msra.mxu1 %v13305_v38 }
  0xb3   :  { %11335 = vmatprep.subr.bf16.mxu1 %v14668_v37 }
  0xb4   :  { %11415 = vmatpush3.bf16.msra.mxu0 %v13081_v39 }
  0xb5   :  { %11416 = vmatprep.subr.bf16.mxu0 %v14668_v37 }
  0xb6   :  { %11337 = vmatpush3.bf16.msra.mxu1 %v13311_v44 }
  0xb7   :  { %11350 = vmatprep.subr.bf16.mxu1 %v14668_v37 }
  0xb8   :  { %11418 = vmatpush3.bf16.msra.mxu0 %v13095_v42 }
  0xb9   :  { %11419 = vmatprep.subr.bf16.mxu0 %v14668_v37 }
  0xbc   :  { %11421 = vmatpush3.bf16.msra.mxu0 %v13107_v45 }
  0xbd   :  { %11434 = vmatprep.subr.bf16.mxu0 %v14668_v37 }
 0x118   :  { %v9321_v51 = vpop.f32.mrb[0].mxu0 }
 0x119   :  { %v9327_v48 = vpop.f32.mrb[0].mxu1  ;;  %v202_v57 = vadd.f32 %v9321_v51, %v8183_v47  ;;  %v196_v61 = vpop.f32.mrb[1].mxu0 }
 0x11a   :  { %v222_v53 = vadd.f32 %v9327_v48, %v8183_v47  ;;  %v216_v56 = vpop.f32.mrb[1].mxu1  ;;  %v197_v2 = vadd.f32 %v8183_v47, %v196_v61 }
 0x11b   :  { %v217_v62 = vadd.f32 %v8183_v47, %v216_v56  ;;  %237 = vst.msk [vmem:[#allocation2 + $0x8] sm:$0xff] %vm235_vm1, %v202_v57 }
 0x11c   :  { %241 = vst.msk [vmem:[#allocation2 + $0x28] sm:$0xff] %vm235_vm1, %v222_v53  ;;  %236 = vst.msk [vmem:[#allocation2] sm:$0xff] %vm235_vm1, %v197_v2  ;;  %v9324_v5 = vpop.f32.mrb[2].mxu0 }
 0x11d   :  { %240 = vst.msk [vmem:[#allocation2 + $0x20] sm:$0xff] %vm235_vm1, %v217_v62  ;;  %v9330_v3 = vpop.f32.mrb[2].mxu1  ;;  %v212_v12 = vadd.f32 %v9324_v5, %v8183_v47  ;;  %v206_v15 = vpop.f32.mrb[3].mxu0 }
 0x11e   :  { %v232_v6 = vadd.f32 %v9330_v3, %v8183_v47  ;;  %v226_v11 = vpop.f32.mrb[3].mxu1  ;;  %v207_v21 = vadd.f32 %v8183_v47, %v206_v15 }
 0x11f   :  { %v227_v17 = vadd.f32 %v8183_v47, %v226_v11  ;;  %239 = vst.msk [vmem:[#allocation2 + $0x18] sm:$0xff] %vm235_vm1, %v212_v12 }
 0x120   :  { %243 = vst.msk [vmem:[#allocation2 + $0x38] sm:$0xff] %vm235_vm1, %v232_v6  ;;  %238 = vst.msk [vmem:[#allocation2 + $0x10] sm:$0xff] %vm235_vm1, %v207_v21  ;;  %v9361_v29 = vpop.f32.mrb[4].mxu0 }
 0x121   :  { %242 = vst.msk [vmem:[#allocation2 + $0x30] sm:$0xff] %vm235_vm1, %v227_v17  ;;  %v9341_v26 = vpop.f32.mrb[4].mxu1  ;;  %v455_v36 = vadd.f32 %v9361_v29, %v8211_v24  ;;  %v449_v40 = vpop.f32.mrb[5].mxu0 }
 0x122   :  { %v329_v30 = vadd.f32 %v9341_v26, %v8197_v20  ;;  %v323_v33 = vpop.f32.mrb[5].mxu1  ;;  %v450_v47 = vadd.f32 %v8211_v24, %v449_v40 }
 0x123   :  { %v324_v43 = vadd.f32 %v8197_v20, %v323_v33  ;;  %489 = vst.msk [vmem:[#allocation4 + $0x8] sm:$0xff] %vm235_vm1, %v455_v36 }
 0x124   :  { %363 = vst.msk [vmem:[#allocation3 + $0x8] sm:$0xff] %vm235_vm1, %v329_v30  ;;  %488 = vst.msk [vmem:[#allocation4] sm:$0xff] %vm235_vm1, %v450_v47  ;;  %v9364_v51 = vpop.f32.mrb[6].mxu0 }
 0x125   :  { %362 = vst.msk [vmem:[#allocation3] sm:$0xff] %vm235_vm1, %v324_v43  ;;  %v9344_v48 = vpop.f32.mrb[6].mxu1  ;;  %v465_v57 = vadd.f32 %v9364_v51, %v8211_v24  ;;  %v459_v61 = vpop.f32.mrb[7].mxu0  ;;  %v628_v51 = vld [vmem:[#allocation2] sm:$0xff] }
 0x126   :  { %v339_v53 = vadd.f32 %v9344_v48, %v8197_v20  ;;  %v333_v56 = vpop.f32.mrb[7].mxu1  ;;  %v460_v2 = vadd.f32 %v8211_v24, %v459_v61  ;;  %v8225_v48 = vld [vmem:[%s14653_s5 + $0x3] ss:$0 sm:$0xff] }
 0x127   :  { %v334_v62 = vadd.f32 %v8197_v20, %v333_v56  ;;  %491 = vst.msk [vmem:[#allocation4 + $0x18] sm:$0xff] %vm235_vm1, %v465_v57 }
 0x128   :  { %365 = vst.msk [vmem:[#allocation3 + $0x18] sm:$0xff] %vm235_vm1, %v339_v53  ;;  %490 = vst.msk [vmem:[#allocation4 + $0x10] sm:$0xff] %vm235_vm1, %v460_v2  ;;  %v9367_v5 = vpop.f32.mrb[8].mxu0 }
 0x129   :  { %364 = vst.msk [vmem:[#allocation3 + $0x10] sm:$0xff] %vm235_vm1, %v334_v62  ;;  %v9347_v3 = vpop.f32.mrb[8].mxu1  ;;  %v475_v12 = vadd.f32 %v9367_v5, %v8211_v24  ;;  %v469_v15 = vpop.f32.mrb[9].mxu0 }
 0x12a   :  { %v349_v6 = vadd.f32 %v9347_v3, %v8197_v20  ;;  %v343_v11 = vpop.f32.mrb[9].mxu1  ;;  %v470_v21 = vadd.f32 %v8211_v24, %v469_v15 }
 0x12b   :  { %v344_v17 = vadd.f32 %v8197_v20, %v343_v11  ;;  %493 = vst.msk [vmem:[#allocation4 + $0x28] sm:$0xff] %vm235_vm1, %v475_v12 }
 0x12c   :  { %367 = vst.msk [vmem:[#allocation3 + $0x28] sm:$0xff] %vm235_vm1, %v349_v6  ;;  %492 = vst.msk [vmem:[#allocation4 + $0x20] sm:$0xff] %vm235_vm1, %v470_v21  ;;  %v9370_v29 = vpop.f32.mrb[10].mxu0 }
 0x12d   :  { %366 = vst.msk [vmem:[#allocation3 + $0x20] sm:$0xff] %vm235_vm1, %v344_v17  ;;  %v9350_v26 = vpop.f32.mrb[10].mxu1  ;;  %v485_v36 = vadd.f32 %v9370_v29, %v8211_v24  ;;  %v479_v40 = vpop.f32.mrb[11].mxu0 }
 0x12e   :  { %v359_v30 = vadd.f32 %v9350_v26, %v8197_v20  ;;  %v353_v33 = vpop.f32.mrb[11].mxu1  ;;  %v480_v47 = vadd.f32 %v8211_v24, %v479_v40 }
 0x12f   :  { %v354_v43 = vadd.f32 %v8197_v20, %v353_v33  ;;  %495 = vst.msk [vmem:[#allocation4 + $0x38] sm:$0xff] %vm235_vm1, %v485_v36 }
 0x130   :  { %369 = vst.msk [vmem:[#allocation3 + $0x38] sm:$0xff] %vm235_vm1, %v359_v30  ;;  %494 = vst.msk [vmem:[#allocation4 + $0x30] sm:$0xff] %vm235_vm1, %v480_v47  ;;  %v706_v56 = vpop.f32.mrb[12].mxu0 }
 0x131   :  { %368 = vst.msk [vmem:[#allocation3 + $0x30] sm:$0xff] %vm235_vm1, %v354_v43  ;;  %v9381_v53 = vpop.f32.mrb[12].mxu1  ;;  %v710_v62 = vadd.f32 %v706_v56, %v628_v51  ;;  %v9409_v20 = vpop.f32.mrb[13].mxu0  ;;  %v711_v43 = vld [vmem:[#allocation3] sm:$0xff] }
 0x132   :  { %v581_v57 = vadd.f32 %v9381_v53, %v8225_v48  ;;  %v575_v61 = vpop.f32.mrb[13].mxu1  ;;  %v792_v51 = vld [vmem:[#allocation4] sm:$0xff] }
 0x133   :  { %v576_v24 = vadd.f32 %v8225_v48, %v575_v61  ;;  %v8240_v2 = vmul.f32 -1.442695, %v710_v62 }
 0x134   :  { %615 = vst.msk [vmem:[#allocation5 + $0x8] sm:$0xff] %vm235_vm1, %v581_v57 }
 0x135   :  { %614 = vst.msk [vmem:[#allocation5] sm:$0xff] %vm235_vm1, %v576_v24  ;;  %v9384_v3 = vpop.f32.mrb[14].mxu1  ;;  %12444 = vpow2.f32 %v8240_v2 }
 0x136   :  { %v591_v5 = vadd.f32 %v9384_v3, %v8225_v48  ;;  %v585_v6 = vpop.f32.mrb[15].mxu1 }
 0x137   :  { %v586_v11 = vadd.f32 %v8225_v48, %v585_v6 }
 0x138   :  { %617 = vst.msk [vmem:[#allocation5 + $0x18] sm:$0xff] %vm235_vm1, %v591_v5 }
 0x139   :  { %616 = vst.msk [vmem:[#allocation5 + $0x10] sm:$0xff] %vm235_vm1, %v586_v11  ;;  %v9387_v12 = vpop.f32.mrb[16].mxu1 }
 0x13a   :  { %v601_v15 = vadd.f32 %v9387_v12, %v8225_v48  ;;  %v595_v17 = vpop.f32.mrb[17].mxu1 }
 0x13b   :  { %v596_v21 = vadd.f32 %v8225_v48, %v595_v17 }
 0x13c   :  { %619 = vst.msk [vmem:[#allocation5 + $0x28] sm:$0xff] %vm235_vm1, %v601_v15  ;;  %v873_v6 = vld [vmem:[#allocation5] sm:$0xff] }
 0x13d   :  { %618 = vst.msk [vmem:[#allocation5 + $0x20] sm:$0xff] %vm235_vm1, %v596_v21  ;;  %v9390_v26 = vpop.f32.mrb[18].mxu1  ;;  %v625_v21 = vld [vmem:[%s14650_s2] sm:$0xff] }
 0x13e   :  { %v611_v29 = vadd.f32 %v9390_v26, %v8225_v48  ;;  %v605_v30 = vpop.f32.mrb[19].mxu1 }
 0x13f   :  { %v606_v33 = vadd.f32 %v8225_v48, %v605_v30  ;;  %v12445_v36 = vpop.eup %12444 }
 0x140   :  { %621 = vst.msk [vmem:[#allocation5 + $0x38] sm:$0xff] %vm235_vm1, %v611_v29  ;;  %v957_v40 = vadd.f32 1.0, %v12445_v36  ;;  %v868_v53 = vpop.f32.mrb[14].mxu0 }
 0x141   :  { %620 = vst.msk [vmem:[#allocation5 + $0x30] sm:$0xff] %vm235_vm1, %v606_v33  ;;  %v787_v47 = vpop.f32.mrb[20].mxu1  ;;  %v872_v57 = vadd.f32 %v868_v53, %v792_v51  ;;  %v9447_v62 = vpop.f32.mrb[15].mxu0 }
 0x142   :  { %v791_v56 = vadd.f32 %v787_v47, %v711_v43  ;;  %v9428_v61 = vpop.f32.mrb[21].mxu1  ;;  %12446 = vrcp.f32 %v957_v40  ;;  %v1149_v40 = vld [vmem:[#allocation10 + $0x40] sm:$0xff]  ;;  %v1150_v43 = vld [vmem:[#allocation10 + $0x48] sm:$0xff] }
 0x143   :  { %12448 = vtanh.f32 %v872_v57  ;;  %v13367_v53 = vpack.c.bf16 %v1150_v43, %v1149_v40  ;;  %v1151_v57 = vld [vmem:[#allocation10 + $0x50] sm:$0xff]  ;;  %v1152_v61 = vld [vmem:[#allocation10 + $0x58] sm:$0xff] }
 0x144   :  { %v8241_v20 = vmul.f32 -1.442695, %v791_v56  ;;  %v13377_v62 = vpack.c.bf16 %v1152_v61, %v1151_v57  ;;  %v1322_v43 = vld [vmem:[#allocation10 + $0xb0] sm:$0xff]  ;;  %v1483_v57 = vld [vmem:[#allocation10 + $0xc0] sm:$0xff]  ;;  %v1484_v61 = vld [vmem:[#allocation10 + $0xc8] sm:$0xff] }
 0x146   :  { %12450 = vpow2.f32 %v8241_v20  ;;  %v1153_v20 = vld [vmem:[#allocation10 + $0x60] sm:$0xff] }
 0x14c   :  { %v12447_v24 = vpop.eup %12446 }
 0x14d   :  { %v12449_v48 = vpop.eup %12448 }
 0x14e   :  { %v974_v2 = vmul.f32 %v12449_v48, %v12447_v24  ;;  %v1154_v24 = vld [vmem:[#allocation10 + $0x68] sm:$0xff] }
 0x14f   :  { %v13387_v48 = vpack.c.bf16 %v1154_v24, %v1153_v20  ;;  %v13432_v20 = vpack.c.bf16 %v1484_v61, %v1483_v57  ;;  %v1485_v24 = vld [vmem:[#allocation10 + $0xd0] sm:$0xff] }
 0x150   :  { %v12451_v3 = vpop.eup %12450 }
 0x151   :  { %v963_v5 = vadd.f32 1.0, %v12451_v3  ;;  %v949_v11 = vpop.f32.mrb[22].mxu1  ;;  %v1156_v3 = vld [vmem:[#allocation10 + $0x78] sm:$0xff] }
 0x152   :  { %v953_v12 = vadd.f32 %v949_v11, %v873_v6  ;;  %v9466_v15 = vpop.f32.mrb[23].mxu1  ;;  %v1316_v6 = vld [vmem:[#allocation10 + $0x80] sm:$0xff]  ;;  %v1317_v11 = vld [vmem:[#allocation10 + $0x88] sm:$0xff] }
 0x153   :  { %12452 = vrcp.f32 %v963_v5  ;;  %v1318_v15 = vld [vmem:[#allocation10 + $0x90] sm:$0xff] }
 0x154   :  { %v8242_v17 = vmul.f32 -1.442695, %v953_v12  ;;  %v13399_v12 = vpack.c.bf16 %v1317_v11, %v1316_v6  ;;  %v1487_v6 = vld [vmem:[#allocation10 + $0xe0] sm:$0xff]  ;;  %v1488_v11 = vld [vmem:[#allocation10 + $0xe8] sm:$0xff] }
 0x156   :  { %12454 = vpow2.f32 %v8242_v17  ;;  %v1319_v17 = vld [vmem:[#allocation10 + $0x98] sm:$0xff] }
 0x15d   :  { %v12453_v26 = vpop.eup %12452 }
 0x15e   :  { %v973_v29 = vmul.f32 %v12453_v26, %v625_v21  ;;  %v13408_v21 = vpack.c.bf16 %v1319_v17, %v1318_v15  ;;  %v1320_v26 = vld [vmem:[#allocation10 + $0xa0] sm:$0xff] }
 0x160   :  { %v12455_v30 = vpop.eup %12454  ;;  %v13364_v33 = vadd.f32 %v974_v2, %v973_v29  ;;  %v1155_v2 = vld [vmem:[#allocation10 + $0x70] sm:$0xff]  ;;  %v1321_v29 = vld [vmem:[#allocation10 + $0xa8] sm:$0xff] }
 0x161   :  { %v970_v36 = vadd.f32 1.0, %v12455_v30  ;;  %v13393_v5 = vpack.c.bf16 %v1156_v3, %v1155_v2  ;;  %v13414_v30 = vpop.f32.mrb[16].mxu0  ;;  %v13420_v40 = vpack.c.bf16 %v1321_v29, %v1320_v26  ;;  %v1486_v2 = vld [vmem:[#allocation10 + $0xd8] sm:$0xff]  ;;  %v13448_v26 = vpack.c.bf16 %v1488_v11, %v1487_v6  ;;  %v1489_v29 = vld [vmem:[#allocation10 + $0xf0] sm:$0xff] }
 0x162   :  { %12456 = vtanh.f32 %v13364_v33  ;;  %v13440_v3 = vpack.c.bf16 %v1486_v2, %v1485_v24  ;;  %v1674_v2 = vld [vmem:[#allocation2 + $0x8] sm:$0xff] }
 0x163   :  { %12458 = vrcp.f32 %v970_v36  ;;  %v9485_v36 = vpop.f32.mrb[17].mxu0 }
 0x164   :  { %v13445_v15 = vpop.f32.mrb[18].mxu0  ;;  %v1490_v36 = vld [vmem:[#allocation10 + $0xf8] sm:$0xff] }
 0x165   :  { %v9523_v17 = vpop.f32.mrb[19].mxu0 }
 0x16c   :  { %v12457_v47 = vpop.eup %12456 }
 0x16d   :  { %v12459_v51 = vpop.eup %12458 }
 0x16e   :  { %v13369_v56 = vmul.f32 %v12459_v51, %v12457_v47  ;;  %v1323_v47 = vld [vmem:[#allocation10 + $0xb8] sm:$0xff] }
 0x16f   :  { %v13426_v51 = vpack.c.bf16 %v1323_v47, %v1322_v43  ;;  %v13452_v43 = vpack.c.bf16 %v1490_v36, %v1489_v29 }
 0x170   :  { %9503 = vmatmul.mubr.msk.f32.vlgmr.msra.gmra.mrb[24].mxu1 %vm235_vm1, %v13369_v56  ;;  %9636 = vmatmul.mubr.msk.f32.vlgmr.msra.gmra.mrb[24].mxu0 %vm235_vm1, %v13369_v56 }
 0x171   :  { %11352 = vmatpush3.bf16.msra.mxu1 %v13367_v53  ;;  %11436 = vmatpush3.bf16.msra.mxu0 %v13127_v52 }
 0x172   :  { %11353 = vmatprep.subr.bf16.mxu1 %v14668_v37  ;;  %11437 = vmatprep.subr.bf16.mxu0 %v14668_v37  ;;  %v13463_v47 = vpop.f32.mrb[20].mxu0 }
 0x173   :  { %9540 = vmatprep.mubr.msk.f32.mxu1 %vm12836_vm2, %v14662_v54  ;;  %9673 = vmatprep.mubr.msk.f32.mxu0 %vm12836_vm2, %v14662_v54  ;;  %v9561_v57 = vpop.f32.mrb[21].mxu0 }
 0x175   :  { %11355 = vmatpush3.bf16.msra.mxu1 %v13377_v62  ;;  %11439 = vmatpush3.bf16.msra.mxu0 %v13140_v59 }
 0x176   :  { %11356 = vmatprep.subr.bf16.mxu1 %v14668_v37  ;;  %11440 = vmatprep.subr.bf16.mxu0 %v14668_v37 }
 0x179   :  { %11358 = vmatpush3.bf16.msra.mxu1 %v13387_v48  ;;  %11442 = vmatpush3.bf16.msra.mxu0 %v13154_v1 }
 0x17a   :  { %11359 = vmatprep.subr.bf16.mxu1 %v14668_v37  ;;  %11443 = vmatprep.subr.bf16.mxu0 %v14668_v37 }
 0x17d   :  { %11361 = vmatpush3.bf16.msra.mxu1 %v13393_v5  ;;  %11445 = vmatpush3.bf16.msra.mxu0 %v13166_v8 }
 0x17e   :  { %11374 = vmatprep.subr.bf16.mxu1 %v14668_v37  ;;  %11458 = vmatprep.subr.bf16.mxu0 %v14668_v37 }
 0x180   :  { %9541 = vmatmul.mubr.msk.f32.vlgmr.msra.gmra.mrb[26].mxu1 %vm235_vm1, %v13369_v56  ;;  %9674 = vmatmul.mubr.msk.f32.vlgmr.msra.gmra.mrb[26].mxu0 %vm235_vm1, %v13369_v56 }
 0x181   :  { %11376 = vmatpush3.bf16.msra.mxu1 %v13399_v12  ;;  %9578 = vmatprep.mubr.msk.f32.mxu1 %vm12836_vm2, %v14662_v54 }
 0x182   :  { %11377 = vmatprep.subr.bf16.mxu1 %v14668_v37  ;;  %11460 = vmatpush3.bf16.msra.mxu0 %v13208_v22  ;;  %v13477_v61 = vpop.f32.mrb[22].mxu0 }
 0x183   :  { %11461 = vmatprep.subr.bf16.mxu0 %v14668_v37  ;;  %9711 = vmatprep.mubr.msk.f32.mxu0 %vm12836_vm2, %v14662_v54  ;;  %v9599_v24 = vpop.f32.mrb[23].mxu0 }
 0x184   :  { %v13501_v24 = vld [vmem:[%s14656_s8] ss:$0 sm:$0xff] }
 0x185   :  { %11379 = vmatpush3.bf16.msra.mxu1 %v13408_v21  ;;  %14711 = vst [vmem:[#allocation32_spill] sm:$0xff] %v13501_v24 }
 0x186   :  { %11380 = vmatprep.subr.bf16.mxu1 %v14668_v37  ;;  %11463 = vmatpush3.bf16.msra.mxu0 %v13212_v25 }
 0x187   :  { %11464 = vmatprep.subr.bf16.mxu0 %v14668_v37 }
 0x189   :  { %11382 = vmatpush3.bf16.msra.mxu1 %v13420_v40 }
 0x18a   :  { %11383 = vmatprep.subr.bf16.mxu1 %v14668_v37  ;;  %11466 = vmatpush3.bf16.msra.mxu0 %v13216_v28 }
 0x18b   :  { %11467 = vmatprep.subr.bf16.mxu0 %v14668_v37 }
 0x18d   :  { %11385 = vmatpush3.bf16.msra.mxu1 %v13426_v51 }
 0x18e   :  { %11398 = vmatprep.subr.bf16.mxu1 %v14668_v37  ;;  %11469 = vmatpush3.bf16.msra.mxu0 %v13220_v31 }
 0x18f   :  { %11482 = vmatprep.subr.bf16.mxu0 %v14668_v37 }
 0x190   :  { %9579 = vmatmul.mubr.msk.f32.vlgmr.msra.gmra.mrb[28].mxu1 %vm235_vm1, %v13369_v56 }
 0x191   :  { %11400 = vmatpush3.bf16.msra.mxu1 %v13432_v20  ;;  %9616 = vmatprep.mubr.msk.f32.mxu1 %vm12836_vm2, %v14662_v54 }
 0x192   :  { %11401 = vmatprep.subr.bf16.mxu1 %v14668_v37 }
 0x195   :  { %11403 = vmatpush3.bf16.msra.mxu1 %v13440_v3 }
 0x196   :  { %11404 = vmatprep.subr.bf16.mxu1 %v14668_v37 }
 0x199   :  { %11406 = vmatpush3.bf16.msra.mxu1 %v13448_v26 }
 0x19a   :  { %11407 = vmatprep.subr.bf16.mxu1 %v14668_v37 }
 0x19d   :  { %11409 = vmatpush3.bf16.msra.mxu1 %v13452_v43 }
 0x19e   :  { %11422 = vmatprep.subr.bf16.mxu1 %v14668_v37 }
 0x1a0   :  { %9617 = vmatmul.mubr.msk.f32.vlgmr.msra.gmra.mrb[30].mxu1 %vm235_vm1, %v13369_v56 }
 0x1a1   :  { %11424 = vmatpush3.bf16.msra.mxu1 %v13120_v50  ;;  %9654 = vmatprep.mubr.msk.f32.mxu1 %vm12836_vm2, %v14662_v54 }
 0x1a2   :  { %11425 = vmatprep.subr.bf16.mxu1 %v14668_v37 }
 0x1a5   :  { %11427 = vmatpush3.bf16.msra.mxu1 %v13138_v58 }
 0x1a6   :  { %11428 = vmatprep.subr.bf16.mxu1 %v14668_v37 }
 0x1a9   :  { %11430 = vmatpush3.bf16.msra.mxu1 %v13152_v0 }
 0x1aa   :  { %11431 = vmatprep.subr.bf16.mxu1 %v14668_v37 }
 0x1ad   :  { %11433 = vmatpush3.bf16.msra.mxu1 %v13164_v7 }
 0x1ae   :  { %11446 = vmatprep.subr.bf16.mxu1 %v14668_v37 }
 0x1b0   :  { %9655 = vmatmul.mubr.msk.f32.vlgmr.msra.gmra.mrb[32].mxu1 %vm235_vm1, %v13369_v56 }
 0x1b1   :  { %11448 = vmatpush3.bf16.msra.mxu1 %v13176_v10  ;;  %9692 = vmatprep.mubr.msk.f32.mxu1 %vm12836_vm2, %v14662_v54 }
 0x1b2   :  { %11449 = vmatprep.subr.bf16.mxu1 %v14668_v37 }
 0x1b5   :  { %11451 = vmatpush3.bf16.msra.mxu1 %v13187_v13 }
 0x1b6   :  { %11452 = vmatprep.subr.bf16.mxu1 %v14668_v37 }
 0x1b9   :  { %11454 = vmatpush3.bf16.msra.mxu1 %v13195_v16 }
 0x1ba   :  { %11455 = vmatprep.subr.bf16.mxu1 %v14668_v37 }
 0x1bd   :  { %11457 = vmatpush3.bf16.msra.mxu1 %v13199_v19 }
 0x1be   :  { %11470 = vmatprep.subr.bf16.mxu1 %v14668_v37 }
 0x1c0   :  { %9693 = vmatmul.mubr.msk.f32.vlgmr.msra.gmra.mrb[34].mxu1 %vm235_vm1, %v13369_v56 }
 0x1c1   :  { %11472 = vmatpush3.bf16.msra.mxu1 %v13289_v27  ;;  %9730 = vmatprep.mubr.msk.f32.mxu1 %vm12836_vm2, %v14662_v54 }
 0x1c2   :  { %11473 = vmatprep.subr.bf16.mxu1 %v14668_v37 }
 0x1c5   :  { %11475 = vmatpush3.bf16.msra.mxu1 %v13297_v32 }
 0x1c6   :  { %11476 = vmatprep.subr.bf16.mxu1 %v14668_v37 }
 0x1c9   :  { %11478 = vmatpush3.bf16.msra.mxu1 %v13305_v38 }
 0x1ca   :  { %11479 = vmatprep.subr.bf16.mxu1 %v14668_v37 }
 0x1cd   :  { %11481 = vmatpush3.bf16.msra.mxu1 %v13311_v44 }
 0x1ce   :  { %11494 = vmatprep.subr.bf16.mxu1 %v14668_v37 }
 0x243   :  { %v1136_v56 = vpop.f32.mrb[24].mxu1  ;;  %v1741_v6 = vpop.f32.mrb[24].mxu0 }
 0x244   :  { %v1137_v11 = vadd.f32 %v1136_v56, %v13414_v30  ;;  %v1745_v17 = vadd.f32 %v1741_v6, %v1674_v2  ;;  %v9504_v29 = vpop.f32.mrb[25].mxu1  ;;  %v9637_v36 = vpop.f32.mrb[25].mxu0  ;;  %v13507_v30 = vld [vmem:[%s14656_s8 + $0x1] ss:$0 sm:$0xff]  ;;  %v1820_v56 = vld [vmem:[#allocation4 + $0x8] sm:$0xff] }
 0x246   :  { %v8265_v57 = vmul.f32 -1.442695, %v1745_v17  ;;  %v1147_v54 = vadd.f32 %v13501_v24, %v1137_v11 }
 0x248   :  { %12460 = vpow2.f32 %v8265_v57  ;;  %v8258_v44 = vmul.f32 -1.442695, %v1147_v54 }
 0x24a   :  { %12462 = vpow2.f32 %v8258_v44  ;;  %v13514_v44 = vld [vmem:[%s14656_s8 + $0x2] ss:$0 sm:$0xff] }
 0x252   :  { %v12461_v38 = vpop.eup %12460 }
 0x253   :  { %v1968_v37 = vadd.f32 1.0, %v12461_v38  ;;  %v1302_v32 = vpop.f32.mrb[26].mxu1  ;;  %v1887_v2 = vpop.f32.mrb[26].mxu0 }
 0x254   :  { %v1303_v6 = vadd.f32 %v1302_v32, %v13445_v15  ;;  %v1891_v17 = vadd.f32 %v1887_v2, %v1820_v56  ;;  %v9542_v29 = vpop.f32.mrb[27].mxu1  ;;  %v9675_v36 = vpop.f32.mrb[27].mxu0 }
 0x255   :  { %12464 = vrcp.f32 %v1968_v37  ;;  %v12463_v38 = vpop.eup %12462 }
 0x256   :  { %v1314_v11 = vadd.f32 %v13507_v30, %v1303_v6  ;;  %12466 = vtanh.f32 %v1891_v17  ;;  %v1652_v19 = vadd.f32 1.0, %v12463_v38 }
 0x258   :  { %v8259_v54 = vmul.f32 -1.442695, %v1314_v11 }
 0x25a   :  { %12468 = vpow2.f32 %v8259_v54 }
 0x25b   :  { %12470 = vrcp.f32 %v1652_v19 }
 0x25f   :  { %v12465_v57 = vpop.eup %12464 }
 0x260   :  { %v12467_v24 = vpop.eup %12466 }
 0x261   :  { %v1985_v27 = vmul.f32 %v12467_v24, %v12465_v57  ;;  %v8235_v24 = vld [vmem:[%s14650_s2 + $0x8] sm:$0xff] }
 0x263   :  { %v1469_v16 = vpop.f32.mrb[28].mxu1 }
 0x264   :  { %v12469_v32 = vpop.eup %12468  ;;  %v1470_v15 = vadd.f32 %v1469_v16, %v13463_v47  ;;  %v9580_v37 = vpop.f32.mrb[29].mxu1  ;;  %v13524_v16 = vld [vmem:[%s14656_s8 + $0x3] ss:$0 sm:$0xff] }
 0x265   :  { %v1658_v56 = vadd.f32 1.0, %v12469_v32  ;;  %v12471_v6 = vpop.eup %12470 }
 0x266   :  { %v1481_v2 = vadd.f32 %v13514_v44, %v1470_v15  ;;  %v1747_v15 = vld [vmem:[#allocation3 + $0x8] sm:$0xff] }
 0x267   :  { %12472 = vrcp.f32 %v1658_v56 }
 0x268   :  { %12474 = vtanh.f32 %v1481_v2 }
 0x271   :  { %v12473_v17 = vpop.eup %12472 }
 0x272   :  { %v12475_v29 = vpop.eup %12474  ;;  %v1668_v36 = vmul.f32 %v12473_v17, %v8235_v24 }
 0x273   :  { %v1669_v11 = vmul.f32 %v12475_v29, %v12471_v6  ;;  %v1636_v54 = vpop.f32.mrb[30].mxu1 }
 0x274   :  { %v1637_v19 = vadd.f32 %v1636_v54, %v13477_v61  ;;  %v9618_v47 = vpop.f32.mrb[31].mxu1 }
 0x275   :  { %v13527_v38 = vadd.f32 %v1669_v11, %v1668_v36  ;;  %v1893_v47 = vld [vmem:[#allocation5 + $0x8] sm:$0xff] }
 0x276   :  { %v1648_v57 = vadd.f32 %v13524_v16, %v1637_v19 }
 0x278   :  { %v8260_v32 = vmul.f32 -1.442695, %v1648_v57 }
 0x27a   :  { %12476 = vpow2.f32 %v8260_v32 }
 0x27b   :  { %12478 = vtanh.f32 %v13527_v38 }
 0x283   :  { %v1814_v37 = vpop.f32.mrb[32].mxu1 }
 0x284   :  { %v12477_v56 = vpop.eup %12476  ;;  %v1818_v2 = vadd.f32 %v1814_v37, %v1747_v15  ;;  %v9656_v24 = vpop.f32.mrb[33].mxu1  ;;  %v14712_v15 = vmov 0.0  }
 0x285   :  { %v1665_v6 = vadd.f32 1.0, %v12477_v56  ;;  %v12479_v29 = vpop.eup %12478  ;;  %v14713_v56 = vmov 0.0|0.0  }
 0x286   :  { %v8266_v17 = vmul.f32 -1.442695, %v1818_v2 }
 0x287   :  { %12480 = vrcp.f32 %v1665_v6 }
 0x288   :  { %12482 = vpow2.f32 %v8266_v17 }
 0x291   :  { %v12481_v61 = vpop.eup %12480 }
 0x292   :  { %v12483_v54 = vpop.eup %12482  ;;  %v1672_v36 = vmul.f32 %v12481_v61, %v12479_v29 }
 0x293   :  { %v1974_v11 = vadd.f32 1.0, %v12483_v54  ;;  %v1960_v19 = vpop.f32.mrb[34].mxu1  ;;  %v14714_v54 = vld [vmem:[#allocation24_spill] sm:$0xff] }
 0x294   :  { %v1964_v57 = vadd.f32 %v1960_v19, %v1893_v47  ;;  %v9694_v32 = vpop.f32.mrb[35].mxu1  ;;  %9712 = vmatmul.mubr.msk.f32.vlgmr.msra.gmra.mrb[28].mxu0 %vm235_vm1, %v1672_v36  ;;  %v14717_v47 = vld [vmem:[#allocation29_spill] sm:$0xff]  ;;  %v14718_v19 = vld [vmem:[#allocation30_spill] sm:$0xff] }
 0x295   :  { %12484 = vrcp.f32 %v1974_v11  ;;  %11484 = vmatpush3.bf16.msra.mxu0 %v13224_v35  ;;  %9749 = vmatprep.mubr.msk.f32.mxu0 %vm12836_vm2, %v14712_v15  ;;  %v14716_v11 = vld [vmem:[#allocation28_spill] sm:$0xff] }
 0x296   :  { %v8267_v37 = vmul.f32 -1.442695, %v1964_v57  ;;  %11485 = vmatprep.subr.bf16.mxu0 %v14713_v56  ;;  %v14719_v57 = vld [vmem:[#allocation31_spill] sm:$0xff] }
 0x298   :  { %12486 = vpow2.f32 %v8267_v37 }
 0x299   :  { %11487 = vmatpush3.bf16.msra.mxu0 %v13237_v41 }
 0x29a   :  { %11488 = vmatprep.subr.bf16.mxu0 %v14713_v56 }
 0x29d   :  { %11490 = vmatpush3.bf16.msra.mxu0 %v13241_v46 }
 0x29e   :  { %11491 = vmatprep.subr.bf16.mxu0 %v14713_v56 }
 0x29f   :  { %v12485_v2 = vpop.eup %12484 }
 0x2a0   :  { %v1984_v24 = vmul.f32 %v12485_v2, %v13364_v33 }
 0x2a1   :  { %11493 = vmatpush3.bf16.msra.mxu0 %v13245_v49 }
 0x2a2   :  { %v12487_v6 = vpop.eup %12486  ;;  %v13542_v17 = vadd.f32 %v1985_v27, %v1984_v24  ;;  %11506 = vmatprep.subr.bf16.mxu0 %v14713_v56 }
 0x2a3   :  { %v1981_v29 = vadd.f32 1.0, %v12487_v6 }
 0x2a4   :  { %12488 = vtanh.f32 %v13542_v17  ;;  %9750 = vmatmul.mubr.msk.f32.vlgmr.msra.gmra.mrb[30].mxu0 %vm235_vm1, %v1672_v36 }
 0x2a5   :  { %12490 = vrcp.f32 %v1981_v29  ;;  %11508 = vmatpush3.bf16.msra.mxu0 %v13249_v55  ;;  %9787 = vmatprep.mubr.msk.f32.mxu0 %vm12836_vm2, %v14712_v15 }
 0x2a6   :  { %11509 = vmatprep.subr.bf16.mxu0 %v14713_v56 }
 0x2a9   :  { %11511 = vmatpush3.bf16.msra.mxu0 %v13257_v60 }
 0x2aa   :  { %11512 = vmatprep.subr.bf16.mxu0 %v14713_v56 }
 0x2ad   :  { %11514 = vmatpush3.bf16.msra.mxu0 %v13261_v63 }
 0x2ae   :  { %v12489_v27 = vpop.eup %12488  ;;  %11515 = vmatprep.subr.bf16.mxu0 %v14713_v56 }
 0x2af   :  { %v12491_v33 = vpop.eup %12490 }
 0x2b0   :  { %v13555_v61 = vmul.f32 %v12491_v33, %v12489_v27 }
 0x2b1   :  { %11517 = vmatpush3.bf16.msra.mxu0 %v13265_v4 }
 0x2b2   :  { %9731 = vmatmul.mubr.msk.f32.vlgmr.msra.gmra.mrb[36].mxu1 %vm235_vm1, %v13555_v61  ;;  %11530 = vmatprep.subr.bf16.mxu0 %v14713_v56 }
 0x2b3   :  { %11496 = vmatpush3.bf16.msra.mxu1 %v13367_v53  ;;  %9768 = vmatprep.mubr.msk.f32.mxu1 %vm12836_vm2, %v14712_v15 }
 0x2b4   :  { %9788 = vmatmul.mubr.msk.f32.vlgmr.msra.gmra.mrb[32].mxu0 %vm235_vm1, %v1672_v36  ;;  %11497 = vmatprep.subr.bf16.mxu1 %v14713_v56 }
 0x2b5   :  { %11532 = vmatpush3.bf16.msra.mxu0 %v13269_v9  ;;  %9825 = vmatprep.mubr.msk.f32.mxu0 %vm12836_vm2, %v14712_v15 }
 0x2b6   :  { %11533 = vmatprep.subr.bf16.mxu0 %v14713_v56 }
 0x2b7   :  { %11499 = vmatpush3.bf16.msra.mxu1 %v13377_v62 }
 0x2b8   :  { %11500 = vmatprep.subr.bf16.mxu1 %v14713_v56 }
 0x2b9   :  { %11535 = vmatpush3.bf16.msra.mxu0 %v13277_v14 }
 0x2ba   :  { %11536 = vmatprep.subr.bf16.mxu0 %v14713_v56 }
 0x2bb   :  { %11502 = vmatpush3.bf16.msra.mxu1 %v13387_v48 }
 0x2bc   :  { %11503 = vmatprep.subr.bf16.mxu1 %v14713_v56 }
 0x2bd   :  { %11538 = vmatpush3.bf16.msra.mxu0 %v13281_v18 }
 0x2be   :  { %11539 = vmatprep.subr.bf16.mxu0 %v14713_v56 }
 0x2bf   :  { %11505 = vmatpush3.bf16.msra.mxu1 %v13393_v5 }
 0x2c0   :  { %11518 = vmatprep.subr.bf16.mxu1 %v14713_v56 }
 0x2c1   :  { %11541 = vmatpush3.bf16.msra.mxu0 %v13285_v23 }
 0x2c2   :  { %9769 = vmatmul.mubr.msk.f32.vlgmr.msra.gmra.mrb[38].mxu1 %vm235_vm1, %v13555_v61  ;;  %11554 = vmatprep.subr.bf16.mxu0 %v14713_v56 }
 0x2c3   :  { %11520 = vmatpush3.bf16.msra.mxu1 %v13399_v12  ;;  %9806 = vmatprep.mubr.msk.f32.mxu1 %vm12836_vm2, %v14712_v15 }
 0x2c4   :  { %9826 = vmatmul.mubr.msk.f32.vlgmr.msra.gmra.mrb[34].mxu0 %vm235_vm1, %v1672_v36  ;;  %11521 = vmatprep.subr.bf16.mxu1 %v14713_v56  ;;  %v14715_v36 = vld [vmem:[#allocation25_spill] sm:$0xff] }
 0x2c5   :  { %11556 = vmatpush3.bf16.msra.mxu0 %v13069_v34  ;;  %9863 = vmatprep.mubr.msk.f32.mxu0 %vm12836_vm2, %v14712_v15 }
 0x2c6   :  { %11557 = vmatprep.subr.bf16.mxu0 %v14713_v56 }
 0x2c7   :  { %11523 = vmatpush3.bf16.msra.mxu1 %v13408_v21 }
 0x2c8   :  { %11524 = vmatprep.subr.bf16.mxu1 %v14713_v56 }
 0x2c9   :  { %11559 = vmatpush3.bf16.msra.mxu0 %v13081_v39 }
 0x2ca   :  { %11560 = vmatprep.subr.bf16.mxu0 %v14713_v56 }
 0x2cb   :  { %11526 = vmatpush3.bf16.msra.mxu1 %v13420_v40 }
 0x2cc   :  { %11527 = vmatprep.subr.bf16.mxu1 %v14713_v56 }
 0x2cd   :  { %11562 = vmatpush3.bf16.msra.mxu0 %v13095_v42 }
 0x2ce   :  { %11563 = vmatprep.subr.bf16.mxu0 %v14713_v56 }
 0x2cf   :  { %11529 = vmatpush3.bf16.msra.mxu1 %v13426_v51 }
 0x2d0   :  { %11542 = vmatprep.subr.bf16.mxu1 %v14713_v56 }
 0x2d1   :  { %11565 = vmatpush3.bf16.msra.mxu0 %v13107_v45 }
 0x2d2   :  { %9807 = vmatmul.mubr.msk.f32.vlgmr.msra.gmra.mrb[40].mxu1 %vm235_vm1, %v13555_v61  ;;  %11578 = vmatprep.subr.bf16.mxu0 %v14713_v56 }
 0x2d3   :  { %11544 = vmatpush3.bf16.msra.mxu1 %v13432_v20  ;;  %9844 = vmatprep.mubr.msk.f32.mxu1 %vm12836_vm2, %v14712_v15 }
 0x2d4   :  { %9864 = vmatmul.mubr.msk.f32.vlgmr.msra.gmra.mrb[36].mxu0 %vm235_vm1, %v13555_v61  ;;  %11545 = vmatprep.subr.bf16.mxu1 %v14713_v56 }
 0x2d5   :  { %11580 = vmatpush3.bf16.msra.mxu0 %v13127_v52  ;;  %9901 = vmatprep.mubr.msk.f32.mxu0 %vm12836_vm2, %v14712_v15 }
 0x2d6   :  { %11581 = vmatprep.subr.bf16.mxu0 %v14713_v56 }
 0x2d7   :  { %11547 = vmatpush3.bf16.msra.mxu1 %v13440_v3 }
 0x2d8   :  { %11548 = vmatprep.subr.bf16.mxu1 %v14713_v56 }
 0x2d9   :  { %11583 = vmatpush3.bf16.msra.mxu0 %v13140_v59 }
 0x2da   :  { %11584 = vmatprep.subr.bf16.mxu0 %v14713_v56 }
 0x2db   :  { %11550 = vmatpush3.bf16.msra.mxu1 %v13448_v26 }
 0x2dc   :  { %11551 = vmatprep.subr.bf16.mxu1 %v14713_v56 }
 0x2dd   :  { %11586 = vmatpush3.bf16.msra.mxu0 %v13154_v1 }
 0x2de   :  { %11587 = vmatprep.subr.bf16.mxu0 %v14713_v56 }
 0x2df   :  { %11553 = vmatpush3.bf16.msra.mxu1 %v13452_v43 }
 0x2e0   :  { %11566 = vmatprep.subr.bf16.mxu1 %v14713_v56 }
 0x2e1   :  { %11589 = vmatpush3.bf16.msra.mxu0 %v13166_v8 }
 0x2e2   :  { %9845 = vmatmul.mubr.msk.f32.vlgmr.msra.gmra.mrb[42].mxu1 %vm235_vm1, %v13555_v61  ;;  %11602 = vmatprep.subr.bf16.mxu0 %v14713_v56 }
 0x2e3   :  { %11568 = vmatpush3.bf16.msra.mxu1 %v13120_v50  ;;  %9882 = vmatprep.mubr.msk.f32.mxu1 %vm12836_vm2, %v14712_v15 }
 0x2e4   :  { %9902 = vmatmul.mubr.msk.f32.vlgmr.msra.gmra.mrb[38].mxu0 %vm235_vm1, %v13555_v61  ;;  %11569 = vmatprep.subr.bf16.mxu1 %v14713_v56 }
 0x2e5   :  { %11604 = vmatpush3.bf16.msra.mxu0 %v13208_v22  ;;  %9939 = vmatprep.mubr.msk.f32.mxu0 %vm12836_vm2, %v14712_v15 }
 0x2e6   :  { %11605 = vmatprep.subr.bf16.mxu0 %v14713_v56 }
 0x2e7   :  { %11571 = vmatpush3.bf16.msra.mxu1 %v13138_v58 }
 0x2e8   :  { %11572 = vmatprep.subr.bf16.mxu1 %v14713_v56 }
 0x2e9   :  { %11607 = vmatpush3.bf16.msra.mxu0 %v13212_v25 }
 0x2ea   :  { %11608 = vmatprep.subr.bf16.mxu0 %v14713_v56 }
 0x2eb   :  { %11574 = vmatpush3.bf16.msra.mxu1 %v13152_v0  ;;  %v2584_v0 = vld [vmem:[#allocation2 + $0x10] sm:$0xff] }
 0x2ec   :  { %11575 = vmatprep.subr.bf16.mxu1 %v14713_v56 }
 0x2ed   :  { %11610 = vmatpush3.bf16.msra.mxu0 %v13216_v28 }
 0x2ee   :  { %11611 = vmatprep.subr.bf16.mxu0 %v14713_v56 }
 0x2ef   :  { %11577 = vmatpush3.bf16.msra.mxu1 %v13164_v7 }
 0x2f0   :  { %11590 = vmatprep.subr.bf16.mxu1 %v14713_v56 }
 0x2f1   :  { %11613 = vmatpush3.bf16.msra.mxu0 %v13220_v31 }
 0x2f2   :  { %9883 = vmatmul.mubr.msk.f32.vlgmr.msra.gmra.mrb[44].mxu1 %vm235_vm1, %v13555_v61  ;;  %11626 = vmatprep.subr.bf16.mxu0 %v14713_v56 }
 0x2f3   :  { %11592 = vmatpush3.bf16.msra.mxu1 %v13176_v10  ;;  %9920 = vmatprep.mubr.msk.f32.mxu1 %vm12836_vm2, %v14712_v15 }
 0x2f4   :  { %11593 = vmatprep.subr.bf16.mxu1 %v14713_v56 }
 0x2f7   :  { %11595 = vmatpush3.bf16.msra.mxu1 %v13187_v13 }
 0x2f8   :  { %11596 = vmatprep.subr.bf16.mxu1 %v14713_v56 }
 0x2fb   :  { %11598 = vmatpush3.bf16.msra.mxu1 %v14714_v54 }
 0x2fc   :  { %11599 = vmatprep.subr.bf16.mxu1 %v14713_v56 }
 0x2ff   :  { %11601 = vmatpush3.bf16.msra.mxu1 %v14715_v36 }
 0x300   :  { %11614 = vmatprep.subr.bf16.mxu1 %v14713_v56 }
 0x302   :  { %9921 = vmatmul.mubr.msk.f32.vlgmr.msra.gmra.mrb[46].mxu1 %vm235_vm1, %v13555_v61 }
 0x303   :  { %11616 = vmatpush3.bf16.msra.mxu1 %v14716_v11  ;;  %9958 = vmatprep.mubr.msk.f32.mxu1 %vm12836_vm2, %v14712_v15 }
 0x304   :  { %11617 = vmatprep.subr.bf16.mxu1 %v14713_v56 }
 0x307   :  { %11619 = vmatpush3.bf16.msra.mxu1 %v14717_v47  ;;  %v14720_v47 = vld [vmem:[#allocation32_spill] sm:$0xff] }
 0x308   :  { %11620 = vmatprep.subr.bf16.mxu1 %v14713_v56 }
 0x30b   :  { %11622 = vmatpush3.bf16.msra.mxu1 %v14718_v19 }
 0x30c   :  { %11623 = vmatprep.subr.bf16.mxu1 %v14713_v56 }
 0x30f   :  { %11625 = vmatpush3.bf16.msra.mxu1 %v14719_v57 }
 0x310   :  { %11638 = vmatprep.subr.bf16.mxu1 %v14713_v56 }
 0x367   :  { %v2058_v32 = vpop.f32.mrb[28].mxu0 }
 0x368   :  { %v9713_v37 = vpop.f32.mrb[29].mxu0 }
 0x377   :  { %v2202_v2 = vpop.f32.mrb[30].mxu0 }
 0x378   :  { %v9751_v24 = vpop.f32.mrb[31].mxu0 }
 0x385   :  { %v2131_v6 = vpop.f32.mrb[36].mxu1 }
 0x386   :  { %v2132_v29 = vadd.f32 %v2131_v6, %v2058_v32  ;;  %v9732_v27 = vpop.f32.mrb[37].mxu1 }
 0x387   :  { %v2343_v33 = vpop.f32.mrb[32].mxu0 }
 0x388   :  { %v9789_v61 = vpop.f32.mrb[33].mxu0  ;;  %v2135_v11 = vadd.f32 %v14720_v47, %v2132_v29 }
 0x38a   :  { %v8276_v36 = vmul.f32 -1.442695, %v2135_v11 }
 0x38c   :  { %12492 = vpow2.f32 %v8276_v36 }
 0x395   :  { %v2272_v54 = vpop.f32.mrb[38].mxu1 }
 0x396   :  { %v2273_v19 = vadd.f32 %v2272_v54, %v2202_v2  ;;  %v9770_v13 = vpop.f32.mrb[39].mxu1  ;;  %v12493_v37 = vpop.eup %12492 }
 0x397   :  { %v2484_v10 = vpop.f32.mrb[34].mxu0  ;;  %v2562_v24 = vadd.f32 1.0, %v12493_v37 }
 0x398   :  { %v2276_v57 = vadd.f32 %v13507_v30, %v2273_v19  ;;  %v9827_v31 = vpop.f32.mrb[35].mxu0 }
 0x39a   :  { %v8277_v7 = vmul.f32 -1.442695, %v2276_v57 }
 0x39c   :  { %12494 = vpow2.f32 %v8277_v7 }
 0x39d   :  { %12496 = vrcp.f32 %v2562_v24 }
 0x3a5   :  { %v2413_v28 = vpop.f32.mrb[40].mxu1 }
 0x3a6   :  { %v12495_v32 = vpop.eup %12494  ;;  %v2414_v6 = vadd.f32 %v2413_v28, %v2343_v33  ;;  %v9808_v27 = vpop.f32.mrb[41].mxu1 }
 0x3a7   :  { %v2568_v61 = vadd.f32 1.0, %v12495_v32  ;;  %v2651_v29 = vpop.f32.mrb[36].mxu0  ;;  %v12497_v31 = vpop.eup %12496 }
 0x3a8   :  { %v2417_v54 = vadd.f32 %v13514_v44, %v2414_v6  ;;  %v2655_v13 = vadd.f32 %v2651_v29, %v2584_v0  ;;  %v9865_v36 = vpop.f32.mrb[37].mxu0  ;;  %v2730_v6 = vld [vmem:[#allocation4 + $0x10] sm:$0xff] }
 0x3a9   :  { %12498 = vrcp.f32 %v2568_v61 }
 0x3aa   :  { %12500 = vtanh.f32 %v2417_v54  ;;  %v8283_v11 = vmul.f32 -1.442695, %v2655_v13 }
 0x3ac   :  { %12502 = vpow2.f32 %v8283_v11  ;;  %v2657_v11 = vld [vmem:[#allocation3 + $0x10] sm:$0xff] }
 0x3b3   :  { %v12499_v7 = vpop.eup %12498 }
 0x3b4   :  { %v12501_v19 = vpop.eup %12500  ;;  %v2578_v57 = vmul.f32 %v12499_v7, %v13527_v38 }
 0x3b5   :  { %v2579_v2 = vmul.f32 %v12501_v19, %v12497_v31  ;;  %v2554_v28 = vpop.f32.mrb[42].mxu1 }
 0x3b6   :  { %v12503_v33 = vpop.eup %12502  ;;  %v2555_v37 = vadd.f32 %v2554_v28, %v2484_v10  ;;  %v9846_v32 = vpop.f32.mrb[43].mxu1 }
 0x3b7   :  { %v13681_v27 = vadd.f32 %v2579_v2, %v2578_v57  ;;  %v2878_v24 = vadd.f32 1.0, %v12503_v33  ;;  %v2797_v0 = vpop.f32.mrb[38].mxu0 }
 0x3b8   :  { %v2558_v61 = vadd.f32 %v13524_v16, %v2555_v37  ;;  %v2801_v29 = vadd.f32 %v2797_v0, %v2730_v6  ;;  %v9903_v54 = vpop.f32.mrb[39].mxu0  ;;  %v2803_v0 = vld [vmem:[#allocation5 + $0x10] sm:$0xff] }
 0x3b9   :  { %12504 = vrcp.f32 %v2878_v24 }
 0x3ba   :  { %v8278_v13 = vmul.f32 -1.442695, %v2558_v61  ;;  %12506 = vtanh.f32 %v2801_v29 }
 0x3bc   :  { %12508 = vpow2.f32 %v8278_v13 }
 0x3bd   :  { %12510 = vtanh.f32 %v13681_v27 }
 0x3c3   :  { %v12505_v36 = vpop.eup %12504 }
 0x3c4   :  { %v12507_v38 = vpop.eup %12506 }
 0x3c5   :  { %v2724_v31 = vpop.f32.mrb[44].mxu1  ;;  %v2895_v10 = vmul.f32 %v12507_v38, %v12505_v36 }
 0x3c6   :  { %v12509_v7 = vpop.eup %12508  ;;  %v2728_v19 = vadd.f32 %v2724_v31, %v2657_v11  ;;  %v9884_v57 = vpop.f32.mrb[45].mxu1 }
 0x3c7   :  { %v2575_v2 = vadd.f32 1.0, %v12509_v7  ;;  %v12511_v33 = vpop.eup %12510  ;;  %v14721_v57 = vld [vmem:[#allocation20_spill] sm:$0xff] }
 0x3c8   :  { %v8284_v28 = vmul.f32 -1.442695, %v2728_v19 }
 0x3c9   :  { %12512 = vrcp.f32 %v2575_v2  ;;  %v14722_v2 = vld [vmem:[#allocation26_spill] sm:$0xff] }
 0x3ca   :  { %12514 = vpow2.f32 %v8284_v28  ;;  %v14723_v28 = vld [vmem:[#allocation21_spill] sm:$0xff] }
 0x3d3   :  { %v12513_v37 = vpop.eup %12512 }
 0x3d4   :  { %v12515_v32 = vpop.eup %12514  ;;  %v2582_v24 = vmul.f32 %v12513_v37, %v12511_v33  ;;  %v14724_v33 = vld [vmem:[#allocation27_spill] sm:$0xff]  ;;  %v14725_v37 = vld [vmem:[#allocation22_spill] sm:$0xff] }
 0x3d5   :  { %v2884_v6 = vadd.f32 1.0, %v12515_v32  ;;  %v2870_v61 = vpop.f32.mrb[46].mxu1  ;;  %v14726_v32 = vld [vmem:[#allocation23_spill] sm:$0xff] }
 0x3d6   :  { %v2874_v29 = vadd.f32 %v2870_v61, %v2803_v0  ;;  %v9922_v54 = vpop.f32.mrb[47].mxu1  ;;  %9940 = vmatmul.mubr.msk.f32.vlgmr.msra.gmra.mrb[40].mxu0 %vm235_vm1, %v2582_v24  ;;  %v14729_v0 = vld [vmem:[#allocation28_spill] sm:$0xff]  ;;  %v14730_v61 = vld [vmem:[#allocation29_spill] sm:$0xff] }
 0x3d7   :  { %12516 = vrcp.f32 %v2884_v6  ;;  %11628 = vmatpush3.bf16.msra.mxu0 %v13224_v35  ;;  %9977 = vmatprep.mubr.msk.f32.mxu0 %vm12836_vm2, %v14712_v15  ;;  %v14728_v6 = vld [vmem:[#allocation25_spill] sm:$0xff]  ;;  %v14732_v54 = vld [vmem:[#allocation31_spill] sm:$0xff] }
 0x3d8   :  { %v8285_v13 = vmul.f32 -1.442695, %v2874_v29  ;;  %11629 = vmatprep.subr.bf16.mxu0 %v14713_v56  ;;  %v14731_v29 = vld [vmem:[#allocation30_spill] sm:$0xff] }
 0x3da   :  { %12518 = vpow2.f32 %v8285_v13 }
 0x3db   :  { %11631 = vmatpush3.bf16.msra.mxu0 %v13237_v41 }
 0x3dc   :  { %11632 = vmatprep.subr.bf16.mxu0 %v14713_v56 }
 0x3df   :  { %11634 = vmatpush3.bf16.msra.mxu0 %v13241_v46 }
 0x3e0   :  { %11635 = vmatprep.subr.bf16.mxu0 %v14713_v56 }
 0x3e1   :  { %v12517_v36 = vpop.eup %12516 }
 0x3e2   :  { %v2894_v38 = vmul.f32 %v12517_v36, %v13542_v17 }
 0x3e3   :  { %11637 = vmatpush3.bf16.msra.mxu0 %v13245_v49 }
 0x3e4   :  { %v12519_v11 = vpop.eup %12518  ;;  %v13696_v31 = vadd.f32 %v2895_v10, %v2894_v38  ;;  %11650 = vmatprep.subr.bf16.mxu0 %v14713_v56 }
 0x3e5   :  { %v2891_v7 = vadd.f32 1.0, %v12519_v11 }
 0x3e6   :  { %12520 = vtanh.f32 %v13696_v31  ;;  %9978 = vmatmul.mubr.msk.f32.vlgmr.msra.gmra.mrb[42].mxu0 %vm235_vm1, %v2582_v24 }
 0x3e7   :  { %12522 = vrcp.f32 %v2891_v7  ;;  %11652 = vmatpush3.bf16.msra.mxu0 %v13249_v55  ;;  %10015 = vmatprep.mubr.msk.f32.mxu0 %vm12836_vm2, %v14712_v15 }
 0x3e8   :  { %11653 = vmatprep.subr.bf16.mxu0 %v14713_v56 }
 0x3eb   :  { %11655 = vmatpush3.bf16.msra.mxu0 %v13257_v60 }
 0x3ec   :  { %11656 = vmatprep.subr.bf16.mxu0 %v14713_v56 }
 0x3ef   :  { %11658 = vmatpush3.bf16.msra.mxu0 %v13261_v63 }
 0x3f0   :  { %v12521_v17 = vpop.eup %12520  ;;  %11659 = vmatprep.subr.bf16.mxu0 %v14713_v56 }
 0x3f1   :  { %v12523_v10 = vpop.eup %12522 }
 0x3f2   :  { %v13709_v19 = vmul.f32 %v12523_v10, %v12521_v17 }
 0x3f3   :  { %11661 = vmatpush3.bf16.msra.mxu0 %v13265_v4 }
 0x3f4   :  { %9959 = vmatmul.mubr.msk.f32.vlgmr.msra.gmra.mrb[48].mxu1 %vm235_vm1, %v13709_v19  ;;  %11674 = vmatprep.subr.bf16.mxu0 %v14713_v56 }
 0x3f5   :  { %11640 = vmatpush3.bf16.msra.mxu1 %v13367_v53  ;;  %9996 = vmatprep.mubr.msk.f32.mxu1 %vm12836_vm2, %v14712_v15 }
 0x3f6   :  { %10016 = vmatmul.mubr.msk.f32.vlgmr.msra.gmra.mrb[44].mxu0 %vm235_vm1, %v2582_v24  ;;  %11641 = vmatprep.subr.bf16.mxu1 %v14713_v56 }
 0x3f7   :  { %11676 = vmatpush3.bf16.msra.mxu0 %v13269_v9  ;;  %10053 = vmatprep.mubr.msk.f32.mxu0 %vm12836_vm2, %v14712_v15 }
 0x3f8   :  { %11677 = vmatprep.subr.bf16.mxu0 %v14713_v56 }
 0x3f9   :  { %11643 = vmatpush3.bf16.msra.mxu1 %v13377_v62 }
 0x3fa   :  { %11644 = vmatprep.subr.bf16.mxu1 %v14713_v56 }
 0x3fb   :  { %11679 = vmatpush3.bf16.msra.mxu0 %v13277_v14 }
 0x3fc   :  { %11680 = vmatprep.subr.bf16.mxu0 %v14713_v56 }
 0x3fd   :  { %11646 = vmatpush3.bf16.msra.mxu1 %v13387_v48 }
 0x3fe   :  { %11647 = vmatprep.subr.bf16.mxu1 %v14713_v56 }
 0x3ff   :  { %11682 = vmatpush3.bf16.msra.mxu0 %v13281_v18 }
 0x400   :  { %11683 = vmatprep.subr.bf16.mxu0 %v14713_v56 }
 0x401   :  { %11649 = vmatpush3.bf16.msra.mxu1 %v13393_v5 }
 0x402   :  { %11662 = vmatprep.subr.bf16.mxu1 %v14713_v56 }
 0x403   :  { %11685 = vmatpush3.bf16.msra.mxu0 %v13285_v23 }
 0x404   :  { %9997 = vmatmul.mubr.msk.f32.vlgmr.msra.gmra.mrb[50].mxu1 %vm235_vm1, %v13709_v19  ;;  %11698 = vmatprep.subr.bf16.mxu0 %v14713_v56 }
 0x405   :  { %11664 = vmatpush3.bf16.msra.mxu1 %v13399_v12  ;;  %10034 = vmatprep.mubr.msk.f32.mxu1 %vm12836_vm2, %v14712_v15 }
 0x406   :  { %10054 = vmatmul.mubr.msk.f32.vlgmr.msra.gmra.mrb[46].mxu0 %vm235_vm1, %v2582_v24  ;;  %11665 = vmatprep.subr.bf16.mxu1 %v14713_v56  ;;  %v14727_v24 = vld [vmem:[#allocation24_spill] sm:$0xff] }
 0x407   :  { %11700 = vmatpush3.bf16.msra.mxu0 %v13069_v34  ;;  %10091 = vmatprep.mubr.msk.f32.mxu0 %vm12836_vm2, %v14712_v15 }
 0x408   :  { %11701 = vmatprep.subr.bf16.mxu0 %v14713_v56 }
 0x409   :  { %11667 = vmatpush3.bf16.msra.mxu1 %v13408_v21 }
 0x40a   :  { %11668 = vmatprep.subr.bf16.mxu1 %v14713_v56 }
 0x40b   :  { %11703 = vmatpush3.bf16.msra.mxu0 %v13081_v39 }
 0x40c   :  { %11704 = vmatprep.subr.bf16.mxu0 %v14713_v56 }
 0x40d   :  { %11670 = vmatpush3.bf16.msra.mxu1 %v13420_v40 }
 0x40e   :  { %11671 = vmatprep.subr.bf16.mxu1 %v14713_v56 }
 0x40f   :  { %11706 = vmatpush3.bf16.msra.mxu0 %v13095_v42 }
 0x410   :  { %11707 = vmatprep.subr.bf16.mxu0 %v14713_v56 }
 0x411   :  { %11673 = vmatpush3.bf16.msra.mxu1 %v13426_v51 }
 0x412   :  { %11686 = vmatprep.subr.bf16.mxu1 %v14713_v56 }
 0x413   :  { %11709 = vmatpush3.bf16.msra.mxu0 %v13107_v45 }
 0x414   :  { %10035 = vmatmul.mubr.msk.f32.vlgmr.msra.gmra.mrb[52].mxu1 %vm235_vm1, %v13709_v19  ;;  %11722 = vmatprep.subr.bf16.mxu0 %v14713_v56 }
 0x415   :  { %11688 = vmatpush3.bf16.msra.mxu1 %v13432_v20  ;;  %10072 = vmatprep.mubr.msk.f32.mxu1 %vm12836_vm2, %v14712_v15 }
 0x416   :  { %10092 = vmatmul.mubr.msk.f32.vlgmr.msra.gmra.mrb[48].mxu0 %vm235_vm1, %v13709_v19  ;;  %11689 = vmatprep.subr.bf16.mxu1 %v14713_v56 }
 0x417   :  { %11724 = vmatpush3.bf16.msra.mxu0 %v13127_v52  ;;  %10129 = vmatprep.mubr.msk.f32.mxu0 %vm12836_vm2, %v14712_v15 }
 0x418   :  { %11725 = vmatprep.subr.bf16.mxu0 %v14713_v56 }
 0x419   :  { %11691 = vmatpush3.bf16.msra.mxu1 %v13440_v3 }
 0x41a   :  { %11692 = vmatprep.subr.bf16.mxu1 %v14713_v56 }
 0x41b   :  { %11727 = vmatpush3.bf16.msra.mxu0 %v13140_v59 }
 0x41c   :  { %11728 = vmatprep.subr.bf16.mxu0 %v14713_v56 }
 0x41d   :  { %11694 = vmatpush3.bf16.msra.mxu1 %v13448_v26 }
 0x41e   :  { %11695 = vmatprep.subr.bf16.mxu1 %v14713_v56 }
 0x41f   :  { %11730 = vmatpush3.bf16.msra.mxu0 %v13154_v1 }
 0x420   :  { %11731 = vmatprep.subr.bf16.mxu0 %v14713_v56 }
 0x421   :  { %11697 = vmatpush3.bf16.msra.mxu1 %v13452_v43 }
 0x422   :  { %11710 = vmatprep.subr.bf16.mxu1 %v14713_v56 }
 0x423   :  { %11733 = vmatpush3.bf16.msra.mxu0 %v13166_v8 }
 0x424   :  { %10073 = vmatmul.mubr.msk.f32.vlgmr.msra.gmra.mrb[54].mxu1 %vm235_vm1, %v13709_v19  ;;  %11746 = vmatprep.subr.bf16.mxu0 %v14713_v56 }
 0x425   :  { %11712 = vmatpush3.bf16.msra.mxu1 %v13120_v50  ;;  %10110 = vmatprep.mubr.msk.f32.mxu1 %vm12836_vm2, %v14712_v15 }
 0x426   :  { %10130 = vmatmul.mubr.msk.f32.vlgmr.msra.gmra.mrb[50].mxu0 %vm235_vm1, %v13709_v19  ;;  %11713 = vmatprep.subr.bf16.mxu1 %v14713_v56 }
 0x427   :  { %11748 = vmatpush3.bf16.msra.mxu0 %v13208_v22  ;;  %10167 = vmatprep.mubr.msk.f32.mxu0 %vm12836_vm2, %v14712_v15 }
 0x428   :  { %11749 = vmatprep.subr.bf16.mxu0 %v14713_v56 }
 0x429   :  { %11715 = vmatpush3.bf16.msra.mxu1 %v13138_v58 }
 0x42a   :  { %11716 = vmatprep.subr.bf16.mxu1 %v14713_v56 }
 0x42b   :  { %11751 = vmatpush3.bf16.msra.mxu0 %v13212_v25 }
 0x42c   :  { %11752 = vmatprep.subr.bf16.mxu0 %v14713_v56 }
 0x42d   :  { %11718 = vmatpush3.bf16.msra.mxu1 %v14721_v57  ;;  %v3494_v57 = vld [vmem:[#allocation2 + $0x18] sm:$0xff] }
 0x42e   :  { %11719 = vmatprep.subr.bf16.mxu1 %v14713_v56 }
 0x42f   :  { %11754 = vmatpush3.bf16.msra.mxu0 %v14722_v2 }
 0x430   :  { %11755 = vmatprep.subr.bf16.mxu0 %v14713_v56 }
 0x431   :  { %11721 = vmatpush3.bf16.msra.mxu1 %v14723_v28 }
 0x432   :  { %11734 = vmatprep.subr.bf16.mxu1 %v14713_v56 }
 0x433   :  { %11757 = vmatpush3.bf16.msra.mxu0 %v14724_v33 }
 0x434   :  { %10111 = vmatmul.mubr.msk.f32.vlgmr.msra.gmra.mrb[56].mxu1 %vm235_vm1, %v13709_v19  ;;  %11770 = vmatprep.subr.bf16.mxu0 %v14713_v56 }
 0x435   :  { %11736 = vmatpush3.bf16.msra.mxu1 %v14725_v37  ;;  %10148 = vmatprep.mubr.msk.f32.mxu1 %vm12836_vm2, %v14712_v15 }
 0x436   :  { %11737 = vmatprep.subr.bf16.mxu1 %v14713_v56 }
 0x439   :  { %11739 = vmatpush3.bf16.msra.mxu1 %v14726_v32 }
 0x43a   :  { %11740 = vmatprep.subr.bf16.mxu1 %v14713_v56 }
 0x43d   :  { %11742 = vmatpush3.bf16.msra.mxu1 %v14727_v24 }
 0x43e   :  { %11743 = vmatprep.subr.bf16.mxu1 %v14713_v56 }
 0x441   :  { %11745 = vmatpush3.bf16.msra.mxu1 %v14728_v6 }
 0x442   :  { %11758 = vmatprep.subr.bf16.mxu1 %v14713_v56 }
 0x444   :  { %10149 = vmatmul.mubr.msk.f32.vlgmr.msra.gmra.mrb[58].mxu1 %vm235_vm1, %v13709_v19 }
 0x445   :  { %11760 = vmatpush3.bf16.msra.mxu1 %v14729_v0  ;;  %10186 = vmatprep.mubr.msk.f32.mxu1 %vm12836_vm2, %v14712_v15 }
 0x446   :  { %11761 = vmatprep.subr.bf16.mxu1 %v14713_v56 }
 0x449   :  { %11763 = vmatpush3.bf16.msra.mxu1 %v14730_v61 }
 0x44a   :  { %11764 = vmatprep.subr.bf16.mxu1 %v14713_v56 }
 0x44d   :  { %11766 = vmatpush3.bf16.msra.mxu1 %v14731_v29 }
 0x44e   :  { %11767 = vmatprep.subr.bf16.mxu1 %v14713_v56 }
 0x451   :  { %11769 = vmatpush3.bf16.msra.mxu1 %v14732_v54 }
 0x452   :  { %11782 = vmatprep.subr.bf16.mxu1 %v14713_v56 }
 0x4a9   :  { %v2968_v13 = vpop.f32.mrb[40].mxu0 }
 0x4aa   :  { %v9941_v36 = vpop.f32.mrb[41].mxu0 }
 0x4b9   :  { %v3112_v38 = vpop.f32.mrb[42].mxu0 }
 0x4ba   :  { %v9979_v11 = vpop.f32.mrb[43].mxu0 }
 0x4c7   :  { %v3041_v7 = vpop.f32.mrb[48].mxu1 }
 0x4c8   :  { %v3042_v17 = vadd.f32 %v3041_v7, %v2968_v13  ;;  %v9960_v10 = vpop.f32.mrb[49].mxu1 }
 0x4c9   :  { %v3253_v19 = vpop.f32.mrb[44].mxu0 }
 0x4ca   :  { %v10017_v0 = vpop.f32.mrb[45].mxu0  ;;  %v3045_v61 = vadd.f32 %v14720_v47, %v3042_v17 }
 0x4cc   :  { %v8294_v6 = vmul.f32 -1.442695, %v3045_v61 }
 0x4ce   :  { %12524 = vpow2.f32 %v8294_v6 }
 0x4d7   :  { %v3182_v24 = vpop.f32.mrb[50].mxu1 }
 0x4d8   :  { %v3183_v29 = vadd.f32 %v3182_v24, %v3112_v38  ;;  %v9998_v32 = vpop.f32.mrb[51].mxu1  ;;  %v12525_v36 = vpop.eup %12524 }
 0x4d9   :  { %v3394_v37 = vpop.f32.mrb[46].mxu0  ;;  %v3472_v11 = vadd.f32 1.0, %v12525_v36 }
 0x4da   :  { %v3186_v54 = vadd.f32 %v13507_v30, %v3183_v29  ;;  %v10055_v33 = vpop.f32.mrb[47].mxu0 }
 0x4dc   :  { %v8295_v28 = vmul.f32 -1.442695, %v3186_v54 }
 0x4de   :  { %12526 = vpow2.f32 %v8295_v28 }
 0x4df   :  { %12528 = vrcp.f32 %v3472_v11 }
 0x4e7   :  { %v3323_v2 = vpop.f32.mrb[52].mxu1 }
 0x4e8   :  { %v12527_v13 = vpop.eup %12526  ;;  %v3324_v7 = vadd.f32 %v3323_v2, %v3253_v19  ;;  %v10036_v10 = vpop.f32.mrb[53].mxu1 }
 0x4e9   :  { %v3478_v0 = vadd.f32 1.0, %v12527_v13  ;;  %v3561_v47 = vpop.f32.mrb[48].mxu0  ;;  %v12529_v33 = vpop.eup %12528 }
 0x4ea   :  { %v3327_v24 = vadd.f32 %v13514_v44, %v3324_v7  ;;  %v3565_v32 = vadd.f32 %v3561_v47, %v3494_v57  ;;  %v10093_v6 = vpop.f32.mrb[49].mxu0  ;;  %v3640_v44 = vld [vmem:[#allocation4 + $0x18] sm:$0xff] }
 0x4eb   :  { %12530 = vrcp.f32 %v3478_v0 }
 0x4ec   :  { %12532 = vtanh.f32 %v3327_v24  ;;  %v8301_v30 = vmul.f32 -1.442695, %v3565_v32  ;;  %v3567_v24 = vld [vmem:[#allocation3 + $0x18] sm:$0xff] }
 0x4ee   :  { %12534 = vpow2.f32 %v8301_v30 }
 0x4f5   :  { %v12531_v28 = vpop.eup %12530 }
 0x4f6   :  { %v12533_v61 = vpop.eup %12532  ;;  %v3488_v29 = vmul.f32 %v12531_v28, %v13681_v27 }
 0x4f7   :  { %v3489_v54 = vmul.f32 %v12533_v61, %v12529_v33  ;;  %v3464_v2 = vpop.f32.mrb[54].mxu1 }
 0x4f8   :  { %v12535_v38 = vpop.eup %12534  ;;  %v3465_v17 = vadd.f32 %v3464_v2, %v3394_v37  ;;  %v10074_v19 = vpop.f32.mrb[55].mxu1 }
 0x4f9   :  { %v13835_v36 = vadd.f32 %v3489_v54, %v3488_v29  ;;  %v3788_v11 = vadd.f32 1.0, %v12535_v38  ;;  %v3707_v57 = vpop.f32.mrb[50].mxu0 }
 0x4fa   :  { %v3468_v13 = vadd.f32 %v13524_v16, %v3465_v17  ;;  %v3711_v7 = vadd.f32 %v3707_v57, %v3640_v44  ;;  %v10131_v10 = vpop.f32.mrb[51].mxu0  ;;  %v3713_v17 = vld [vmem:[#allocation5 + $0x18] sm:$0xff] }
 0x4fb   :  { %12536 = vrcp.f32 %v3788_v11 }
 0x4fc   :  { %v8296_v0 = vmul.f32 -1.442695, %v3468_v13  ;;  %12538 = vtanh.f32 %v3711_v7 }
 0x4fe   :  { %12540 = vpow2.f32 %v8296_v0 }
 0x4ff   :  { %12542 = vtanh.f32 %v13835_v36 }
 0x505   :  { %v12537_v47 = vpop.eup %12536 }
 0x506   :  { %v12539_v27 = vpop.eup %12538 }
 0x507   :  { %v3634_v32 = vpop.f32.mrb[56].mxu1  ;;  %v3805_v37 = vmul.f32 %v12539_v27, %v12537_v47 }
 0x508   :  { %v12541_v6 = vpop.eup %12540  ;;  %v3638_v30 = vadd.f32 %v3634_v32, %v3567_v24  ;;  %v10112_v33 = vpop.f32.mrb[57].mxu1  ;;  %v14733_v32 = vld [vmem:[#allocation20_spill] sm:$0xff] }
 0x509   :  { %v3485_v28 = vadd.f32 1.0, %v12541_v6  ;;  %v12543_v16 = vpop.eup %12542  ;;  %v14734_v6 = vld [vmem:[#allocation26_spill] sm:$0xff] }
 0x50a   :  { %v8302_v61 = vmul.f32 -1.442695, %v3638_v30  ;;  %v14736_v30 = vld [vmem:[#allocation27_spill] sm:$0xff]  ;;  %v14737_v33 = vld [vmem:[#allocation22_spill] sm:$0xff] }
 0x50b   :  { %12544 = vrcp.f32 %v3485_v28  ;;  %v14738_v28 = vld [vmem:[#allocation23_spill] sm:$0xff] }
 0x50c   :  { %12546 = vpow2.f32 %v8302_v61  ;;  %v14739_v61 = vld [vmem:[#allocation24_spill] sm:$0xff] }
 0x515   :  { %v12545_v29 = vpop.eup %12544 }
 0x516   :  { %v12547_v54 = vpop.eup %12546  ;;  %v3492_v2 = vmul.f32 %v12545_v29, %v12543_v16  ;;  %v14740_v16 = vld [vmem:[#allocation25_spill] sm:$0xff]  ;;  %v14741_v29 = vld [vmem:[#allocation28_spill] sm:$0xff] }
 0x517   :  { %v3794_v38 = vadd.f32 1.0, %v12547_v54  ;;  %v3780_v19 = vpop.f32.mrb[58].mxu1  ;;  %v14742_v54 = vld [vmem:[#allocation29_spill] sm:$0xff] }
 0x518   :  { %v3784_v11 = vadd.f32 %v3780_v19, %v3713_v17  ;;  %v10150_v44 = vpop.f32.mrb[59].mxu1  ;;  %10168 = vmatmul.mubr.msk.f32.vlgmr.msra.gmra.mrb[52].mxu0 %vm235_vm1, %v3492_v2 }
 0x519   :  { %12548 = vrcp.f32 %v3794_v38  ;;  %11772 = vmatpush3.bf16.msra.mxu0 %v13224_v35  ;;  %10205 = vmatprep.mubr.msk.f32.mxu0 %vm12836_vm2, %v14712_v15  ;;  %v14744_v38 = vld [vmem:[#allocation31_spill] sm:$0xff] }
 0x51a   :  { %v8303_v57 = vmul.f32 -1.442695, %v3784_v11  ;;  %11773 = vmatprep.subr.bf16.mxu0 %v14713_v56 }
 0x51c   :  { %12550 = vpow2.f32 %v8303_v57 }
 0x51d   :  { %11775 = vmatpush3.bf16.msra.mxu0 %v13237_v41 }
 0x51e   :  { %11776 = vmatprep.subr.bf16.mxu0 %v14713_v56 }
 0x521   :  { %11778 = vmatpush3.bf16.msra.mxu0 %v13241_v46 }
 0x522   :  { %11779 = vmatprep.subr.bf16.mxu0 %v14713_v56 }
 0x523   :  { %v12549_v13 = vpop.eup %12548 }
 0x524   :  { %v3804_v7 = vmul.f32 %v12549_v13, %v13696_v31 }
 0x525   :  { %11781 = vmatpush3.bf16.msra.mxu0 %v13245_v49 }
 0x526   :  { %v12551_v10 = vpop.eup %12550  ;;  %v13850_v0 = vadd.f32 %v3805_v37, %v3804_v7  ;;  %11794 = vmatprep.subr.bf16.mxu0 %v14713_v56  ;;  %v14735_v37 = vld [vmem:[#allocation21_spill] sm:$0xff] }
 0x527   :  { %v3801_v47 = vadd.f32 1.0, %v12551_v10 }
 0x528   :  { %12552 = vtanh.f32 %v13850_v0  ;;  %10206 = vmatmul.mubr.msk.f32.vlgmr.msra.gmra.mrb[54].mxu0 %vm235_vm1, %v3492_v2 }
 0x529   :  { %12554 = vrcp.f32 %v3801_v47  ;;  %11796 = vmatpush3.bf16.msra.mxu0 %v13249_v55  ;;  %10243 = vmatprep.mubr.msk.f32.mxu0 %vm12836_vm2, %v14712_v15 }
 0x52a   :  { %11797 = vmatprep.subr.bf16.mxu0 %v14713_v56 }
 0x52d   :  { %11799 = vmatpush3.bf16.msra.mxu0 %v13257_v60 }
 0x52e   :  { %11800 = vmatprep.subr.bf16.mxu0 %v14713_v56 }
 0x531   :  { %11802 = vmatpush3.bf16.msra.mxu0 %v13261_v63 }
 0x532   :  { %v12553_v31 = vpop.eup %12552  ;;  %11803 = vmatprep.subr.bf16.mxu0 %v14713_v56 }
 0x533   :  { %v12555_v27 = vpop.eup %12554 }
 0x534   :  { %v13863_v24 = vmul.f32 %v12555_v27, %v12553_v31  ;;  %v13988_v31 = vld [vmem:[%s14656_s8] ss:$0 sm:$0xff] }
 0x535   :  { %11805 = vmatpush3.bf16.msra.mxu0 %v13265_v4  ;;  %14745 = vst [vmem:[#allocation32_spill] sm:$0xff] %v13988_v31 }
 0x536   :  { %10187 = vmatmul.mubr.msk.f32.vlgmr.msra.gmra.mrb[60].mxu1 %vm235_vm1, %v13863_v24  ;;  %11818 = vmatprep.subr.bf16.mxu0 %v14713_v56 }
 0x537   :  { %11784 = vmatpush3.bf16.msra.mxu1 %v13367_v53  ;;  %10224 = vmatprep.mubr.msk.f32.mxu1 %vm12836_vm2, %v14712_v15 }
 0x538   :  { %10244 = vmatmul.mubr.msk.f32.vlgmr.msra.gmra.mrb[56].mxu0 %vm235_vm1, %v3492_v2  ;;  %11785 = vmatprep.subr.bf16.mxu1 %v14713_v56 }
 0x539   :  { %11820 = vmatpush3.bf16.msra.mxu0 %v13269_v9  ;;  %10281 = vmatprep.mubr.msk.f32.mxu0 %vm12836_vm2, %v14712_v15 }
 0x53a   :  { %11821 = vmatprep.subr.bf16.mxu0 %v14713_v56 }
 0x53b   :  { %11787 = vmatpush3.bf16.msra.mxu1 %v13377_v62 }
 0x53c   :  { %11788 = vmatprep.subr.bf16.mxu1 %v14713_v56 }
 0x53d   :  { %11823 = vmatpush3.bf16.msra.mxu0 %v13277_v14 }
 0x53e   :  { %11824 = vmatprep.subr.bf16.mxu0 %v14713_v56 }
 0x53f   :  { %11790 = vmatpush3.bf16.msra.mxu1 %v13387_v48 }
 0x540   :  { %11791 = vmatprep.subr.bf16.mxu1 %v14713_v56 }
 0x541   :  { %11826 = vmatpush3.bf16.msra.mxu0 %v13281_v18 }
 0x542   :  { %11827 = vmatprep.subr.bf16.mxu0 %v14713_v56 }
 0x543   :  { %11793 = vmatpush3.bf16.msra.mxu1 %v13393_v5 }
 0x544   :  { %11806 = vmatprep.subr.bf16.mxu1 %v14713_v56 }
 0x545   :  { %11829 = vmatpush3.bf16.msra.mxu0 %v13285_v23 }
 0x546   :  { %10225 = vmatmul.mubr.msk.f32.vlgmr.msra.gmra.mrb[62].mxu1 %vm235_vm1, %v13863_v24  ;;  %11842 = vmatprep.subr.bf16.mxu0 %v14713_v56 }
 0x547   :  { %11808 = vmatpush3.bf16.msra.mxu1 %v13399_v12  ;;  %10262 = vmatprep.mubr.msk.f32.mxu1 %vm12836_vm2, %v14712_v15 }
 0x548   :  { %10282 = vmatmul.mubr.msk.f32.vlgmr.msra.gmra.mrb[58].mxu0 %vm235_vm1, %v3492_v2  ;;  %11809 = vmatprep.subr.bf16.mxu1 %v14713_v56  ;;  %v14743_v2 = vld [vmem:[#allocation30_spill] sm:$0xff] }
 0x549   :  { %11844 = vmatpush3.bf16.msra.mxu0 %v13069_v34  ;;  %10319 = vmatprep.mubr.msk.f32.mxu0 %vm12836_vm2, %v14712_v15 }
 0x54a   :  { %11845 = vmatprep.subr.bf16.mxu0 %v14713_v56 }
 0x54b   :  { %11811 = vmatpush3.bf16.msra.mxu1 %v13408_v21 }
 0x54c   :  { %11812 = vmatprep.subr.bf16.mxu1 %v14713_v56 }
 0x54d   :  { %11847 = vmatpush3.bf16.msra.mxu0 %v13081_v39 }
 0x54e   :  { %11848 = vmatprep.subr.bf16.mxu0 %v14713_v56 }
 0x54f   :  { %11814 = vmatpush3.bf16.msra.mxu1 %v13420_v40 }
 0x550   :  { %11815 = vmatprep.subr.bf16.mxu1 %v14713_v56 }
 0x551   :  { %11850 = vmatpush3.bf16.msra.mxu0 %v13095_v42 }
 0x552   :  { %11851 = vmatprep.subr.bf16.mxu0 %v14713_v56 }
 0x553   :  { %11817 = vmatpush3.bf16.msra.mxu1 %v13426_v51 }
 0x554   :  { %11830 = vmatprep.subr.bf16.mxu1 %v14713_v56 }
 0x555   :  { %11853 = vmatpush3.bf16.msra.mxu0 %v13107_v45 }
 0x556   :  { %10263 = vmatmul.mubr.msk.f32.vlgmr.msra.gmra.mrb[64].mxu1 %vm235_vm1, %v13863_v24  ;;  %11866 = vmatprep.subr.bf16.mxu0 %v14713_v56 }
 0x557   :  { %11832 = vmatpush3.bf16.msra.mxu1 %v13432_v20  ;;  %10300 = vmatprep.mubr.msk.f32.mxu1 %vm12836_vm2, %v14712_v15 }
 0x558   :  { %10320 = vmatmul.mubr.msk.f32.vlgmr.msra.gmra.mrb[60].mxu0 %vm235_vm1, %v13863_v24  ;;  %11833 = vmatprep.subr.bf16.mxu1 %v14713_v56 }
 0x559   :  { %11868 = vmatpush3.bf16.msra.mxu0 %v13127_v52  ;;  %10357 = vmatprep.mubr.msk.f32.mxu0 %vm12836_vm2, %v14712_v15 }
 0x55a   :  { %11869 = vmatprep.subr.bf16.mxu0 %v14713_v56 }
 0x55b   :  { %11835 = vmatpush3.bf16.msra.mxu1 %v13440_v3 }
 0x55c   :  { %11836 = vmatprep.subr.bf16.mxu1 %v14713_v56 }
 0x55d   :  { %11871 = vmatpush3.bf16.msra.mxu0 %v13140_v59 }
 0x55e   :  { %11872 = vmatprep.subr.bf16.mxu0 %v14713_v56 }
 0x55f   :  { %11838 = vmatpush3.bf16.msra.mxu1 %v13448_v26 }
 0x560   :  { %11839 = vmatprep.subr.bf16.mxu1 %v14713_v56 }
 0x561   :  { %11874 = vmatpush3.bf16.msra.mxu0 %v13154_v1 }
 0x562   :  { %11875 = vmatprep.subr.bf16.mxu0 %v14713_v56 }
 0x563   :  { %11841 = vmatpush3.bf16.msra.mxu1 %v13452_v43 }
 0x564   :  { %11854 = vmatprep.subr.bf16.mxu1 %v14713_v56 }
 0x565   :  { %11877 = vmatpush3.bf16.msra.mxu0 %v13166_v8 }
 0x566   :  { %10301 = vmatmul.mubr.msk.f32.vlgmr.msra.gmra.mrb[66].mxu1 %vm235_vm1, %v13863_v24  ;;  %11890 = vmatprep.subr.bf16.mxu0 %v14713_v56 }
 0x567   :  { %11856 = vmatpush3.bf16.msra.mxu1 %v13120_v50  ;;  %10338 = vmatprep.mubr.msk.f32.mxu1 %vm12836_vm2, %v14712_v15 }
 0x568   :  { %10358 = vmatmul.mubr.msk.f32.vlgmr.msra.gmra.mrb[62].mxu0 %vm235_vm1, %v13863_v24  ;;  %11857 = vmatprep.subr.bf16.mxu1 %v14713_v56 }
 0x569   :  { %11892 = vmatpush3.bf16.msra.mxu0 %v13208_v22  ;;  %10395 = vmatprep.mubr.msk.f32.mxu0 %vm12836_vm2, %v14712_v15 }
 0x56a   :  { %11893 = vmatprep.subr.bf16.mxu0 %v14713_v56 }
 0x56b   :  { %11859 = vmatpush3.bf16.msra.mxu1 %v13138_v58 }
 0x56c   :  { %11860 = vmatprep.subr.bf16.mxu1 %v14713_v56 }
 0x56d   :  { %11895 = vmatpush3.bf16.msra.mxu0 %v13212_v25 }
 0x56e   :  { %11896 = vmatprep.subr.bf16.mxu0 %v14713_v56 }
 0x56f   :  { %11862 = vmatpush3.bf16.msra.mxu1 %v14733_v32 }
 0x570   :  { %11863 = vmatprep.subr.bf16.mxu1 %v14713_v56 }
 0x571   :  { %11898 = vmatpush3.bf16.msra.mxu0 %v14734_v6 }
 0x572   :  { %11899 = vmatprep.subr.bf16.mxu0 %v14713_v56 }
 0x573   :  { %11865 = vmatpush3.bf16.msra.mxu1 %v14735_v37 }
 0x574   :  { %11878 = vmatprep.subr.bf16.mxu1 %v14713_v56 }
 0x575   :  { %11901 = vmatpush3.bf16.msra.mxu0 %v14736_v30 }
 0x576   :  { %10339 = vmatmul.mubr.msk.f32.vlgmr.msra.gmra.mrb[68].mxu1 %vm235_vm1, %v13863_v24  ;;  %11914 = vmatprep.subr.bf16.mxu0 %v14713_v56 }
 0x577   :  { %11880 = vmatpush3.bf16.msra.mxu1 %v14737_v33  ;;  %10376 = vmatprep.mubr.msk.f32.mxu1 %vm12836_vm2, %v14712_v15 }
 0x578   :  { %11881 = vmatprep.subr.bf16.mxu1 %v14713_v56 }
 0x57b   :  { %11883 = vmatpush3.bf16.msra.mxu1 %v14738_v28 }
 0x57c   :  { %11884 = vmatprep.subr.bf16.mxu1 %v14713_v56 }
 0x57f   :  { %11886 = vmatpush3.bf16.msra.mxu1 %v14739_v61 }
 0x580   :  { %11887 = vmatprep.subr.bf16.mxu1 %v14713_v56 }
 0x583   :  { %11889 = vmatpush3.bf16.msra.mxu1 %v14740_v16 }
 0x584   :  { %11902 = vmatprep.subr.bf16.mxu1 %v14713_v56 }
 0x586   :  { %10377 = vmatmul.mubr.msk.f32.vlgmr.msra.gmra.mrb[70].mxu1 %vm235_vm1, %v13863_v24 }
 0x587   :  { %11904 = vmatpush3.bf16.msra.mxu1 %v14741_v29  ;;  %10414 = vmatprep.mubr.msk.f32.mxu1 %vm12836_vm2, %v14712_v15 }
 0x588   :  { %11905 = vmatprep.subr.bf16.mxu1 %v14713_v56 }
 0x58b   :  { %11907 = vmatpush3.bf16.msra.mxu1 %v14742_v54 }
 0x58c   :  { %11908 = vmatprep.subr.bf16.mxu1 %v14713_v56 }
 0x58f   :  { %11910 = vmatpush3.bf16.msra.mxu1 %v14743_v2 }
 0x590   :  { %11911 = vmatprep.subr.bf16.mxu1 %v14713_v56 }
 0x593   :  { %11913 = vmatpush3.bf16.msra.mxu1 %v14744_v38 }
 0x594   :  { %11926 = vmatprep.subr.bf16.mxu1 %v14713_v56 }
 0x5eb   :  { %v3878_v17 = vpop.f32.mrb[52].mxu0 }
 0x5ec   :  { %v10169_v19 = vpop.f32.mrb[53].mxu0 }
 0x5fb   :  { %v4022_v11 = vpop.f32.mrb[54].mxu0 }
 0x5fc   :  { %v10207_v44 = vpop.f32.mrb[55].mxu0 }
 0x609   :  { %v3951_v57 = vpop.f32.mrb[60].mxu1 }
 0x60a   :  { %v3952_v13 = vadd.f32 %v3951_v57, %v3878_v17  ;;  %v10188_v7 = vpop.f32.mrb[61].mxu1  ;;  %v13994_v17 = vld [vmem:[%s14656_s8 + $0x1] ss:$0 sm:$0xff] }
 0x60b   :  { %v4163_v10 = vpop.f32.mrb[56].mxu0  ;;  %14746 = vst [vmem:[#allocation33_spill] sm:$0xff] %v13994_v17 }
 0x60c   :  { %v10245_v47 = vpop.f32.mrb[57].mxu0  ;;  %v3955_v27 = vadd.f32 %v13988_v31, %v3952_v13 }
 0x60e   :  { %v8312_v24 = vmul.f32 -1.442695, %v3955_v27 }
 0x610   :  { %12556 = vpow2.f32 %v8312_v24  ;;  %v14000_v24 = vld [vmem:[%s14656_s8 + $0x2] ss:$0 sm:$0xff] }
 0x619   :  { %v4092_v38 = vpop.f32.mrb[62].mxu1 }
 0x61a   :  { %v4093_v2 = vadd.f32 %v4092_v38, %v4022_v11  ;;  %v10226_v54 = vpop.f32.mrb[63].mxu1  ;;  %v12557_v47 = vpop.eup %12556 }
 0x61b   :  { %v4304_v19 = vpop.f32.mrb[58].mxu0  ;;  %v4382_v29 = vadd.f32 1.0, %v12557_v47  ;;  %v4404_v54 = vld [vmem:[#allocation2 + $0x20] sm:$0xff] }
 0x61c   :  { %v4096_v44 = vadd.f32 %v13994_v17, %v4093_v2  ;;  %v10283_v57 = vpop.f32.mrb[59].mxu0 }
 0x61e   :  { %v8313_v7 = vmul.f32 -1.442695, %v4096_v44 }
 0x620   :  { %12558 = vpow2.f32 %v8313_v7 }
 0x621   :  { %12560 = vrcp.f32 %v4382_v29 }
 0x629   :  { %v4233_v16 = vpop.f32.mrb[64].mxu1 }
 0x62a   :  { %v12559_v13 = vpop.eup %12558  ;;  %v4234_v27 = vadd.f32 %v4233_v16, %v4163_v10  ;;  %v10264_v31 = vpop.f32.mrb[65].mxu1 }
 0x62b   :  { %v4388_v38 = vadd.f32 1.0, %v12559_v13  ;;  %v4471_v11 = vpop.f32.mrb[60].mxu0  ;;  %v12561_v47 = vpop.eup %12560 }
 0x62c   :  { %v4237_v2 = vadd.f32 %v14000_v24, %v4234_v27  ;;  %v4475_v57 = vadd.f32 %v4471_v11, %v4404_v54  ;;  %v10321_v44 = vpop.f32.mrb[61].mxu0  ;;  %v4550_v27 = vld [vmem:[#allocation4 + $0x20] sm:$0xff] }
 0x62d   :  { %12562 = vrcp.f32 %v4388_v38  ;;  %v14009_v38 = vld [vmem:[%s14656_s8 + $0x3] ss:$0 sm:$0xff] }
 0x62e   :  { %12564 = vtanh.f32 %v4237_v2  ;;  %v8319_v7 = vmul.f32 -1.442695, %v4475_v57  ;;  %v4477_v44 = vld [vmem:[#allocation3 + $0x20] sm:$0xff] }
 0x630   :  { %12566 = vpow2.f32 %v8319_v7 }
 0x637   :  { %v12563_v16 = vpop.eup %12562 }
 0x638   :  { %v12565_v10 = vpop.eup %12564  ;;  %v4398_v31 = vmul.f32 %v12563_v16, %v13835_v36 }
 0x639   :  { %v4399_v13 = vmul.f32 %v12565_v10, %v12561_v47  ;;  %v4374_v29 = vpop.f32.mrb[66].mxu1 }
 0x63a   :  { %v12567_v17 = vpop.eup %12566  ;;  %v4375_v61 = vadd.f32 %v4374_v29, %v4304_v19  ;;  %v10302_v28 = vpop.f32.mrb[67].mxu1 }
 0x63b   :  { %v14004_v33 = vadd.f32 %v4399_v13, %v4398_v31  ;;  %v4698_v30 = vadd.f32 1.0, %v12567_v17  ;;  %v4617_v54 = vpop.f32.mrb[62].mxu0 }
 0x63c   :  { %v4378_v11 = vadd.f32 %v14009_v38, %v4375_v61  ;;  %v4621_v2 = vadd.f32 %v4617_v54, %v4550_v27  ;;  %v10359_v57 = vpop.f32.mrb[63].mxu0 }
 0x63d   :  { %12568 = vrcp.f32 %v4698_v30 }
 0x63e   :  { %v8314_v36 = vmul.f32 -1.442695, %v4378_v11  ;;  %12570 = vtanh.f32 %v4621_v2  ;;  %v4623_v11 = vld [vmem:[#allocation5 + $0x20] sm:$0xff] }
 0x640   :  { %12572 = vpow2.f32 %v8314_v36 }
 0x641   :  { %12574 = vtanh.f32 %v14004_v33 }
 0x647   :  { %v12569_v19 = vpop.eup %12568 }
 0x648   :  { %v12571_v28 = vpop.eup %12570 }
 0x649   :  { %v4544_v7 = vpop.f32.mrb[68].mxu1  ;;  %v4715_v47 = vmul.f32 %v12571_v28, %v12569_v19 }
 0x64a   :  { %v12573_v17 = vpop.eup %12572  ;;  %v4548_v16 = vadd.f32 %v4544_v7, %v4477_v44  ;;  %v10340_v10 = vpop.f32.mrb[69].mxu1 }
 0x64b   :  { %v4395_v31 = vadd.f32 1.0, %v12573_v17  ;;  %v12575_v61 = vpop.eup %12574 }
 0x64c   :  { %v8320_v13 = vmul.f32 -1.442695, %v4548_v16 }
 0x64d   :  { %12576 = vrcp.f32 %v4395_v31  ;;  %v14747_v31 = vld [vmem:[#allocation27_spill] sm:$0xff] }
 0x64e   :  { %12578 = vpow2.f32 %v8320_v13  ;;  %v14748_v13 = vld [vmem:[#allocation22_spill] sm:$0xff] }
 0x657   :  { %v12577_v29 = vpop.eup %12576 }
 0x658   :  { %v12579_v30 = vpop.eup %12578  ;;  %v4402_v27 = vmul.f32 %v12577_v29, %v12575_v61  ;;  %v14749_v61 = vld [vmem:[#allocation23_spill] sm:$0xff]  ;;  %v14750_v29 = vld [vmem:[#allocation24_spill] sm:$0xff] }
 0x659   :  { %v4704_v54 = vadd.f32 1.0, %v12579_v30  ;;  %v4690_v2 = vpop.f32.mrb[70].mxu1  ;;  %v14751_v30 = vld [vmem:[#allocation25_spill] sm:$0xff] }
 0x65a   :  { %v4694_v57 = vadd.f32 %v4690_v2, %v4623_v11  ;;  %v10378_v36 = vpop.f32.mrb[71].mxu1  ;;  %10396 = vmatmul.mubr.msk.f32.vlgmr.msra.gmra.mrb[64].mxu0 %vm235_vm1, %v4402_v27  ;;  %v14754_v11 = vld [vmem:[#allocation30_spill] sm:$0xff]  ;;  %v14755_v2 = vld [vmem:[#allocation31_spill] sm:$0xff] }
 0x65b   :  { %12580 = vrcp.f32 %v4704_v54  ;;  %11916 = vmatpush3.bf16.msra.mxu0 %v13224_v35  ;;  %10433 = vmatprep.mubr.msk.f32.mxu0 %vm12836_vm2, %v14712_v15  ;;  %v14753_v54 = vld [vmem:[#allocation29_spill] sm:$0xff] }
 0x65c   :  { %v8321_v19 = vmul.f32 -1.442695, %v4694_v57  ;;  %11917 = vmatprep.subr.bf16.mxu0 %v14713_v56 }
 0x65e   :  { %12582 = vpow2.f32 %v8321_v19 }
 0x65f   :  { %11919 = vmatpush3.bf16.msra.mxu0 %v13237_v41 }
 0x660   :  { %11920 = vmatprep.subr.bf16.mxu0 %v14713_v56 }
 0x663   :  { %11922 = vmatpush3.bf16.msra.mxu0 %v13241_v46 }
 0x664   :  { %11923 = vmatprep.subr.bf16.mxu0 %v14713_v56 }
 0x665   :  { %v12581_v28 = vpop.eup %12580 }
 0x666   :  { %v4714_v44 = vmul.f32 %v12581_v28, %v13850_v0 }
 0x667   :  { %11925 = vmatpush3.bf16.msra.mxu0 %v13245_v49 }
 0x668   :  { %v12583_v7 = vpop.eup %12582  ;;  %v14024_v17 = vadd.f32 %v4715_v47, %v4714_v44  ;;  %11938 = vmatprep.subr.bf16.mxu0 %v14713_v56 }
 0x669   :  { %v4711_v16 = vadd.f32 1.0, %v12583_v7 }
 0x66a   :  { %12584 = vtanh.f32 %v14024_v17  ;;  %10434 = vmatmul.mubr.msk.f32.vlgmr.msra.gmra.mrb[66].mxu0 %vm235_vm1, %v4402_v27 }
 0x66b   :  { %12586 = vrcp.f32 %v4711_v16  ;;  %11940 = vmatpush3.bf16.msra.mxu0 %v13249_v55  ;;  %10471 = vmatprep.mubr.msk.f32.mxu0 %vm12836_vm2, %v14712_v15 }
 0x66c   :  { %11941 = vmatprep.subr.bf16.mxu0 %v14713_v56 }
 0x66f   :  { %11943 = vmatpush3.bf16.msra.mxu0 %v13257_v60 }
 0x670   :  { %11944 = vmatprep.subr.bf16.mxu0 %v14713_v56 }
 0x673   :  { %11946 = vmatpush3.bf16.msra.mxu0 %v13261_v63 }
 0x674   :  { %v12585_v0 = vpop.eup %12584  ;;  %11947 = vmatprep.subr.bf16.mxu0 %v14713_v56 }
 0x675   :  { %v12587_v47 = vpop.eup %12586 }
 0x676   :  { %v14037_v10 = vmul.f32 %v12587_v47, %v12585_v0 }
 0x677   :  { %11949 = vmatpush3.bf16.msra.mxu0 %v13265_v4 }
 0x678   :  { %10415 = vmatmul.mubr.msk.f32.vlgmr.msra.gmra.mrb[72].mxu1 %vm235_vm1, %v14037_v10  ;;  %11962 = vmatprep.subr.bf16.mxu0 %v14713_v56 }
 0x679   :  { %11928 = vmatpush3.bf16.msra.mxu1 %v13367_v53  ;;  %10452 = vmatprep.mubr.msk.f32.mxu1 %vm12836_vm2, %v14712_v15 }
 0x67a   :  { %10472 = vmatmul.mubr.msk.f32.vlgmr.msra.gmra.mrb[68].mxu0 %vm235_vm1, %v4402_v27  ;;  %11929 = vmatprep.subr.bf16.mxu1 %v14713_v56 }
 0x67b   :  { %11964 = vmatpush3.bf16.msra.mxu0 %v13269_v9  ;;  %10509 = vmatprep.mubr.msk.f32.mxu0 %vm12836_vm2, %v14712_v15 }
 0x67c   :  { %11965 = vmatprep.subr.bf16.mxu0 %v14713_v56 }
 0x67d   :  { %11931 = vmatpush3.bf16.msra.mxu1 %v13377_v62 }
 0x67e   :  { %11932 = vmatprep.subr.bf16.mxu1 %v14713_v56 }
 0x67f   :  { %11967 = vmatpush3.bf16.msra.mxu0 %v13277_v14 }
 0x680   :  { %11968 = vmatprep.subr.bf16.mxu0 %v14713_v56 }
 0x681   :  { %11934 = vmatpush3.bf16.msra.mxu1 %v13387_v48 }
 0x682   :  { %11935 = vmatprep.subr.bf16.mxu1 %v14713_v56 }
 0x683   :  { %11970 = vmatpush3.bf16.msra.mxu0 %v13281_v18 }
 0x684   :  { %11971 = vmatprep.subr.bf16.mxu0 %v14713_v56 }
 0x685   :  { %11937 = vmatpush3.bf16.msra.mxu1 %v13393_v5 }
 0x686   :  { %11950 = vmatprep.subr.bf16.mxu1 %v14713_v56 }
 0x687   :  { %11973 = vmatpush3.bf16.msra.mxu0 %v13285_v23 }
 0x688   :  { %10453 = vmatmul.mubr.msk.f32.vlgmr.msra.gmra.mrb[74].mxu1 %vm235_vm1, %v14037_v10  ;;  %11986 = vmatprep.subr.bf16.mxu0 %v14713_v56 }
 0x689   :  { %11952 = vmatpush3.bf16.msra.mxu1 %v13399_v12  ;;  %10490 = vmatprep.mubr.msk.f32.mxu1 %vm12836_vm2, %v14712_v15 }
 0x68a   :  { %10510 = vmatmul.mubr.msk.f32.vlgmr.msra.gmra.mrb[70].mxu0 %vm235_vm1, %v4402_v27  ;;  %11953 = vmatprep.subr.bf16.mxu1 %v14713_v56  ;;  %v14752_v27 = vld [vmem:[#allocation28_spill] sm:$0xff] }
 0x68b   :  { %11988 = vmatpush3.bf16.msra.mxu0 %v13069_v34  ;;  %10547 = vmatprep.mubr.msk.f32.mxu0 %vm12836_vm2, %v14712_v15 }
 0x68c   :  { %11989 = vmatprep.subr.bf16.mxu0 %v14713_v56 }
 0x68d   :  { %11955 = vmatpush3.bf16.msra.mxu1 %v13408_v21 }
 0x68e   :  { %11956 = vmatprep.subr.bf16.mxu1 %v14713_v56 }
 0x68f   :  { %11991 = vmatpush3.bf16.msra.mxu0 %v13081_v39 }
 0x690   :  { %11992 = vmatprep.subr.bf16.mxu0 %v14713_v56 }
 0x691   :  { %11958 = vmatpush3.bf16.msra.mxu1 %v13420_v40 }
 0x692   :  { %11959 = vmatprep.subr.bf16.mxu1 %v14713_v56 }
 0x693   :  { %11994 = vmatpush3.bf16.msra.mxu0 %v13095_v42 }
 0x694   :  { %11995 = vmatprep.subr.bf16.mxu0 %v14713_v56 }
 0x695   :  { %11961 = vmatpush3.bf16.msra.mxu1 %v13426_v51 }
 0x696   :  { %11974 = vmatprep.subr.bf16.mxu1 %v14713_v56 }
 0x697   :  { %11997 = vmatpush3.bf16.msra.mxu0 %v13107_v45 }
 0x698   :  { %10491 = vmatmul.mubr.msk.f32.vlgmr.msra.gmra.mrb[76].mxu1 %vm235_vm1, %v14037_v10  ;;  %12010 = vmatprep.subr.bf16.mxu0 %v14713_v56 }
 0x699   :  { %11976 = vmatpush3.bf16.msra.mxu1 %v13432_v20  ;;  %10528 = vmatprep.mubr.msk.f32.mxu1 %vm12836_vm2, %v14712_v15 }
 0x69a   :  { %10548 = vmatmul.mubr.msk.f32.vlgmr.msra.gmra.mrb[72].mxu0 %vm235_vm1, %v14037_v10  ;;  %11977 = vmatprep.subr.bf16.mxu1 %v14713_v56 }
 0x69b   :  { %12012 = vmatpush3.bf16.msra.mxu0 %v13127_v52  ;;  %10585 = vmatprep.mubr.msk.f32.mxu0 %vm12836_vm2, %v14712_v15 }
 0x69c   :  { %12013 = vmatprep.subr.bf16.mxu0 %v14713_v56 }
 0x69d   :  { %11979 = vmatpush3.bf16.msra.mxu1 %v13440_v3 }
 0x69e   :  { %11980 = vmatprep.subr.bf16.mxu1 %v14713_v56 }
 0x69f   :  { %12015 = vmatpush3.bf16.msra.mxu0 %v13140_v59 }
 0x6a0   :  { %12016 = vmatprep.subr.bf16.mxu0 %v14713_v56 }
 0x6a1   :  { %11982 = vmatpush3.bf16.msra.mxu1 %v13448_v26 }
 0x6a2   :  { %11983 = vmatprep.subr.bf16.mxu1 %v14713_v56 }
 0x6a3   :  { %12018 = vmatpush3.bf16.msra.mxu0 %v13154_v1 }
 0x6a4   :  { %12019 = vmatprep.subr.bf16.mxu0 %v14713_v56 }
 0x6a5   :  { %11985 = vmatpush3.bf16.msra.mxu1 %v13452_v43 }
 0x6a6   :  { %11998 = vmatprep.subr.bf16.mxu1 %v14713_v56 }
 0x6a7   :  { %12021 = vmatpush3.bf16.msra.mxu0 %v13166_v8 }
 0x6a8   :  { %10529 = vmatmul.mubr.msk.f32.vlgmr.msra.gmra.mrb[78].mxu1 %vm235_vm1, %v14037_v10  ;;  %12034 = vmatprep.subr.bf16.mxu0 %v14713_v56 }
 0x6a9   :  { %12000 = vmatpush3.bf16.msra.mxu1 %v13120_v50  ;;  %10566 = vmatprep.mubr.msk.f32.mxu1 %vm12836_vm2, %v14712_v15 }
 0x6aa   :  { %10586 = vmatmul.mubr.msk.f32.vlgmr.msra.gmra.mrb[74].mxu0 %vm235_vm1, %v14037_v10  ;;  %12001 = vmatprep.subr.bf16.mxu1 %v14713_v56 }
 0x6ab   :  { %12036 = vmatpush3.bf16.msra.mxu0 %v13208_v22  ;;  %10623 = vmatprep.mubr.msk.f32.mxu0 %vm12836_vm2, %v14712_v15 }
 0x6ac   :  { %12037 = vmatprep.subr.bf16.mxu0 %v14713_v56 }
 0x6ad   :  { %12003 = vmatpush3.bf16.msra.mxu1 %v13138_v58 }
 0x6ae   :  { %12004 = vmatprep.subr.bf16.mxu1 %v14713_v56 }
 0x6af   :  { %12039 = vmatpush3.bf16.msra.mxu0 %v13212_v25 }
 0x6b0   :  { %12040 = vmatprep.subr.bf16.mxu0 %v14713_v56 }
 0x6b1   :  { %12006 = vmatpush3.bf16.msra.mxu1 %v14733_v32  ;;  %v5314_v32 = vld [vmem:[#allocation2 + $0x28] sm:$0xff] }
 0x6b2   :  { %12007 = vmatprep.subr.bf16.mxu1 %v14713_v56 }
 0x6b3   :  { %12042 = vmatpush3.bf16.msra.mxu0 %v14734_v6 }
 0x6b4   :  { %12043 = vmatprep.subr.bf16.mxu0 %v14713_v56 }
 0x6b5   :  { %12009 = vmatpush3.bf16.msra.mxu1 %v14735_v37 }
 0x6b6   :  { %12022 = vmatprep.subr.bf16.mxu1 %v14713_v56 }
 0x6b7   :  { %12045 = vmatpush3.bf16.msra.mxu0 %v14747_v31 }
 0x6b8   :  { %10567 = vmatmul.mubr.msk.f32.vlgmr.msra.gmra.mrb[80].mxu1 %vm235_vm1, %v14037_v10  ;;  %12058 = vmatprep.subr.bf16.mxu0 %v14713_v56 }
 0x6b9   :  { %12024 = vmatpush3.bf16.msra.mxu1 %v14748_v13  ;;  %10604 = vmatprep.mubr.msk.f32.mxu1 %vm12836_vm2, %v14712_v15 }
 0x6ba   :  { %12025 = vmatprep.subr.bf16.mxu1 %v14713_v56 }
 0x6bd   :  { %12027 = vmatpush3.bf16.msra.mxu1 %v14749_v61 }
 0x6be   :  { %12028 = vmatprep.subr.bf16.mxu1 %v14713_v56 }
 0x6c1   :  { %12030 = vmatpush3.bf16.msra.mxu1 %v14750_v29 }
 0x6c2   :  { %12031 = vmatprep.subr.bf16.mxu1 %v14713_v56 }
 0x6c5   :  { %12033 = vmatpush3.bf16.msra.mxu1 %v14751_v30 }
 0x6c6   :  { %12046 = vmatprep.subr.bf16.mxu1 %v14713_v56 }
 0x6c8   :  { %10605 = vmatmul.mubr.msk.f32.vlgmr.msra.gmra.mrb[82].mxu1 %vm235_vm1, %v14037_v10  ;;  %v14756_v10 = vld [vmem:[#allocation32_spill] sm:$0xff] }
 0x6c9   :  { %12048 = vmatpush3.bf16.msra.mxu1 %v14752_v27  ;;  %10642 = vmatprep.mubr.msk.f32.mxu1 %vm12836_vm2, %v14712_v15 }
 0x6ca   :  { %12049 = vmatprep.subr.bf16.mxu1 %v14713_v56 }
 0x6cd   :  { %12051 = vmatpush3.bf16.msra.mxu1 %v14753_v54 }
 0x6ce   :  { %12052 = vmatprep.subr.bf16.mxu1 %v14713_v56 }
 0x6d1   :  { %12054 = vmatpush3.bf16.msra.mxu1 %v14754_v11 }
 0x6d2   :  { %12055 = vmatprep.subr.bf16.mxu1 %v14713_v56 }
 0x6d5   :  { %12057 = vmatpush3.bf16.msra.mxu1 %v14755_v2  ;;  %v14757_v2 = vld [vmem:[#allocation33_spill] sm:$0xff] }
 0x6d6   :  { %12070 = vmatprep.subr.bf16.mxu1 %v14713_v56 }
 0x72d   :  { %v4788_v57 = vpop.f32.mrb[64].mxu0 }
 0x72e   :  { %v10397_v36 = vpop.f32.mrb[65].mxu0 }
 0x73d   :  { %v4932_v19 = vpop.f32.mrb[66].mxu0 }
 0x73e   :  { %v10435_v28 = vpop.f32.mrb[67].mxu0 }
 0x74b   :  { %v4861_v44 = vpop.f32.mrb[72].mxu1 }
 0x74c   :  { %v4862_v7 = vadd.f32 %v4861_v44, %v4788_v57  ;;  %v10416_v16 = vpop.f32.mrb[73].mxu1 }
 0x74d   :  { %v5073_v0 = vpop.f32.mrb[68].mxu0 }
 0x74e   :  { %v10473_v47 = vpop.f32.mrb[69].mxu0  ;;  %v4865_v54 = vadd.f32 %v14756_v10, %v4862_v7 }
 0x750   :  { %v8330_v27 = vmul.f32 -1.442695, %v4865_v54 }
 0x752   :  { %12588 = vpow2.f32 %v8330_v27 }
 0x75b   :  { %v5002_v30 = vpop.f32.mrb[74].mxu1 }
 0x75c   :  { %v5003_v11 = vadd.f32 %v5002_v30, %v4932_v19  ;;  %v10454_v29 = vpop.f32.mrb[75].mxu1  ;;  %v12589_v36 = vpop.eup %12588 }
 0x75d   :  { %v5214_v61 = vpop.f32.mrb[70].mxu0  ;;  %v5292_v28 = vadd.f32 1.0, %v12589_v36 }
 0x75e   :  { %v5006_v13 = vadd.f32 %v14757_v2, %v5003_v11  ;;  %v10511_v31 = vpop.f32.mrb[71].mxu0 }
 0x760   :  { %v8331_v37 = vmul.f32 -1.442695, %v5006_v13 }
 0x762   :  { %12590 = vpow2.f32 %v8331_v37 }
 0x763   :  { %12592 = vrcp.f32 %v5292_v28 }
 0x76b   :  { %v5143_v6 = vpop.f32.mrb[76].mxu1 }
 0x76c   :  { %v12591_v57 = vpop.eup %12590  ;;  %v5144_v44 = vadd.f32 %v5143_v6, %v5073_v0  ;;  %v10492_v16 = vpop.f32.mrb[77].mxu1 }
 0x76d   :  { %v5298_v47 = vadd.f32 1.0, %v12591_v57  ;;  %v5381_v7 = vpop.f32.mrb[72].mxu0  ;;  %v12593_v31 = vpop.eup %12592 }
 0x76e   :  { %v5147_v30 = vadd.f32 %v14000_v24, %v5144_v44  ;;  %v5385_v29 = vadd.f32 %v5381_v7, %v5314_v32  ;;  %v10549_v27 = vpop.f32.mrb[73].mxu0  ;;  %v5460_v44 = vld [vmem:[#allocation4 + $0x28] sm:$0xff] }
 0x76f   :  { %12594 = vrcp.f32 %v5298_v47 }
 0x770   :  { %12596 = vtanh.f32 %v5147_v30  ;;  %v8337_v54 = vmul.f32 -1.442695, %v5385_v29 }
 0x772   :  { %12598 = vpow2.f32 %v8337_v54  ;;  %v5387_v54 = vld [vmem:[#allocation3 + $0x28] sm:$0xff] }
 0x779   :  { %v12595_v37 = vpop.eup %12594 }
 0x77a   :  { %v12597_v13 = vpop.eup %12596  ;;  %v5308_v11 = vmul.f32 %v12595_v37, %v14004_v33 }
 0x77b   :  { %v5309_v19 = vmul.f32 %v12597_v13, %v12593_v31  ;;  %v5284_v6 = vpop.f32.mrb[78].mxu1 }
 0x77c   :  { %v12599_v0 = vpop.eup %12598  ;;  %v5285_v36 = vadd.f32 %v5284_v6, %v5214_v61  ;;  %v10530_v57 = vpop.f32.mrb[79].mxu1 }
 0x77d   :  { %v14163_v16 = vadd.f32 %v5309_v19, %v5308_v11  ;;  %v5608_v28 = vadd.f32 1.0, %v12599_v0  ;;  %v5527_v32 = vpop.f32.mrb[74].mxu0 }
 0x77e   :  { %v5288_v47 = vadd.f32 %v14009_v38, %v5285_v36  ;;  %v5531_v7 = vadd.f32 %v5527_v32, %v5460_v44  ;;  %v10587_v30 = vpop.f32.mrb[75].mxu0  ;;  %v5533_v32 = vld [vmem:[#allocation5 + $0x28] sm:$0xff] }
 0x77f   :  { %12600 = vrcp.f32 %v5608_v28 }
 0x780   :  { %v8332_v29 = vmul.f32 -1.442695, %v5288_v47  ;;  %12602 = vtanh.f32 %v5531_v7 }
 0x782   :  { %12604 = vpow2.f32 %v8332_v29 }
 0x783   :  { %12606 = vtanh.f32 %v14163_v16 }
 0x789   :  { %v12601_v27 = vpop.eup %12600 }
 0x78a   :  { %v12603_v33 = vpop.eup %12602 }
 0x78b   :  { %v5454_v31 = vpop.f32.mrb[80].mxu1  ;;  %v5625_v61 = vmul.f32 %v12603_v33, %v12601_v27 }
 0x78c   :  { %v12605_v37 = vpop.eup %12604  ;;  %v5458_v13 = vadd.f32 %v5454_v31, %v5387_v54  ;;  %v10568_v11 = vpop.f32.mrb[81].mxu1 }
 0x78d   :  { %v5305_v19 = vadd.f32 1.0, %v12605_v37  ;;  %v12607_v0 = vpop.eup %12606  ;;  %v14758_v11 = vld [vmem:[#allocation20_spill] sm:$0xff] }
 0x78e   :  { %v8338_v6 = vmul.f32 -1.442695, %v5458_v13 }
 0x78f   :  { %12608 = vrcp.f32 %v5305_v19  ;;  %v14759_v19 = vld [vmem:[#allocation26_spill] sm:$0xff] }
 0x790   :  { %12610 = vpow2.f32 %v8338_v6  ;;  %v14760_v6 = vld [vmem:[#allocation21_spill] sm:$0xff] }
 0x799   :  { %v12609_v36 = vpop.eup %12608 }
 0x79a   :  { %v12611_v57 = vpop.eup %12610  ;;  %v5312_v28 = vmul.f32 %v12609_v36, %v12607_v0  ;;  %v14761_v0 = vld [vmem:[#allocation27_spill] sm:$0xff]  ;;  %v14762_v36 = vld [vmem:[#allocation22_spill] sm:$0xff] }
 0x79b   :  { %v5614_v44 = vadd.f32 1.0, %v12611_v57  ;;  %v5600_v47 = vpop.f32.mrb[82].mxu1  ;;  %v14763_v57 = vld [vmem:[#allocation23_spill] sm:$0xff] }
 0x79c   :  { %v5604_v7 = vadd.f32 %v5600_v47, %v5533_v32  ;;  %v10606_v30 = vpop.f32.mrb[83].mxu1  ;;  %10624 = vmatmul.mubr.msk.f32.vlgmr.msra.gmra.mrb[76].mxu0 %vm235_vm1, %v5312_v28  ;;  %v14766_v32 = vld [vmem:[#allocation28_spill] sm:$0xff]  ;;  %v14767_v47 = vld [vmem:[#allocation29_spill] sm:$0xff] }
 0x79d   :  { %12612 = vrcp.f32 %v5614_v44  ;;  %12060 = vmatpush3.bf16.msra.mxu0 %v13224_v35  ;;  %10661 = vmatprep.mubr.msk.f32.mxu0 %vm12836_vm2, %v14712_v15  ;;  %v14765_v44 = vld [vmem:[#allocation25_spill] sm:$0xff]  ;;  %v14769_v30 = vld [vmem:[#allocation31_spill] sm:$0xff] }
 0x79e   :  { %v8339_v29 = vmul.f32 -1.442695, %v5604_v7  ;;  %12061 = vmatprep.subr.bf16.mxu0 %v14713_v56  ;;  %v14768_v7 = vld [vmem:[#allocation30_spill] sm:$0xff] }
 0x7a0   :  { %12614 = vpow2.f32 %v8339_v29 }
 0x7a1   :  { %12063 = vmatpush3.bf16.msra.mxu0 %v13237_v41 }
 0x7a2   :  { %12064 = vmatprep.subr.bf16.mxu0 %v14713_v56 }
 0x7a5   :  { %12066 = vmatpush3.bf16.msra.mxu0 %v13241_v46 }
 0x7a6   :  { %12067 = vmatprep.subr.bf16.mxu0 %v14713_v56 }
 0x7a7   :  { %v12613_v27 = vpop.eup %12612 }
 0x7a8   :  { %v5624_v33 = vmul.f32 %v12613_v27, %v14024_v17 }
 0x7a9   :  { %12069 = vmatpush3.bf16.msra.mxu0 %v13245_v49 }
 0x7aa   :  { %v12615_v54 = vpop.eup %12614  ;;  %v14178_v31 = vadd.f32 %v5625_v61, %v5624_v33  ;;  %12082 = vmatprep.subr.bf16.mxu0 %v14713_v56 }
 0x7ab   :  { %v5621_v37 = vadd.f32 1.0, %v12615_v54 }
 0x7ac   :  { %12616 = vtanh.f32 %v14178_v31  ;;  %10662 = vmatmul.mubr.msk.f32.vlgmr.msra.gmra.mrb[78].mxu0 %vm235_vm1, %v5312_v28 }
 0x7ad   :  { %12618 = vrcp.f32 %v5621_v37  ;;  %12084 = vmatpush3.bf16.msra.mxu0 %v13249_v55  ;;  %10699 = vmatprep.mubr.msk.f32.mxu0 %vm12836_vm2, %v14712_v15 }
 0x7ae   :  { %12085 = vmatprep.subr.bf16.mxu0 %v14713_v56 }
 0x7b1   :  { %12087 = vmatpush3.bf16.msra.mxu0 %v13257_v60 }
 0x7b2   :  { %12088 = vmatprep.subr.bf16.mxu0 %v14713_v56 }
 0x7b5   :  { %12090 = vmatpush3.bf16.msra.mxu0 %v13261_v63 }
 0x7b6   :  { %v12617_v17 = vpop.eup %12616  ;;  %12091 = vmatprep.subr.bf16.mxu0 %v14713_v56 }
 0x7b7   :  { %v12619_v61 = vpop.eup %12618 }
 0x7b8   :  { %v14191_v13 = vmul.f32 %v12619_v61, %v12617_v17 }
 0x7b9   :  { %12093 = vmatpush3.bf16.msra.mxu0 %v13265_v4 }
 0x7ba   :  { %10643 = vmatmul.mubr.msk.f32.vlgmr.msra.gmra.mrb[84].mxu1 %vm235_vm1, %v14191_v13  ;;  %12106 = vmatprep.subr.bf16.mxu0 %v14713_v56 }
 0x7bb   :  { %12072 = vmatpush3.bf16.msra.mxu1 %v13367_v53  ;;  %10680 = vmatprep.mubr.msk.f32.mxu1 %vm12836_vm2, %v14712_v15 }
 0x7bc   :  { %10700 = vmatmul.mubr.msk.f32.vlgmr.msra.gmra.mrb[80].mxu0 %vm235_vm1, %v5312_v28  ;;  %12073 = vmatprep.subr.bf16.mxu1 %v14713_v56 }
 0x7bd   :  { %12108 = vmatpush3.bf16.msra.mxu0 %v13269_v9  ;;  %10737 = vmatprep.mubr.msk.f32.mxu0 %vm12836_vm2, %v14712_v15 }
 0x7be   :  { %12109 = vmatprep.subr.bf16.mxu0 %v14713_v56 }
 0x7bf   :  { %12075 = vmatpush3.bf16.msra.mxu1 %v13377_v62 }
 0x7c0   :  { %12076 = vmatprep.subr.bf16.mxu1 %v14713_v56 }
 0x7c1   :  { %12111 = vmatpush3.bf16.msra.mxu0 %v13277_v14 }
 0x7c2   :  { %12112 = vmatprep.subr.bf16.mxu0 %v14713_v56 }
 0x7c3   :  { %12078 = vmatpush3.bf16.msra.mxu1 %v13387_v48 }
 0x7c4   :  { %12079 = vmatprep.subr.bf16.mxu1 %v14713_v56 }
 0x7c5   :  { %12114 = vmatpush3.bf16.msra.mxu0 %v13281_v18 }
 0x7c6   :  { %12115 = vmatprep.subr.bf16.mxu0 %v14713_v56 }
 0x7c7   :  { %12081 = vmatpush3.bf16.msra.mxu1 %v13393_v5 }
 0x7c8   :  { %12094 = vmatprep.subr.bf16.mxu1 %v14713_v56 }
 0x7c9   :  { %12117 = vmatpush3.bf16.msra.mxu0 %v13285_v23 }
 0x7ca   :  { %10681 = vmatmul.mubr.msk.f32.vlgmr.msra.gmra.mrb[86].mxu1 %vm235_vm1, %v14191_v13  ;;  %12130 = vmatprep.subr.bf16.mxu0 %v14713_v56 }
 0x7cb   :  { %12096 = vmatpush3.bf16.msra.mxu1 %v13399_v12  ;;  %10718 = vmatprep.mubr.msk.f32.mxu1 %vm12836_vm2, %v14712_v15 }
 0x7cc   :  { %10738 = vmatmul.mubr.msk.f32.vlgmr.msra.gmra.mrb[82].mxu0 %vm235_vm1, %v5312_v28  ;;  %12097 = vmatprep.subr.bf16.mxu1 %v14713_v56  ;;  %v14764_v28 = vld [vmem:[#allocation24_spill] sm:$0xff] }
 0x7cd   :  { %12132 = vmatpush3.bf16.msra.mxu0 %v13069_v34  ;;  %10775 = vmatprep.mubr.msk.f32.mxu0 %vm12836_vm2, %v14712_v15 }
 0x7ce   :  { %12133 = vmatprep.subr.bf16.mxu0 %v14713_v56 }
 0x7cf   :  { %12099 = vmatpush3.bf16.msra.mxu1 %v13408_v21 }
 0x7d0   :  { %12100 = vmatprep.subr.bf16.mxu1 %v14713_v56 }
 0x7d1   :  { %12135 = vmatpush3.bf16.msra.mxu0 %v13081_v39 }
 0x7d2   :  { %12136 = vmatprep.subr.bf16.mxu0 %v14713_v56 }
 0x7d3   :  { %12102 = vmatpush3.bf16.msra.mxu1 %v13420_v40 }
 0x7d4   :  { %12103 = vmatprep.subr.bf16.mxu1 %v14713_v56 }
 0x7d5   :  { %12138 = vmatpush3.bf16.msra.mxu0 %v13095_v42 }
 0x7d6   :  { %12139 = vmatprep.subr.bf16.mxu0 %v14713_v56 }
 0x7d7   :  { %12105 = vmatpush3.bf16.msra.mxu1 %v13426_v51 }
 0x7d8   :  { %12118 = vmatprep.subr.bf16.mxu1 %v14713_v56 }
 0x7d9   :  { %12141 = vmatpush3.bf16.msra.mxu0 %v13107_v45 }
 0x7da   :  { %10719 = vmatmul.mubr.msk.f32.vlgmr.msra.gmra.mrb[88].mxu1 %vm235_vm1, %v14191_v13  ;;  %12154 = vmatprep.subr.bf16.mxu0 %v14713_v56 }
 0x7db   :  { %12120 = vmatpush3.bf16.msra.mxu1 %v13432_v20  ;;  %10756 = vmatprep.mubr.msk.f32.mxu1 %vm12836_vm2, %v14712_v15 }
 0x7dc   :  { %10776 = vmatmul.mubr.msk.f32.vlgmr.msra.gmra.mrb[84].mxu0 %vm235_vm1, %v14191_v13  ;;  %12121 = vmatprep.subr.bf16.mxu1 %v14713_v56 }
 0x7dd   :  { %12156 = vmatpush3.bf16.msra.mxu0 %v13127_v52  ;;  %10813 = vmatprep.mubr.msk.f32.mxu0 %vm12836_vm2, %v14712_v15 }
 0x7de   :  { %12157 = vmatprep.subr.bf16.mxu0 %v14713_v56 }
 0x7df   :  { %12123 = vmatpush3.bf16.msra.mxu1 %v13440_v3 }
 0x7e0   :  { %12124 = vmatprep.subr.bf16.mxu1 %v14713_v56 }
 0x7e1   :  { %12159 = vmatpush3.bf16.msra.mxu0 %v13140_v59 }
 0x7e2   :  { %12160 = vmatprep.subr.bf16.mxu0 %v14713_v56 }
 0x7e3   :  { %12126 = vmatpush3.bf16.msra.mxu1 %v13448_v26 }
 0x7e4   :  { %12127 = vmatprep.subr.bf16.mxu1 %v14713_v56 }
 0x7e5   :  { %12162 = vmatpush3.bf16.msra.mxu0 %v13154_v1 }
 0x7e6   :  { %12163 = vmatprep.subr.bf16.mxu0 %v14713_v56 }
 0x7e7   :  { %12129 = vmatpush3.bf16.msra.mxu1 %v13452_v43 }
 0x7e8   :  { %12142 = vmatprep.subr.bf16.mxu1 %v14713_v56 }
 0x7e9   :  { %12165 = vmatpush3.bf16.msra.mxu0 %v13166_v8 }
 0x7ea   :  { %10757 = vmatmul.mubr.msk.f32.vlgmr.msra.gmra.mrb[90].mxu1 %vm235_vm1, %v14191_v13  ;;  %12178 = vmatprep.subr.bf16.mxu0 %v14713_v56 }
 0x7eb   :  { %12144 = vmatpush3.bf16.msra.mxu1 %v13120_v50  ;;  %10794 = vmatprep.mubr.msk.f32.mxu1 %vm12836_vm2, %v14712_v15 }
 0x7ec   :  { %10814 = vmatmul.mubr.msk.f32.vlgmr.msra.gmra.mrb[86].mxu0 %vm235_vm1, %v14191_v13  ;;  %12145 = vmatprep.subr.bf16.mxu1 %v14713_v56 }
 0x7ed   :  { %12180 = vmatpush3.bf16.msra.mxu0 %v13208_v22  ;;  %10851 = vmatprep.mubr.msk.f32.mxu0 %vm12836_vm2, %v14712_v15 }
 0x7ee   :  { %12181 = vmatprep.subr.bf16.mxu0 %v14713_v56 }
 0x7ef   :  { %12147 = vmatpush3.bf16.msra.mxu1 %v13138_v58 }
 0x7f0   :  { %12148 = vmatprep.subr.bf16.mxu1 %v14713_v56 }
 0x7f1   :  { %12183 = vmatpush3.bf16.msra.mxu0 %v13212_v25 }
 0x7f2   :  { %12184 = vmatprep.subr.bf16.mxu0 %v14713_v56 }
 0x7f3   :  { %12150 = vmatpush3.bf16.msra.mxu1 %v14758_v11  ;;  %v6224_v11 = vld [vmem:[#allocation2 + $0x30] sm:$0xff] }
 0x7f4   :  { %12151 = vmatprep.subr.bf16.mxu1 %v14713_v56 }
 0x7f5   :  { %12186 = vmatpush3.bf16.msra.mxu0 %v14759_v19 }
 0x7f6   :  { %12187 = vmatprep.subr.bf16.mxu0 %v14713_v56 }
 0x7f7   :  { %12153 = vmatpush3.bf16.msra.mxu1 %v14760_v6 }
 0x7f8   :  { %12166 = vmatprep.subr.bf16.mxu1 %v14713_v56 }
 0x7f9   :  { %12189 = vmatpush3.bf16.msra.mxu0 %v14761_v0 }
 0x7fa   :  { %10795 = vmatmul.mubr.msk.f32.vlgmr.msra.gmra.mrb[92].mxu1 %vm235_vm1, %v14191_v13  ;;  %12202 = vmatprep.subr.bf16.mxu0 %v14713_v56 }
 0x7fb   :  { %12168 = vmatpush3.bf16.msra.mxu1 %v14762_v36  ;;  %10832 = vmatprep.mubr.msk.f32.mxu1 %vm12836_vm2, %v14712_v15 }
 0x7fc   :  { %12169 = vmatprep.subr.bf16.mxu1 %v14713_v56 }
 0x7ff   :  { %12171 = vmatpush3.bf16.msra.mxu1 %v14763_v57 }
 0x800   :  { %12172 = vmatprep.subr.bf16.mxu1 %v14713_v56 }
 0x803   :  { %12174 = vmatpush3.bf16.msra.mxu1 %v14764_v28 }
 0x804   :  { %12175 = vmatprep.subr.bf16.mxu1 %v14713_v56 }
 0x807   :  { %12177 = vmatpush3.bf16.msra.mxu1 %v14765_v44 }
 0x808   :  { %12190 = vmatprep.subr.bf16.mxu1 %v14713_v56 }
 0x80a   :  { %10833 = vmatmul.mubr.msk.f32.vlgmr.msra.gmra.mrb[94].mxu1 %vm235_vm1, %v14191_v13 }
 0x80b   :  { %12192 = vmatpush3.bf16.msra.mxu1 %v14766_v32  ;;  %10870 = vmatprep.mubr.msk.f32.mxu1 %vm12836_vm2, %v14712_v15 }
 0x80c   :  { %12193 = vmatprep.subr.bf16.mxu1 %v14713_v56 }
 0x80f   :  { %12195 = vmatpush3.bf16.msra.mxu1 %v14767_v47 }
 0x810   :  { %12196 = vmatprep.subr.bf16.mxu1 %v14713_v56 }
 0x813   :  { %12198 = vmatpush3.bf16.msra.mxu1 %v14768_v7 }
 0x814   :  { %12199 = vmatprep.subr.bf16.mxu1 %v14713_v56 }
 0x817   :  { %12201 = vmatpush3.bf16.msra.mxu1 %v14769_v30 }
 0x818   :  { %12214 = vmatprep.subr.bf16.mxu1 %v14713_v56 }
 0x86f   :  { %v5698_v29 = vpop.f32.mrb[76].mxu0 }
 0x870   :  { %v10625_v27 = vpop.f32.mrb[77].mxu0 }
 0x87f   :  { %v5842_v33 = vpop.f32.mrb[78].mxu0 }
 0x880   :  { %v10663_v54 = vpop.f32.mrb[79].mxu0 }
 0x88d   :  { %v5771_v37 = vpop.f32.mrb[84].mxu1 }
 0x88e   :  { %v5772_v17 = vadd.f32 %v5771_v37, %v5698_v29  ;;  %v10644_v61 = vpop.f32.mrb[85].mxu1 }
 0x88f   :  { %v5983_v13 = vpop.f32.mrb[80].mxu0 }
 0x890   :  { %v10701_v32 = vpop.f32.mrb[81].mxu0  ;;  %v5775_v47 = vadd.f32 %v14756_v10, %v5772_v17 }
 0x892   :  { %v8348_v44 = vmul.f32 -1.442695, %v5775_v47 }
 0x894   :  { %12620 = vpow2.f32 %v8348_v44 }
 0x89d   :  { %v5912_v28 = vpop.f32.mrb[86].mxu1 }
 0x89e   :  { %v5913_v7 = vadd.f32 %v5912_v28, %v5842_v33  ;;  %v10682_v57 = vpop.f32.mrb[87].mxu1  ;;  %v12621_v27 = vpop.eup %12620 }
 0x89f   :  { %v6124_v36 = vpop.f32.mrb[82].mxu0  ;;  %v6202_v54 = vadd.f32 1.0, %v12621_v27 }
 0x8a0   :  { %v5916_v30 = vadd.f32 %v14757_v2, %v5913_v7  ;;  %v10739_v0 = vpop.f32.mrb[83].mxu0 }
 0x8a2   :  { %v8349_v6 = vmul.f32 -1.442695, %v5916_v30 }
 0x8a4   :  { %12622 = vpow2.f32 %v8349_v6 }
 0x8a5   :  { %12624 = vrcp.f32 %v6202_v54 }
 0x8ad   :  { %v6053_v19 = vpop.f32.mrb[88].mxu1 }
 0x8ae   :  { %v12623_v29 = vpop.eup %12622  ;;  %v6054_v37 = vadd.f32 %v6053_v19, %v5983_v13  ;;  %v10720_v61 = vpop.f32.mrb[89].mxu1 }
 0x8af   :  { %v6208_v32 = vadd.f32 1.0, %v12623_v29  ;;  %v6291_v10 = vpop.f32.mrb[84].mxu0  ;;  %v12625_v0 = vpop.eup %12624 }
 0x8b0   :  { %v6057_v28 = vadd.f32 %v14000_v24, %v6054_v37  ;;  %v6295_v57 = vadd.f32 %v6291_v10, %v6224_v11  ;;  %v10777_v44 = vpop.f32.mrb[85].mxu0  ;;  %v6370_v24 = vld [vmem:[#allocation4 + $0x30] sm:$0xff] }
 0x8b1   :  { %12626 = vrcp.f32 %v6208_v32 }
 0x8b2   :  { %12628 = vtanh.f32 %v6057_v28  ;;  %v8355_v2 = vmul.f32 -1.442695, %v6295_v57  ;;  %v6297_v28 = vld [vmem:[#allocation3 + $0x30] sm:$0xff] }
 0x8b4   :  { %12630 = vpow2.f32 %v8355_v2 }
 0x8bb   :  { %v12627_v6 = vpop.eup %12626 }
 0x8bc   :  { %v12629_v47 = vpop.eup %12628  ;;  %v6218_v7 = vmul.f32 %v12627_v6, %v14163_v16 }
 0x8bd   :  { %v6219_v30 = vmul.f32 %v12629_v47, %v12625_v0  ;;  %v6194_v19 = vpop.f32.mrb[90].mxu1 }
 0x8be   :  { %v12631_v33 = vpop.eup %12630  ;;  %v6195_v17 = vadd.f32 %v6194_v19, %v6124_v36  ;;  %v10758_v13 = vpop.f32.mrb[91].mxu1 }
 0x8bf   :  { %v14317_v27 = vadd.f32 %v6219_v30, %v6218_v7  ;;  %v6518_v54 = vadd.f32 1.0, %v12631_v33  ;;  %v6437_v11 = vpop.f32.mrb[86].mxu0 }
 0x8c0   :  { %v6198_v29 = vadd.f32 %v14009_v38, %v6195_v17  ;;  %v6441_v37 = vadd.f32 %v6437_v11, %v6370_v24  ;;  %v10815_v61 = vpop.f32.mrb[87].mxu0  ;;  %v6443_v17 = vld [vmem:[#allocation5 + $0x30] sm:$0xff] }
 0x8c1   :  { %12632 = vrcp.f32 %v6518_v54 }
 0x8c2   :  { %v8350_v32 = vmul.f32 -1.442695, %v6198_v29  ;;  %12634 = vtanh.f32 %v6441_v37 }
 0x8c4   :  { %12636 = vpow2.f32 %v8350_v32 }
 0x8c5   :  { %12638 = vtanh.f32 %v14317_v27 }
 0x8cb   :  { %v12633_v10 = vpop.eup %12632 }
 0x8cc   :  { %v12635_v16 = vpop.eup %12634 }
 0x8cd   :  { %v6364_v57 = vpop.f32.mrb[92].mxu1  ;;  %v6535_v36 = vmul.f32 %v12635_v16, %v12633_v10 }
 0x8ce   :  { %v12637_v44 = vpop.eup %12636  ;;  %v6368_v2 = vadd.f32 %v6364_v57, %v6297_v28  ;;  %v10796_v0 = vpop.f32.mrb[93].mxu1 }
 0x8cf   :  { %v6215_v6 = vadd.f32 1.0, %v12637_v44  ;;  %v12639_v38 = vpop.eup %12638 }
 0x8d0   :  { %v8356_v47 = vmul.f32 -1.442695, %v6368_v2 }
 0x8d1   :  { %12640 = vrcp.f32 %v6215_v6 }
 0x8d2   :  { %12642 = vpow2.f32 %v8356_v47 }
 0x8db   :  { %v12641_v7 = vpop.eup %12640 }
 0x8dc   :  { %v12643_v30 = vpop.eup %12642  ;;  %v6222_v19 = vmul.f32 %v12641_v7, %v12639_v38 }
 0x8dd   :  { %v6524_v33 = vadd.f32 1.0, %v12643_v30  ;;  %v6510_v13 = vpop.f32.mrb[94].mxu1  ;;  %v14470_v30 = vld [vmem:[%s14656_s8] ss:$0 sm:$0xff] }
 0x8de   :  { %v6514_v54 = vadd.f32 %v6510_v13, %v6443_v17  ;;  %v10834_v24 = vpop.f32.mrb[95].mxu1  ;;  %10852 = vmatmul.mubr.msk.f32.vlgmr.msra.gmra.mrb[88].mxu0 %vm235_vm1, %v6222_v19 }
 0x8df   :  { %12644 = vrcp.f32 %v6524_v33  ;;  %12204 = vmatpush3.bf16.msra.mxu0 %v13224_v35  ;;  %10889 = vmatprep.mubr.msk.f32.mxu0 %vm12836_vm2, %v14712_v15 }
 0x8e0   :  { %v8357_v11 = vmul.f32 -1.442695, %v6514_v54  ;;  %12205 = vmatprep.subr.bf16.mxu0 %v14713_v56 }
 0x8e2   :  { %12646 = vpow2.f32 %v8357_v11  ;;  %v14476_v11 = vld [vmem:[%s14656_s8 + $0x1] ss:$0 sm:$0xff] }
 0x8e3   :  { %12207 = vmatpush3.bf16.msra.mxu0 %v13237_v41 }
 0x8e4   :  { %12208 = vmatprep.subr.bf16.mxu0 %v14713_v56 }
 0x8e7   :  { %12210 = vmatpush3.bf16.msra.mxu0 %v13241_v46 }
 0x8e8   :  { %12211 = vmatprep.subr.bf16.mxu0 %v14713_v56 }
 0x8e9   :  { %v12645_v29 = vpop.eup %12644 }
 0x8ea   :  { %v6534_v37 = vmul.f32 %v12645_v29, %v14178_v31 }
 0x8eb   :  { %12213 = vmatpush3.bf16.msra.mxu0 %v13245_v49 }
 0x8ec   :  { %v12647_v61 = vpop.eup %12646  ;;  %v14332_v32 = vadd.f32 %v6535_v36, %v6534_v37  ;;  %12226 = vmatprep.subr.bf16.mxu0 %v14713_v56 }
 0x8ed   :  { %v6531_v10 = vadd.f32 1.0, %v12647_v61 }
 0x8ee   :  { %12648 = vtanh.f32 %v14332_v32  ;;  %10890 = vmatmul.mubr.msk.f32.vlgmr.msra.gmra.mrb[90].mxu0 %vm235_vm1, %v6222_v19 }
 0x8ef   :  { %12650 = vrcp.f32 %v6531_v10  ;;  %12228 = vmatpush3.bf16.msra.mxu0 %v13249_v55  ;;  %10927 = vmatprep.mubr.msk.f32.mxu0 %vm12836_vm2, %v14712_v15 }
 0x8f0   :  { %12229 = vmatprep.subr.bf16.mxu0 %v14713_v56 }
 0x8f3   :  { %12231 = vmatpush3.bf16.msra.mxu0 %v13257_v60 }
 0x8f4   :  { %12232 = vmatprep.subr.bf16.mxu0 %v14713_v56 }
 0x8f7   :  { %12234 = vmatpush3.bf16.msra.mxu0 %v13261_v63 }
 0x8f8   :  { %v12649_v31 = vpop.eup %12648  ;;  %12235 = vmatprep.subr.bf16.mxu0 %v14713_v56 }
 0x8f9   :  { %v12651_v16 = vpop.eup %12650 }
 0x8fa   :  { %v14345_v28 = vmul.f32 %v12651_v16, %v12649_v31 }
 0x8fb   :  { %12237 = vmatpush3.bf16.msra.mxu0 %v13265_v4 }
 0x8fc   :  { %10871 = vmatmul.mubr.msk.f32.vlgmr.msra.gmra.mrb[96].mxu1 %vm235_vm1, %v14345_v28  ;;  %12250 = vmatprep.subr.bf16.mxu0 %v14713_v56 }
 0x8fd   :  { %12216 = vmatpush3.bf16.msra.mxu1 %v13367_v53  ;;  %10908 = vmatprep.mubr.msk.f32.mxu1 %vm12836_vm2, %v14712_v15 }
 0x8fe   :  { %10928 = vmatmul.mubr.msk.f32.vlgmr.msra.gmra.mrb[92].mxu0 %vm235_vm1, %v6222_v19  ;;  %12217 = vmatprep.subr.bf16.mxu1 %v14713_v56 }
 0x8ff   :  { %12252 = vmatpush3.bf16.msra.mxu0 %v13269_v9  ;;  %10965 = vmatprep.mubr.msk.f32.mxu0 %vm12836_vm2, %v14712_v15 }
 0x900   :  { %12253 = vmatprep.subr.bf16.mxu0 %v14713_v56 }
 0x901   :  { %12219 = vmatpush3.bf16.msra.mxu1 %v13377_v62 }
 0x902   :  { %12220 = vmatprep.subr.bf16.mxu1 %v14713_v56 }
 0x903   :  { %12255 = vmatpush3.bf16.msra.mxu0 %v13277_v14 }
 0x904   :  { %12256 = vmatprep.subr.bf16.mxu0 %v14713_v56 }
 0x905   :  { %12222 = vmatpush3.bf16.msra.mxu1 %v13387_v48 }
 0x906   :  { %12223 = vmatprep.subr.bf16.mxu1 %v14713_v56 }
 0x907   :  { %12258 = vmatpush3.bf16.msra.mxu0 %v13281_v18 }
 0x908   :  { %12259 = vmatprep.subr.bf16.mxu0 %v14713_v56 }
 0x909   :  { %12225 = vmatpush3.bf16.msra.mxu1 %v13393_v5 }
 0x90a   :  { %12238 = vmatprep.subr.bf16.mxu1 %v14713_v56 }
 0x90b   :  { %12261 = vmatpush3.bf16.msra.mxu0 %v13285_v23 }
 0x90c   :  { %10909 = vmatmul.mubr.msk.f32.vlgmr.msra.gmra.mrb[98].mxu1 %vm235_vm1, %v14345_v28  ;;  %12274 = vmatprep.subr.bf16.mxu0 %v14713_v56 }
 0x90d   :  { %12240 = vmatpush3.bf16.msra.mxu1 %v13399_v12  ;;  %10946 = vmatprep.mubr.msk.f32.mxu1 %vm12836_vm2, %v14712_v15 }
 0x90e   :  { %10966 = vmatmul.mubr.msk.f32.vlgmr.msra.gmra.mrb[94].mxu0 %vm235_vm1, %v6222_v19  ;;  %12241 = vmatprep.subr.bf16.mxu1 %v14713_v56 }
 0x90f   :  { %12276 = vmatpush3.bf16.msra.mxu0 %v13069_v34  ;;  %11003 = vmatprep.mubr.msk.f32.mxu0 %vm12836_vm2, %v14712_v15  ;;  %v14770_v34 = vld [vmem:[#allocation20_spill] sm:$0xff] }
 0x910   :  { %12277 = vmatprep.subr.bf16.mxu0 %v14713_v56 }
 0x911   :  { %12243 = vmatpush3.bf16.msra.mxu1 %v13408_v21 }
 0x912   :  { %12244 = vmatprep.subr.bf16.mxu1 %v14713_v56 }
 0x913   :  { %12279 = vmatpush3.bf16.msra.mxu0 %v13081_v39  ;;  %v14771_v39 = vld [vmem:[#allocation26_spill] sm:$0xff] }
 0x914   :  { %12280 = vmatprep.subr.bf16.mxu0 %v14713_v56 }
 0x915   :  { %12246 = vmatpush3.bf16.msra.mxu1 %v13420_v40 }
 0x916   :  { %12247 = vmatprep.subr.bf16.mxu1 %v14713_v56 }
 0x917   :  { %12282 = vmatpush3.bf16.msra.mxu0 %v13095_v42  ;;  %v14772_v42 = vld [vmem:[#allocation21_spill] sm:$0xff] }
 0x918   :  { %12283 = vmatprep.subr.bf16.mxu0 %v14713_v56 }
 0x919   :  { %12249 = vmatpush3.bf16.msra.mxu1 %v13426_v51 }
 0x91a   :  { %12262 = vmatprep.subr.bf16.mxu1 %v14713_v56 }
 0x91b   :  { %12285 = vmatpush3.bf16.msra.mxu0 %v13107_v45  ;;  %v14773_v45 = vld [vmem:[#allocation27_spill] sm:$0xff] }
 0x91c   :  { %10947 = vmatmul.mubr.msk.f32.vlgmr.msra.gmra.mrb[100].mxu1 %vm235_vm1, %v14345_v28  ;;  %12298 = vmatprep.subr.bf16.mxu0 %v14713_v56 }
 0x91d   :  { %12264 = vmatpush3.bf16.msra.mxu1 %v13432_v20  ;;  %10984 = vmatprep.mubr.msk.f32.mxu1 %vm12836_vm2, %v14712_v15 }
 0x91e   :  { %11004 = vmatmul.mubr.msk.f32.vlgmr.msra.gmra.mrb[96].mxu0 %vm235_vm1, %v14345_v28  ;;  %12265 = vmatprep.subr.bf16.mxu1 %v14713_v56 }
 0x91f   :  { %12300 = vmatpush3.bf16.msra.mxu0 %v13127_v52  ;;  %11041 = vmatprep.mubr.msk.f32.mxu0 %vm12836_vm2, %v14712_v15  ;;  %v14775_v52 = vld [vmem:[#allocation23_spill] sm:$0xff] }
 0x920   :  { %12301 = vmatprep.subr.bf16.mxu0 %v14713_v56 }
 0x921   :  { %12267 = vmatpush3.bf16.msra.mxu1 %v13440_v3 }
 0x922   :  { %12268 = vmatprep.subr.bf16.mxu1 %v14713_v56 }
 0x923   :  { %12303 = vmatpush3.bf16.msra.mxu0 %v13140_v59  ;;  %v14777_v59 = vld [vmem:[#allocation25_spill] sm:$0xff] }
 0x924   :  { %12304 = vmatprep.subr.bf16.mxu0 %v14713_v56 }
 0x925   :  { %12270 = vmatpush3.bf16.msra.mxu1 %v13448_v26 }
 0x926   :  { %12271 = vmatprep.subr.bf16.mxu1 %v14713_v56 }
 0x927   :  { %12306 = vmatpush3.bf16.msra.mxu0 %v13154_v1  ;;  %v14778_v1 = vld [vmem:[#allocation28_spill] sm:$0xff] }
 0x928   :  { %12307 = vmatprep.subr.bf16.mxu0 %v14713_v56 }
 0x929   :  { %12273 = vmatpush3.bf16.msra.mxu1 %v13452_v43 }
 0x92a   :  { %12286 = vmatprep.subr.bf16.mxu1 %v14713_v56 }
 0x92b   :  { %12309 = vmatpush3.bf16.msra.mxu0 %v13166_v8  ;;  %v14779_v8 = vld [vmem:[#allocation29_spill] sm:$0xff] }
 0x92c   :  { %10985 = vmatmul.mubr.msk.f32.vlgmr.msra.gmra.mrb[102].mxu1 %vm235_vm1, %v14345_v28  ;;  %12322 = vmatprep.subr.bf16.mxu0 %v14713_v56 }
 0x92d   :  { %12288 = vmatpush3.bf16.msra.mxu1 %v13120_v50  ;;  %11022 = vmatprep.mubr.msk.f32.mxu1 %vm12836_vm2, %v14712_v15  ;;  %v14774_v50 = vld [vmem:[#allocation22_spill] sm:$0xff] }
 0x92e   :  { %11042 = vmatmul.mubr.msk.f32.vlgmr.msra.gmra.mrb[98].mxu0 %vm235_vm1, %v14345_v28  ;;  %12289 = vmatprep.subr.bf16.mxu1 %v14713_v56 }
 0x92f   :  { %12324 = vmatpush3.bf16.msra.mxu0 %v13208_v22  ;;  %11079 = vmatprep.mubr.msk.f32.mxu0 %vm12836_vm2, %v14712_v15  ;;  %v14780_v22 = vld [vmem:[#allocation30_spill] sm:$0xff] }
 0x930   :  { %12325 = vmatprep.subr.bf16.mxu0 %v14713_v56 }
 0x931   :  { %12291 = vmatpush3.bf16.msra.mxu1 %v13138_v58  ;;  %v14776_v58 = vld [vmem:[#allocation24_spill] sm:$0xff] }
 0x932   :  { %12292 = vmatprep.subr.bf16.mxu1 %v14713_v56 }
 0x933   :  { %12327 = vmatpush3.bf16.msra.mxu0 %v13212_v25  ;;  %v14781_v25 = vld [vmem:[#allocation31_spill] sm:$0xff] }
 0x934   :  { %12328 = vmatprep.subr.bf16.mxu0 %v14713_v56 }
 0x935   :  { %12294 = vmatpush3.bf16.msra.mxu1 %v14770_v34 }
 0x936   :  { %12295 = vmatprep.subr.bf16.mxu1 %v14713_v56 }
 0x937   :  { %12330 = vmatpush3.bf16.msra.mxu0 %v14771_v39 }
 0x938   :  { %12331 = vmatprep.subr.bf16.mxu0 %v14713_v56 }
 0x939   :  { %12297 = vmatpush3.bf16.msra.mxu1 %v14772_v42 }
 0x93a   :  { %12310 = vmatprep.subr.bf16.mxu1 %v14713_v56 }
 0x93b   :  { %12333 = vmatpush3.bf16.msra.mxu0 %v14773_v45  ;;  %v7134_v45 = vld [vmem:[#allocation2 + $0x38] sm:$0xff] }
 0x93c   :  { %11023 = vmatmul.mubr.msk.f32.vlgmr.msra.gmra.mrb[104].mxu1 %vm235_vm1, %v14345_v28  ;;  %12346 = vmatprep.subr.bf16.mxu0 %v14713_v56 }
 0x93d   :  { %12312 = vmatpush3.bf16.msra.mxu1 %v14774_v50  ;;  %11060 = vmatprep.mubr.msk.f32.mxu1 %vm12836_vm2, %v14712_v15 }
 0x93e   :  { %12313 = vmatprep.subr.bf16.mxu1 %v14713_v56 }
 0x941   :  { %12315 = vmatpush3.bf16.msra.mxu1 %v14775_v52  ;;  %v14482_v52 = vld [vmem:[%s14656_s8 + $0x2] ss:$0 sm:$0xff] }
 0x942   :  { %12316 = vmatprep.subr.bf16.mxu1 %v14713_v56 }
 0x945   :  { %12318 = vmatpush3.bf16.msra.mxu1 %v14776_v58 }
 0x946   :  { %12319 = vmatprep.subr.bf16.mxu1 %v14713_v56 }
 0x949   :  { %12321 = vmatpush3.bf16.msra.mxu1 %v14777_v59 }
 0x94a   :  { %12334 = vmatprep.subr.bf16.mxu1 %v14713_v56 }
 0x94c   :  { %11061 = vmatmul.mubr.msk.f32.vlgmr.msra.gmra.mrb[106].mxu1 %vm235_vm1, %v14345_v28 }
 0x94d   :  { %12336 = vmatpush3.bf16.msra.mxu1 %v14778_v1  ;;  %11098 = vmatprep.mubr.msk.f32.mxu1 %vm12836_vm2, %v14712_v15 }
 0x94e   :  { %12337 = vmatprep.subr.bf16.mxu1 %v14713_v56 }
 0x951   :  { %12339 = vmatpush3.bf16.msra.mxu1 %v14779_v8 }
 0x952   :  { %12340 = vmatprep.subr.bf16.mxu1 %v14713_v56 }
 0x955   :  { %12342 = vmatpush3.bf16.msra.mxu1 %v14780_v22 }
 0x956   :  { %12343 = vmatprep.subr.bf16.mxu1 %v14713_v56 }
 0x959   :  { %12345 = vmatpush3.bf16.msra.mxu1 %v14781_v25 }
 0x95a   :  { %12358 = vmatprep.subr.bf16.mxu1 %v14713_v56 }
 0x9b1   :  { %v6608_v57 = vpop.f32.mrb[88].mxu0 }
 0x9b2   :  { %v10853_v44 = vpop.f32.mrb[89].mxu0 }
 0x9c1   :  { %v6752_v36 = vpop.f32.mrb[90].mxu0 }
 0x9c2   :  { %v10891_v2 = vpop.f32.mrb[91].mxu0 }
 0x9cf   :  { %v6681_v0 = vpop.f32.mrb[96].mxu1 }
 0x9d0   :  { %v6682_v6 = vadd.f32 %v6681_v0, %v6608_v57  ;;  %v10872_v47 = vpop.f32.mrb[97].mxu1 }
 0x9d1   :  { %v6893_v38 = vpop.f32.mrb[92].mxu0 }
 0x9d2   :  { %v10929_v7 = vpop.f32.mrb[93].mxu0  ;;  %v6685_v19 = vadd.f32 %v14470_v30, %v6682_v6 }
 0x9d4   :  { %v8366_v33 = vmul.f32 -1.442695, %v6685_v19  ;;  %v7280_v19 = vld [vmem:[#allocation4 + $0x38] sm:$0xff] }
 0x9d6   :  { %12652 = vpow2.f32 %v8366_v33 }
 0x9df   :  { %v6822_v17 = vpop.f32.mrb[98].mxu1 }
 0x9e0   :  { %v6823_v13 = vadd.f32 %v6822_v17, %v6752_v36  ;;  %v10910_v54 = vpop.f32.mrb[99].mxu1  ;;  %v12653_v10 = vpop.eup %12652  ;;  %v14491_v17 = vld [vmem:[%s14656_s8 + $0x3] ss:$0 sm:$0xff] }
 0x9e1   :  { %v7034_v24 = vpop.f32.mrb[94].mxu0  ;;  %v7112_v31 = vadd.f32 1.0, %v12653_v10 }
 0x9e2   :  { %v6826_v29 = vadd.f32 %v14476_v11, %v6823_v13  ;;  %v10967_v37 = vpop.f32.mrb[95].mxu0 }
 0x9e4   :  { %v8367_v61 = vmul.f32 -1.442695, %v6826_v29 }
 0x9e6   :  { %12654 = vpow2.f32 %v8367_v61  ;;  %v7207_v61 = vld [vmem:[#allocation3 + $0x38] sm:$0xff] }
 0x9e7   :  { %12656 = vrcp.f32 %v7112_v31 }
 0x9ef   :  { %v6963_v16 = vpop.f32.mrb[100].mxu1 }
 0x9f0   :  { %v12655_v28 = vpop.eup %12654  ;;  %v6964_v34 = vadd.f32 %v6963_v16, %v6893_v38  ;;  %v10948_v39 = vpop.f32.mrb[101].mxu1 }
 0x9f1   :  { %v7118_v42 = vadd.f32 1.0, %v12655_v28  ;;  %v7201_v50 = vpop.f32.mrb[96].mxu0  ;;  %v12657_v22 = vpop.eup %12656 }
 0x9f2   :  { %v6967_v58 = vadd.f32 %v14482_v52, %v6964_v34  ;;  %v7205_v59 = vadd.f32 %v7201_v50, %v7134_v45  ;;  %v11005_v1 = vpop.f32.mrb[97].mxu0 }
 0x9f3   :  { %12658 = vrcp.f32 %v7118_v42 }
 0x9f4   :  { %12660 = vtanh.f32 %v6967_v58  ;;  %v8373_v8 = vmul.f32 -1.442695, %v7205_v59 }
 0x9f6   :  { %12662 = vpow2.f32 %v8373_v8  ;;  %v7353_v8 = vld [vmem:[#allocation5 + $0x38] sm:$0xff] }
 0x9fd   :  { %v12659_v25 = vpop.eup %12658 }
 0x9fe   :  { %v12661_v57 = vpop.eup %12660  ;;  %v7128_v44 = vmul.f32 %v12659_v25, %v14317_v27 }
 0x9ff   :  { %v7129_v36 = vmul.f32 %v12661_v57, %v12657_v22  ;;  %v7104_v2 = vpop.f32.mrb[102].mxu1 }
 0xa00   :  { %v12663_v0 = vpop.eup %12662  ;;  %v7105_v6 = vadd.f32 %v7104_v2, %v7034_v24  ;;  %v10986_v47 = vpop.f32.mrb[103].mxu1 }
 0xa01   :  { %v14486_v38 = vadd.f32 %v7129_v36, %v7128_v44  ;;  %v7428_v7 = vadd.f32 1.0, %v12663_v0  ;;  %v7347_v33 = vpop.f32.mrb[98].mxu0 }
 0xa02   :  { %v7108_v13 = vadd.f32 %v14491_v17, %v7105_v6  ;;  %v7351_v54 = vadd.f32 %v7347_v33, %v7280_v19  ;;  %v11043_v29 = vpop.f32.mrb[99].mxu0 }
 0xa03   :  { %12664 = vrcp.f32 %v7428_v7 }
 0xa04   :  { %v8368_v27 = vmul.f32 -1.442695, %v7108_v13  ;;  %12666 = vtanh.f32 %v7351_v54 }
 0xa06   :  { %12668 = vpow2.f32 %v8368_v27 }
 0xa07   :  { %12670 = vtanh.f32 %v14486_v38 }
 0xa0d   :  { %v12665_v24 = vpop.eup %12664 }
 0xa0e   :  { %v12667_v37 = vpop.eup %12666 }
 0xa0f   :  { %v7274_v10 = vpop.f32.mrb[104].mxu1  ;;  %v7445_v16 = vmul.f32 %v12667_v37, %v12665_v24 }
 0xa10   :  { %v12669_v31 = vpop.eup %12668  ;;  %v7278_v28 = vadd.f32 %v7274_v10, %v7207_v61  ;;  %v11024_v34 = vpop.f32.mrb[105].mxu1 }
 0xa11   :  { %v7125_v39 = vadd.f32 1.0, %v12669_v31  ;;  %v12671_v45 = vpop.eup %12670 }
 0xa12   :  { %v8374_v42 = vmul.f32 -1.442695, %v7278_v28 }
 0xa13   :  { %12672 = vrcp.f32 %v7125_v39 }
 0xa14   :  { %12674 = vpow2.f32 %v8374_v42 }
 0xa1d   :  { %v12673_v50 = vpop.eup %12672 }
 0xa1e   :  { %v12675_v58 = vpop.eup %12674  ;;  %v14495_v59 = vmul.f32 %v12673_v50, %v12671_v45 }
 0xa1f   :  { %v7434_v1 = vadd.f32 1.0, %v12675_v58  ;;  %v7420_v22 = vpop.f32.mrb[106].mxu1 }
 0xa20   :  { %v7424_v25 = vadd.f32 %v7420_v22, %v7353_v8  ;;  %v11062_v57 = vpop.f32.mrb[107].mxu1  ;;  %11080 = vmatmul.mubr.msk.f32.vlgmr.msra.gmra.mrb[100].mxu0 %vm235_vm1, %v14495_v59 }
 0xa21   :  { %12676 = vrcp.f32 %v7434_v1  ;;  %12348 = vmatpush3.bf16.msra.mxu0 %v13224_v35  ;;  %11117 = vmatprep.mubr.msk.f32.mxu0 %vm12836_vm2, %v14712_v15 }
 0xa22   :  { %v8375_v44 = vmul.f32 -1.442695, %v7424_v25  ;;  %12349 = vmatprep.subr.bf16.mxu0 %v14713_v56 }
 0xa24   :  { %12678 = vpow2.f32 %v8375_v44 }
 0xa25   :  { %12351 = vmatpush3.bf16.msra.mxu0 %v13237_v41 }
 0xa26   :  { %12352 = vmatprep.subr.bf16.mxu0 %v14713_v56 }
 0xa29   :  { %12354 = vmatpush3.bf16.msra.mxu0 %v13241_v46 }
 0xa2a   :  { %12355 = vmatprep.subr.bf16.mxu0 %v14713_v56 }
 0xa2b   :  { %v12677_v36 = vpop.eup %12676 }
 0xa2c   :  { %v7444_v2 = vmul.f32 %v12677_v36, %v14332_v32 }
 0xa2d   :  { %12357 = vmatpush3.bf16.msra.mxu0 %v13245_v49 }
 0xa2e   :  { %v12679_v35 = vpop.eup %12678  ;;  %v7446_v0 = vadd.f32 %v7445_v16, %v7444_v2  ;;  %12370 = vmatprep.subr.bf16.mxu0 %v14713_v56 }
 0xa2f   :  { %v7441_v6 = vadd.f32 1.0, %v12679_v35 }
 0xa30   :  { %12680 = vtanh.f32 %v7446_v0  ;;  %8044 = vst.msk [vmem:[#allocation14] sm:$0xff] %vm235_vm1, %v7446_v0  ;;  %11118 = vmatmul.mubr.msk.f32.vlgmr.msra.gmra.mrb[102].mxu0 %vm235_vm1, %v14495_v59 }
 0xa31   :  { %12682 = vrcp.f32 %v7441_v6  ;;  %12372 = vmatpush3.bf16.msra.mxu0 %v13249_v55  ;;  %11155 = vmatprep.mubr.msk.f32.mxu0 %vm12836_vm2, %v14712_v15  ;;  %v8049_v55 = vld [vmem:[%s14657_s9] sm:$0xff] }
 0xa32   :  { %12373 = vmatprep.subr.bf16.mxu0 %v14713_v56 }
 0xa35   :  { %12375 = vmatpush3.bf16.msra.mxu0 %v13257_v60  ;;  %v8050_v60 = vld [vmem:[%s14657_s9 + $0x8] sm:$0xff] }
 0xa36   :  { %12376 = vmatprep.subr.bf16.mxu0 %v14713_v56 }
 0xa39   :  { %12378 = vmatpush3.bf16.msra.mxu0 %v13261_v63  ;;  %v12419_v63 = vpack.c.bf16 %v8050_v60, %v8049_v55 }
 0xa3a   :  { %v12681_v41 = vpop.eup %12680  ;;  %12379 = vmatprep.subr.bf16.mxu0 %v14713_v56 }
 0xa3b   :  { %v12683_v46 = vpop.eup %12682 }
 0xa3c   :  { %v7448_v49 = vmul.f32 %v12683_v46, %v12681_v41 }
 0xa3d   :  { %12381 = vmatpush3.bf16.msra.mxu0 %v13265_v4  ;;  %v8051_v4 = vld [vmem:[%s14657_s9 + $0x10] sm:$0xff] }
 0xa3e   :  { %11099 = vmatmul.mubr.msk.f32.vlgmr.msra.gmra.mrb[108].mxu1 %vm235_vm1, %v7448_v49  ;;  %8043 = vst.msk [vmem:[#allocation13] sm:$0xff] %vm235_vm1, %v7448_v49  ;;  %12394 = vmatprep.subr.bf16.mxu0 %v14713_v56 }
 0xa3f   :  { %12360 = vmatpush3.bf16.msra.mxu1 %v13367_v53  ;;  %11136 = vmatprep.mubr.msk.f32.mxu1 %vm12836_vm2, %v14712_v15 }
 0xa40   :  { %11156 = vmatmul.mubr.msk.f32.vlgmr.msra.gmra.mrb[104].mxu0 %vm235_vm1, %v14495_v59  ;;  %12361 = vmatprep.subr.bf16.mxu1 %v14713_v56 }
 0xa41   :  { %12396 = vmatpush3.bf16.msra.mxu0 %v13269_v9  ;;  %11193 = vmatprep.mubr.msk.f32.mxu0 %vm12836_vm2, %v14712_v15  ;;  %v8052_v9 = vld [vmem:[%s14657_s9 + $0x18] sm:$0xff] }
 0xa42   :  { %12397 = vmatprep.subr.bf16.mxu0 %v14713_v56 }
 0xa43   :  { %12363 = vmatpush3.bf16.msra.mxu1 %v13377_v62  ;;  %v8055_v62 = vld [vmem:[%s14657_s9 + $0x30] sm:$0xff] }
 0xa44   :  { %12364 = vmatprep.subr.bf16.mxu1 %v14713_v56 }
 0xa45   :  { %12399 = vmatpush3.bf16.msra.mxu0 %v13277_v14  ;;  %v12422_v14 = vpack.c.bf16 %v8052_v9, %v8051_v4 }
 0xa46   :  { %12400 = vmatprep.subr.bf16.mxu0 %v14713_v56 }
 0xa47   :  { %12366 = vmatpush3.bf16.msra.mxu1 %v13387_v48  ;;  %v8056_v48 = vld [vmem:[%s14657_s9 + $0x38] sm:$0xff] }
 0xa48   :  { %12367 = vmatprep.subr.bf16.mxu1 %v14713_v56 }
 0xa49   :  { %12402 = vmatpush3.bf16.msra.mxu0 %v13281_v18  ;;  %v8053_v18 = vld [vmem:[%s14657_s9 + $0x20] sm:$0xff] }
 0xa4a   :  { %12403 = vmatprep.subr.bf16.mxu0 %v14713_v56 }
 0xa4b   :  { %12369 = vmatpush3.bf16.msra.mxu1 %v13393_v5  ;;  %v12428_v5 = vpack.c.bf16 %v8056_v48, %v8055_v62 }
 0xa4c   :  { %12382 = vmatprep.subr.bf16.mxu1 %v14713_v56 }
 0xa4d   :  { %12405 = vmatpush3.bf16.msra.mxu0 %v13285_v23  ;;  %v8054_v23 = vld [vmem:[%s14657_s9 + $0x28] sm:$0xff]  ;;  %s12838_s9 = smov [#allocation13]  }
 0xa4e   :  { %11137 = vmatmul.mubr.msk.f32.vlgmr.msra.gmra.mrb[110].mxu1 %vm235_vm1, %v7448_v49  ;;  %12418 = vmatprep.subr.bf16.mxu0 %v14713_v56  ;;  %v12425_v53 = vpack.c.bf16 %v8054_v23, %v8053_v18  ;;  %s8152_s26 = sshll.u32 %s12838_s9, 4  ;;  %s8153_s26 = int_to_ptr.vmem [resolvable:$true] %s8152_s26 }
 0xa4f   :  { %12384 = vmatpush3.bf16.msra.mxu1 %v13399_v12  ;;  %11174 = vmatprep.mubr.msk.f32.mxu1 %vm12836_vm2, %v14712_v15  ;;  %s12778_s4 = scalar_lea.vmem %s8153_s26, 256  ;;  %p12783_p11 = scmp.lt.s32.totalorder %s8153_s26, %s8153_s26 }
 0xa50   :  { %11194 = vmatmul.mubr.msk.f32.vlgmr.msra.gmra.mrb[106].mxu0 %vm235_vm1, %v14495_v59  ;;  %12385 = vmatprep.subr.bf16.mxu1 %v14713_v56  ;;  %p12779_p10 = scmp.ne.s32.totalorder %s8153_s26, %s12778_s4  ;;  %p12784_p12 = scmp.lt.s32.totalorder %s12778_s4, %s12778_s4 }
 0xa51   :  { %11231 = vmatprep.mubr.msk.f32.mxu0 %vm12836_vm2, %v14712_v15  ;;  %12420 = vmatpush3.bf16.msra.mxu0 %v12419_v63 }
 0xa52   :  { %12421 = vmatprep.subr.bf16.mxu0 %v14713_v56  ;;  %p12785_p13 = por %p12784_p12, %p12783_p11 }
 0xa53   :  { %12387 = vmatpush3.bf16.msra.mxu1 %v13408_v21 }
 0xa54   :  { %12388 = vmatprep.subr.bf16.mxu1 %v14713_v56  ;;  %p12786_p0 = pnand %p12785_p13, %p12779_p10 }
 0xa55   :  { %12423 = vmatpush3.bf16.msra.mxu0 %v12422_v14 }
 0xa56   :  { %12424 = vmatprep.subr.bf16.mxu0 %v14713_v56 }
 0xa57   :  { %12390 = vmatpush3.bf16.msra.mxu1 %v13420_v40 }
 0xa58   :  { %12391 = vmatprep.subr.bf16.mxu1 %v14713_v56 }
 0xa59   :  { %12426 = vmatpush3.bf16.msra.mxu0 %v12425_v53 }
 0xa5a   :  { %12427 = vmatprep.subr.bf16.mxu0 %v14713_v56 }
 0xa5b   :  { %12393 = vmatpush3.bf16.msra.mxu1 %v13426_v51 }
 0xa5c   :  { %12406 = vmatprep.subr.bf16.mxu1 %v14713_v56 }
 0xa5d   :  { %12429 = vmatpush3.bf16.msra.mxu0 %v12428_v5 }
 0xa5e   :  { %11175 = vmatmul.mubr.msk.f32.vlgmr.msra.gmra.mrb[112].mxu1 %vm235_vm1, %v7448_v49 }
 0xa5f   :  { %12408 = vmatpush3.bf16.msra.mxu1 %v13432_v20  ;;  %11212 = vmatprep.mubr.msk.f32.mxu1 %vm12836_vm2, %v14712_v15 }
 0xa60   :  { %12409 = vmatprep.subr.bf16.mxu1 %v14713_v56 }
 0xa63   :  { %12411 = vmatpush3.bf16.msra.mxu1 %v13440_v3 }
 0xa64   :  { %12412 = vmatprep.subr.bf16.mxu1 %v14713_v56 }
 0xa67   :  { %12414 = vmatpush3.bf16.msra.mxu1 %v13448_v26 }
 0xa68   :  { %12415 = vmatprep.subr.bf16.mxu1 %v14713_v56 }
 0xa6b   :  { %12417 = vmatpush3.bf16.msra.mxu1 %v13452_v43 }
 0xa6e   :  { %11213 = vmatmul.mubr.msk.f32.vlgmr.msra.gmra.mrb[114].mxu1 %vm235_vm1, %v7448_v49 }
 0xaf3   :  { %v7518_v12 = vpop.f32.mrb[100].mxu0 }
 0xaf4   :  { %v11081_v21 = vpop.f32.mrb[101].mxu0 }
 0xb03   :  { %v7662_v40 = vpop.f32.mrb[102].mxu0 }
 0xb04   :  { %v11119_v51 = vpop.f32.mrb[103].mxu0 }
 0xb11   :  { %v7591_v20 = vpop.f32.mrb[108].mxu1 }
 0xb12   :  { %v7592_v3 = vadd.f32 %v7591_v20, %v7518_v12  ;;  %v11100_v26 = vpop.f32.mrb[109].mxu1 }
 0xb13   :  { %v7803_v43 = vpop.f32.mrb[104].mxu0 }
 0xb14   :  { %v11157_v15 = vpop.f32.mrb[105].mxu0  ;;  %v7595_v32 = vadd.f32 %v14470_v30, %v7592_v3 }
 0xb16   :  { %v8384_v47 = vmul.f32 -1.442695, %v7595_v32 }
 0xb18   :  { %12684 = vpow2.f32 %v8384_v47 }
 0xb21   :  { %v7732_v7 = vpop.f32.mrb[110].mxu1 }
 0xb22   :  { %v7733_v19 = vadd.f32 %v7732_v7, %v7662_v40  ;;  %v11138_v33 = vpop.f32.mrb[111].mxu1  ;;  %v12685_v27 = vpop.eup %12684 }
 0xb23   :  { %v7944_v13 = vpop.f32.mrb[106].mxu0  ;;  %v8022_v24 = vadd.f32 1.0, %v12685_v27 }
 0xb24   :  { %v7736_v56 = vadd.f32 %v14476_v11, %v7733_v19  ;;  %v11195_v54 = vpop.f32.mrb[107].mxu0 }
 0xb26   :  { %v8385_v29 = vmul.f32 -1.442695, %v7736_v56 }
 0xb28   :  { %12686 = vpow2.f32 %v8385_v29 }
 0xb29   :  { %12688 = vrcp.f32 %v8022_v24 }
 0xb31   :  { %v7873_v37 = vpop.f32.mrb[112].mxu1 }
 0xb32   :  { %v12687_v61 = vpop.eup %12686  ;;  %v7874_v10 = vadd.f32 %v7873_v37, %v7803_v43  ;;  %v11176_v31 = vpop.f32.mrb[113].mxu1 }
 0xb33   :  { %v8028_v16 = vadd.f32 1.0, %v12687_v61  ;;  %v12689_v28 = vpop.eup %12688 }
 0xb34   :  { %v7877_v30 = vadd.f32 %v14482_v52, %v7874_v10 }
 0xb35   :  { %12690 = vrcp.f32 %v8028_v16 }
 0xb36   :  { %12692 = vtanh.f32 %v7877_v30 }
 0xb3f   :  { %v12691_v34 = vpop.eup %12690 }
 0xb40   :  { %v12693_v39 = vpop.eup %12692  ;;  %v8038_v11 = vmul.f32 %v12691_v34, %v14486_v38 }
 0xb41   :  { %v8039_v42 = vmul.f32 %v12693_v39, %v12689_v28  ;;  %v8014_v45 = vpop.f32.mrb[114].mxu1 }
 0xb42   :  { %v8015_v50 = vadd.f32 %v8014_v45, %v7944_v13  ;;  %v11214_v58 = vpop.f32.mrb[115].mxu1 }
 0xb43   :  { %v8040_v59 = vadd.f32 %v8039_v42, %v8038_v11 }
 0xb44   :  { %v8018_v1 = vadd.f32 %v14491_v17, %v8015_v50 }
 0xb45   :  { %8048 = vst.msk [vmem:[#allocation14 + $0x8] sm:$0xff] %vm235_vm1, %v8040_v59 }
 0xb46   :  { %v8386_v8 = vmul.f32 -1.442695, %v8018_v1 }
 0xb48   :  { %12694 = vpow2.f32 %v8386_v8 }
 0xb49   :  { %12696 = vtanh.f32 %v8040_v59 }
 0xb52   :  { %v12695_v22 = vpop.eup %12694 }
 0xb53   :  { %v8035_v52 = vadd.f32 1.0, %v12695_v22  ;;  %v12697_v25 = vpop.eup %12696 }
 0xb55   :  { %12698 = vrcp.f32 %v8035_v52 }
 0xb5f   :  { %v12699_v57 = vpop.eup %12698 }
 0xb60   :  { %v8042_v44 = vmul.f32 %v12699_v57, %v12697_v25 }
 0xb62   :  { %11232 = vmatmul.mubr.msk.f32.vlgmr.msra.gmra.mrb[108].mxu0 %vm235_vm1, %v8042_v44  ;;  %8046 = vst.msk [vmem:[#allocation13 + $0x8] sm:$0xff] %vm235_vm1, %v8042_v44 }
 0xb63   :  { %12789 = shalt.err (!%p12786_p0)
}
 0xb64   :  { %s12790_s14 = scalar_lea.hbm %s14660_s12, 256 }
 0xb65   :  { %p12791_p1 = scmp.ne.s32.totalorder %s14660_s12, %s12790_s14  ;;  %p12794_p2 = scmp.lt.u32.totalorder %s12790_s14, %s14660_s12 }
 0xb67   :  { %p12796_p3 = pnand %p12794_p2, %p12791_p1 }
 0xb69   :  { %12799 = shalt.err (!%p12796_p3)
}
 0xb6a   :  { %8158 = dma.vmem_to_hbm [thread:$0]  %s8153_s26, 256, %s14660_s12, [#allocation9], %s12832_s21, %s12832_s21, %s12833_s22  }
 0xb6b   :  { %s12800_s18 = scalar_lea.vmem %s14608_s29, 256  ;;  %p12805_p5 = scmp.lt.s32.totalorder %s14608_s29, %s14608_s29 }
 0xb6c   :  { %p12801_p4 = scmp.ne.s32.totalorder %s14608_s29, %s12800_s18  ;;  %p12806_p6 = scmp.lt.s32.totalorder %s12800_s18, %s12800_s18 }
 0xb6e   :  { %p12807_p7 = por %p12806_p6, %p12805_p5 }
 0xb70   :  { %p12808_p8 = pnand %p12807_p7, %p12801_p4 }
 0xb72   :  { %12811 = shalt.err (!%p12808_p8)
}
 0xb73   :  { %s12812_s10 = scalar_lea.hbm %s14661_s13, 256 }
 0xb74   :  { %p12813_p9 = scmp.ne.s32.totalorder %s14661_s13, %s12812_s10  ;;  %p12816_p10 = scmp.lt.u32.totalorder %s12812_s10, %s14661_s13 }
 0xb76   :  { %p12818_p11 = pnand %p12816_p10, %p12813_p9 }
 0xb78   :  { %12821 = shalt.err (!%p12818_p11)
}
 0xb79   :  { %8170 = dma.vmem_to_hbm [thread:$0]  %s14608_s29, 256, %s14661_s13, [#allocation15], %s12832_s21, %s12832_s21, %s12833_s22   ;;  %v8387_v38 = vld [vmem:[#allocation6] ss:$0 sm:$0xff]  ;;  %vm8143_vm3 = vcmask 7168  }
 0xc35   :  { %v8133_v17 = vpop.f32.mrb[108].mxu0 }
 0xc36   :  { %v8134_v36 = vadd.f32 %v8387_v38, %v8133_v17  ;;  %v11233_v2 = vpop.f32.mrb[109].mxu0 }
 0xc38   :  { %v8389_v35 = vmul.f32 -1.442695, %v8134_v36 }
 0xc3a   :  { %12700 = vpow2.f32 %v8389_v35 }
 0xc44   :  { %v12701_v0 = vpop.eup %12700 }
 0xc45   :  { %v8140_v6 = vadd.f32 1.0, %v12701_v0 }
 0xc47   :  { %12702 = vrcp.f32 %v8140_v6 }
 0xc51   :  { %v12703_v41 = vpop.eup %12702 }
 0xc52   :  { %8144 = vst.msk [vmem:[%s14659_s11] sm:$0xff] %vm8143_vm3, %v12703_v41 }
 0xc53   :  { %12826 = dma.done.wait [#allocation9], 256  }
 0xc54   :  { %12827 = vsyncadd [#allocation9], 4294967040 }
 0xc55   :  { %12828 = dma.done.wait [#allocation15], 256  }
 0xc56   :  { %12829 = vsyncadd [#allocation15], 4294967040 }
 0xc57   :  { %8179 = vsyncpa [#allocation8], 1 }
 0xc58   :  { %8180 = vsyncpa [#allocation11], 1 }
 0xc59   :  { %8181 = vsyncpa [#allocation9], 1 }
 0xc5a   :  { %8182 = vsyncpa [#allocation15], 1 }

</bundles_post_ra>
